<compile_context>
chip_gen: v7x
topology: tpu7x:2x2x1
jax: 0.10.0
libtpu: 0.0.40
codegen_flags: <defaults>
</compile_context>

<pallas_src>
import math

import jax
import jax.numpy as jnp
from jax.experimental import pallas as pl
from jax.experimental.pallas import tpu as pltpu

# ---- model dims (x_dim=784 forced by x.view(-1, 784)) ----
X_DIM = 784
XP = 896            # 7 * 128: lane-padded feature dim
H1 = 256
H2 = 128
Z_DIM = 16
TILE_M = 128        # batch rows per grid step


def cvae_kernel(x_ref, eps_ref, lab_ref,
                w1_ref, b1_ref, w2_ref, b2_ref,
                w3_ref, b3_ref,
                w4z_ref, w4l_ref, b4_ref,
                w5_ref, b5_ref, w6_ref, b6_ref,
                recon_ref, muvar_ref):
    bf16 = jnp.bfloat16

    # ----- encoder (bf16 MXU operands, f32 accumulation, f32 elementwise) -----
    x = x_ref[...].astype(bf16)                                     # (TM, XP)
    h1 = jnp.dot(x, w1_ref[...], preferred_element_type=jnp.float32) + b1_ref[...]
    h1 = jnp.maximum(h1, 0.0)
    h2 = jnp.dot(h1.astype(bf16), w2_ref[...],
                 preferred_element_type=jnp.float32) + b2_ref[...]
    h2 = jnp.maximum(h2, 0.0)

    # fused mu / log_var heads: one (H2, 2*Z_DIM) matmul
    muvar = jnp.dot(h2.astype(bf16), w3_ref[...],
                    preferred_element_type=jnp.float32) + b3_ref[...]
    mu = muvar[:, :Z_DIM]
    log_var = muvar[:, Z_DIM:]

    # ----- reparameterization: z = eps * exp(0.5*log_var) + mu (f32) -----
    std = jnp.exp(0.5 * log_var)
    z = eps_ref[...] * std + mu

    # ----- decoder -----
    # concat(z, label) @ W4 == z @ W4[:z_dim] + label * W4[z_dim]
    h4 = jnp.dot(z.astype(bf16), w4z_ref[...],
                 preferred_element_type=jnp.float32)
    h4 = h4 + lab_ref[...] * w4l_ref[...] + b4_ref[...]
    h4 = jnp.maximum(h4, 0.0)
    h5 = jnp.dot(h4.astype(bf16), w5_ref[...],
                 preferred_element_type=jnp.float32) + b5_ref[...]
    h5 = jnp.maximum(h5, 0.0)
    logits = jnp.dot(h5.astype(bf16), w6_ref[...],
                     preferred_element_type=jnp.float32) + b6_ref[...]

    recon_ref[...] = jax.nn.sigmoid(logits)
    muvar_ref[...] = muvar


def init_params(key):
    """PyTorch-style Linear init: U(-1/sqrt(fan_in), 1/sqrt(fan_in)).
    Weights stored as (in, out) (transposed vs torch), f32 master copy."""
    def linear(k, fan_in, fan_out):
        kw, kb = jax.random.split(k)
        bound = 1.0 / jnp.sqrt(fan_in)
        w = jax.random.uniform(kw, (fan_in, fan_out), jnp.float32, -bound, bound)
        b = jax.random.uniform(kb, (1, fan_out), jnp.float32, -bound, bound)
        return w, b

    ks = jax.random.split(key, 7)
    p = {}
    p["w1"], p["b1"] = linear(ks[0], X_DIM, H1)
    p["w2"], p["b2"] = linear(ks[1], H1, H2)
    p["w31"], p["b31"] = linear(ks[2], H2, Z_DIM)
    p["w32"], p["b32"] = linear(ks[3], H2, Z_DIM)
    p["w4"], p["b4"] = linear(ks[4], Z_DIM + 1, H2)
    p["w5"], p["b5"] = linear(ks[5], H2, H1)
    p["w6"], p["b6"] = linear(ks[6], H1, X_DIM)
    return p


def pack_params(p):
    """bf16 weights (halved DMA), fused mu/logvar head, 784->896 lane padding,
    fc4 split into z-rows (matmul) + label-row (elementwise)."""
    bf16 = jnp.bfloat16
    w1p = jnp.zeros((XP, H1), bf16).at[:X_DIM, :].set(p["w1"].astype(bf16))
    w3 = jnp.concatenate([p["w31"], p["w32"]], axis=1).astype(bf16)      # (H2, 2Z)
    b3 = jnp.concatenate([p["b31"], p["b32"]], axis=1)                   # (1, 2Z) f32
    w4z = p["w4"][:Z_DIM, :].astype(bf16)                                # (Z, H2)
    w4l = p["w4"][Z_DIM:, :].astype(jnp.float32)                         # (1, H2) f32
    w6p = jnp.zeros((H1, XP), bf16).at[:, :X_DIM].set(p["w6"].astype(bf16))
    b6p = jnp.zeros((1, XP), jnp.float32).at[:, :X_DIM].set(p["b6"])
    return dict(
        w1=w1p, b1=p["b1"],
        w2=p["w2"].astype(bf16), b2=p["b2"],
        w3=w3, b3=b3,
        w4z=w4z, w4l=w4l, b4=p["b4"],
        w5=p["w5"].astype(bf16), b5=p["b5"],
        w6=w6p, b6=b6p,
    )


def cvae_forward(x, labels, eps, packed):
    """x: (B,1,28,28) or (B,784); labels: (B,); eps: (B, Z_DIM) ~ N(0,1)."""
    x2d = x.reshape(-1, X_DIM).astype(jnp.float32)
    B = x2d.shape[0]
    b_pad = ((B + TILE_M - 1) // TILE_M) * TILE_M

    xp = jnp.zeros((b_pad, XP), jnp.float32).at[:B, :X_DIM].set(x2d)
    epsp = jnp.zeros((b_pad, Z_DIM), jnp.float32).at[:B, :].set(
        eps.astype(jnp.float32))
    labp = jnp.zeros((b_pad, 1), jnp.float32).at[:B, :].set(
        labels.reshape(-1, 1).astype(jnp.float32))

    inputs = (xp, epsp, labp,
              packed["w1"], packed["b1"], packed["w2"], packed["b2"],
              packed["w3"], packed["b3"],
              packed["w4z"], packed["w4l"], packed["b4"],
              packed["w5"], packed["b5"], packed["w6"], packed["b6"])

    grid = (b_pad // TILE_M,)

    def batch_spec(cols):                     # tiled along the batch grid axis
        return pl.BlockSpec((TILE_M, cols), lambda i: (i, 0))

    def weight_spec(arr):                     # constant index -> VMEM-resident
        return pl.BlockSpec(arr.shape, lambda i: (0, 0))

    in_specs = [batch_spec(XP), batch_spec(Z_DIM), batch_spec(1)] + \
               [weight_spec(a) for a in inputs[3:]]
    out_specs = (batch_spec(XP), batch_spec(2 * Z_DIM))
    out_shape = (jax.ShapeDtypeStruct((b_pad, XP), jnp.float32),
                 jax.ShapeDtypeStruct((b_pad, 2 * Z_DIM), jnp.float32))

    flops = 2 * b_pad * (XP * H1 + H1 * H2 + H2 * 2 * Z_DIM
                         + Z_DIM * H2 + H2 * H1 + H1 * XP)
    transcendentals = b_pad * (Z_DIM + XP)               # exp + sigmoid
    bytes_accessed = (sum(a.size * a.dtype.itemsize for a in inputs)
                      + sum(math.prod(s.shape) * s.dtype.itemsize
                            for s in out_shape))

    recon_p, muvar_p = pl.pallas_call(
        cvae_kernel,
        grid=grid,
        in_specs=in_specs,
        out_specs=out_specs,
        out_shape=out_shape,
        compiler_params=pltpu.CompilerParams(
            dimension_semantics=("parallel",)),
        cost_estimate=pl.CostEstimate(flops=flops,
                                      transcendentals=transcendentals,
                                      bytes_accessed=bytes_accessed),
    )(*inputs)

    recon = recon_p[:B, :X_DIM]
    mu = muvar_p[:B, :Z_DIM]
    log_var = muvar_p[:B, Z_DIM:]
    return recon, mu, log_var


def cvae_forward_ref_packed(x, labels, eps, packed):
    """Pure-JAX reference with the same bf16-operand / f32-accum math."""
    bf16 = jnp.bfloat16
    x2d = x.reshape(-1, X_DIM).astype(jnp.float32)
    lab = labels.reshape(-1, 1).astype(jnp.float32)
    xb = jnp.pad(x2d, ((0, 0), (0, XP - X_DIM))).astype(bf16)
    h1 = jnp.maximum(jnp.dot(xb, packed["w1"],
                             preferred_element_type=jnp.float32) + packed["b1"], 0.0)
    h2 = jnp.maximum(jnp.dot(h1.astype(bf16), packed["w2"],
                             preferred_element_type=jnp.float32) + packed["b2"], 0.0)
    muvar = jnp.dot(h2.astype(bf16), packed["w3"],
                    preferred_element_type=jnp.float32) + packed["b3"]
    mu, log_var = muvar[:, :Z_DIM], muvar[:, Z_DIM:]
    z = eps * jnp.exp(0.5 * log_var) + mu
    h4 = jnp.dot(z.astype(bf16), packed["w4z"],
                 preferred_element_type=jnp.float32) + lab * packed["w4l"] + packed["b4"]
    h4 = jnp.maximum(h4, 0.0)
    h5 = jnp.maximum(jnp.dot(h4.astype(bf16), packed["w5"],
                             preferred_element_type=jnp.float32) + packed["b5"], 0.0)
    logits = jnp.dot(h5.astype(bf16), packed["w6"],
                     preferred_element_type=jnp.float32) + packed["b6"]
    return jax.nn.sigmoid(logits)[:, :X_DIM], mu, log_var


def cvae_forward_ref_f32(x, labels, eps, params):
    """Full-f32 reference matching the original torch forward."""
    x2d = x.reshape(-1, X_DIM).astype(jnp.float32)
    lab = labels.reshape(-1, 1).astype(jnp.float32)
    h = jax.nn.relu(x2d @ params["w1"] + params["b1"])
    h = jax.nn.relu(h @ params["w2"] + params["b2"])
    mu = h @ params["w31"] + params["b31"]
    log_var = h @ params["w32"] + params["b32"]
    z = eps * jnp.exp(0.5 * log_var) + mu
    z_cond = jnp.concatenate([z, lab], axis=-1)
    h = jax.nn.relu(z_cond @ params["w4"] + params["b4"])
    h = jax.nn.relu(h @ params["w5"] + params["b5"])
    recon = jax.nn.sigmoid(h @ params["w6"] + params["b6"])
    return recon, mu, log_var


if __name__ == "__main__":
    key = jax.random.PRNGKey(0)
    k_params, k_x, k_lab, k_eps = jax.random.split(key, 4)

    params = init_params(k_params)
    packed = pack_params(params)

    BATCH = 256   # two 128-row batch tiles -> exercises the grid / megacore path
    x = jax.random.uniform(k_x, (BATCH, 1, 28, 28), jnp.float32)      # MNIST-like NCHW
    labels = jax.random.randint(k_lab, (BATCH,), 0, 10).astype(jnp.float32)
    # eps plays the role of torch.randn_like(std); drawn outside the kernel
    # for determinism and passed in.
    eps = jax.random.normal(k_eps, (BATCH, Z_DIM), jnp.float32)

    fwd = jax.jit(cvae_forward)
    recon, mu, log_var = jax.block_until_ready(fwd(x, labels, eps, packed))

    # check vs a reference using identical bf16-operand math
    r_ref, mu_ref, lv_ref = cvae_forward_ref_packed(x, labels, eps, packed)
    assert recon.shape == (BATCH, X_DIM) and mu.shape == (BATCH, Z_DIM)
    assert jnp.allclose(recon, r_ref, atol=1e-2, rtol=1e-2)
    assert jnp.allclose(mu, mu_ref, atol=1e-2, rtol=1e-2)
    assert jnp.allclose(log_var, lv_ref, atol=1e-2, rtol=1e-2)

    # sanity vs full-f32 math (looser tolerance due to bf16 weight operands)
    r32, mu32, lv32 = cvae_forward_ref_f32(x, labels, eps, params)
    assert jnp.allclose(recon, r32, atol=5e-2, rtol=5e-2)
    assert jnp.allclose(mu, mu32, atol=5e-2, rtol=5e-2)
    assert jnp.allclose(log_var, lv32, atol=5e-2, rtol=5e-2)

    print("KERNEL_OK")
</pallas_src>

<mosaic_0001>
module attributes {stable_mosaic.version = 11 : i64} {
  func.func @cvae_kernel(%arg0: i32, %arg1: memref<128x896xf32, #tpu.memory_space<vmem>>, %arg2: memref<128x16xf32, #tpu.memory_space<vmem>>, %arg3: memref<128x1xf32, #tpu.memory_space<vmem>>, %arg4: memref<896x256xbf16, #tpu.memory_space<vmem>>, %arg5: memref<1x256xf32, #tpu.memory_space<vmem>>, %arg6: memref<256x128xbf16, #tpu.memory_space<vmem>>, %arg7: memref<1x128xf32, #tpu.memory_space<vmem>>, %arg8: memref<128x32xbf16, #tpu.memory_space<vmem>>, %arg9: memref<1x32xf32, #tpu.memory_space<vmem>>, %arg10: memref<16x128xbf16, #tpu.memory_space<vmem>>, %arg11: memref<1x128xf32, #tpu.memory_space<vmem>>, %arg12: memref<1x128xf32, #tpu.memory_space<vmem>>, %arg13: memref<128x256xbf16, #tpu.memory_space<vmem>>, %arg14: memref<1x256xf32, #tpu.memory_space<vmem>>, %arg15: memref<256x896xbf16, #tpu.memory_space<vmem>>, %arg16: memref<1x896xf32, #tpu.memory_space<vmem>>, %arg17: memref<128x896xf32, #tpu.memory_space<vmem>>, %arg18: memref<128x32xf32, #tpu.memory_space<vmem>>) attributes {dimension_semantics = [#tpu.dimension_semantics<parallel>], iteration_bounds = array<i64: 2>, scalar_prefetch = 0 : i64, scratch_operands = 0 : i64, tpu.core_type = #tpu.core_type<tc>, window_params = [{transform_indices = @transform_0, window_bounds = array<i64: 128, 896>}, {transform_indices = @transform_1, window_bounds = array<i64: 128, 16>}, {transform_indices = @transform_2, window_bounds = array<i64: 128, 1>}, {pipeline_mode = #tpu.pipeline_mode<synchronous>, transform_indices = @transform_3, window_bounds = array<i64: 896, 256>}, {pipeline_mode = #tpu.pipeline_mode<synchronous>, transform_indices = @transform_4, window_bounds = array<i64: 1, 256>}, {pipeline_mode = #tpu.pipeline_mode<synchronous>, transform_indices = @transform_5, window_bounds = array<i64: 256, 128>}, {pipeline_mode = #tpu.pipeline_mode<synchronous>, transform_indices = @transform_6, window_bounds = array<i64: 1, 128>}, {pipeline_mode = #tpu.pipeline_mode<synchronous>, transform_indices = @transform_7, window_bounds = array<i64: 128, 32>}, {pipeline_mode = #tpu.pipeline_mode<synchronous>, transform_indices = @transform_8, window_bounds = array<i64: 1, 32>}, {pipeline_mode = #tpu.pipeline_mode<synchronous>, transform_indices = @transform_9, window_bounds = array<i64: 16, 128>}, {pipeline_mode = #tpu.pipeline_mode<synchronous>, transform_indices = @transform_10, window_bounds = array<i64: 1, 128>}, {pipeline_mode = #tpu.pipeline_mode<synchronous>, transform_indices = @transform_11, window_bounds = array<i64: 1, 128>}, {pipeline_mode = #tpu.pipeline_mode<synchronous>, transform_indices = @transform_12, window_bounds = array<i64: 128, 256>}, {pipeline_mode = #tpu.pipeline_mode<synchronous>, transform_indices = @transform_13, window_bounds = array<i64: 1, 256>}, {pipeline_mode = #tpu.pipeline_mode<synchronous>, transform_indices = @transform_14, window_bounds = array<i64: 256, 896>}, {pipeline_mode = #tpu.pipeline_mode<synchronous>, transform_indices = @transform_15, window_bounds = array<i64: 1, 896>}, {transform_indices = @transform_16, window_bounds = array<i64: 128, 896>}, {transform_indices = @transform_17, window_bounds = array<i64: 128, 32>}]} {
    %c0 = arith.constant 0 : index
    %c0_0 = arith.constant 0 : index
    %0 = vector.load %arg1[%c0, %c0_0] : memref<128x896xf32, #tpu.memory_space<vmem>>, vector<128x896xf32>
    %1 = arith.truncf %0 : vector<128x896xf32> to vector<128x896xbf16>
    %c0_1 = arith.constant 0 : index
    %c0_2 = arith.constant 0 : index
    %2 = vector.load %arg4[%c0_1, %c0_2] : memref<896x256xbf16, #tpu.memory_space<vmem>>, vector<896x256xbf16>
    %cst = arith.constant dense<0.000000e+00> : vector<128x256xf32>
    %3 = tpu.matmul %1, %2, %cst {dimension_numbers = #tpu.dot_dimension_numbers<[1], [0], [0], [1], [0, 0, 1, 1], [], []>} : vector<128x896xbf16>, vector<896x256xbf16>, vector<128x256xf32> -> vector<128x256xf32>
    %c0_3 = arith.constant 0 : index
    %c0_4 = arith.constant 0 : index
    %4 = vector.load %arg5[%c0_3, %c0_4] : memref<1x256xf32, #tpu.memory_space<vmem>>, vector<1x256xf32>
    %5 = vector.broadcast %4 : vector<1x256xf32> to vector<128x256xf32>
    %6 = arith.addf %3, %5 : vector<128x256xf32>
    %cst_5 = arith.constant 0.000000e+00 : f32
    %7 = vector.broadcast %cst_5 : f32 to vector<128x256xf32>
    %8 = arith.maximumf %6, %7 : vector<128x256xf32>
    %9 = arith.truncf %8 : vector<128x256xf32> to vector<128x256xbf16>
    %c0_6 = arith.constant 0 : index
    %c0_7 = arith.constant 0 : index
    %10 = vector.load %arg6[%c0_6, %c0_7] : memref<256x128xbf16, #tpu.memory_space<vmem>>, vector<256x128xbf16>
    %cst_8 = arith.constant dense<0.000000e+00> : vector<128x128xf32>
    %11 = tpu.matmul %9, %10, %cst_8 {dimension_numbers = #tpu.dot_dimension_numbers<[1], [0], [0], [1], [0, 0, 1, 1], [], []>} : vector<128x256xbf16>, vector<256x128xbf16>, vector<128x128xf32> -> vector<128x128xf32>
    %c0_9 = arith.constant 0 : index
    %c0_10 = arith.constant 0 : index
    %12 = vector.load %arg7[%c0_9, %c0_10] : memref<1x128xf32, #tpu.memory_space<vmem>>, vector<1x128xf32>
    %13 = vector.broadcast %12 : vector<1x128xf32> to vector<128x128xf32>
    %14 = arith.addf %11, %13 : vector<128x128xf32>
    %cst_11 = arith.constant 0.000000e+00 : f32
    %15 = vector.broadcast %cst_11 : f32 to vector<128x128xf32>
    %16 = arith.maximumf %14, %15 : vector<128x128xf32>
    %17 = arith.truncf %16 : vector<128x128xf32> to vector<128x128xbf16>
    %c0_12 = arith.constant 0 : index
    %c0_13 = arith.constant 0 : index
    %18 = vector.load %arg8[%c0_12, %c0_13] : memref<128x32xbf16, #tpu.memory_space<vmem>>, vector<128x32xbf16>
    %cst_14 = arith.constant dense<0.000000e+00> : vector<128x32xf32>
    %19 = tpu.matmul %17, %18, %cst_14 {dimension_numbers = #tpu.dot_dimension_numbers<[1], [0], [0], [1], [0, 0, 1, 1], [], []>} : vector<128x128xbf16>, vector<128x32xbf16>, vector<128x32xf32> -> vector<128x32xf32>
    %c0_15 = arith.constant 0 : index
    %c0_16 = arith.constant 0 : index
    %20 = vector.load %arg9[%c0_15, %c0_16] : memref<1x32xf32, #tpu.memory_space<vmem>>, vector<1x32xf32>
    %21 = vector.broadcast %20 : vector<1x32xf32> to vector<128x32xf32>
    %22 = arith.addf %19, %21 : vector<128x32xf32>
    %23 = vector.extract_strided_slice %22 {offsets = [0, 0], sizes = [128, 16], strides = [1, 1]} : vector<128x32xf32> to vector<128x16xf32>
    %24 = vector.extract_strided_slice %22 {offsets = [0, 16], sizes = [128, 16], strides = [1, 1]} : vector<128x32xf32> to vector<128x16xf32>
    %cst_17 = arith.constant 5.000000e-01 : f32
    %25 = vector.broadcast %cst_17 : f32 to vector<128x16xf32>
    %26 = arith.mulf %25, %24 : vector<128x16xf32>
    %27 = math.exp %26 : vector<128x16xf32>
    %c0_18 = arith.constant 0 : index
    %c0_19 = arith.constant 0 : index
    %28 = vector.load %arg2[%c0_18, %c0_19] : memref<128x16xf32, #tpu.memory_space<vmem>>, vector<128x16xf32>
    %29 = arith.mulf %28, %27 : vector<128x16xf32>
    %30 = arith.addf %29, %23 : vector<128x16xf32>
    %31 = arith.truncf %30 : vector<128x16xf32> to vector<128x16xbf16>
    %c0_20 = arith.constant 0 : index
    %c0_21 = arith.constant 0 : index
    %32 = vector.load %arg10[%c0_20, %c0_21] : memref<16x128xbf16, #tpu.memory_space<vmem>>, vector<16x128xbf16>
    %cst_22 = arith.constant dense<0.000000e+00> : vector<128x128xf32>
    %33 = tpu.matmul %31, %32, %cst_22 {dimension_numbers = #tpu.dot_dimension_numbers<[1], [0], [0], [1], [0, 0, 1, 1], [], []>} : vector<128x16xbf16>, vector<16x128xbf16>, vector<128x128xf32> -> vector<128x128xf32>
    %c0_23 = arith.constant 0 : index
    %c0_24 = arith.constant 0 : index
    %34 = vector.load %arg3[%c0_23, %c0_24] : memref<128x1xf32, #tpu.memory_space<vmem>>, vector<128x1xf32>
    %c0_25 = arith.constant 0 : index
    %c0_26 = arith.constant 0 : index
    %35 = vector.load %arg11[%c0_25, %c0_26] : memref<1x128xf32, #tpu.memory_space<vmem>>, vector<1x128xf32>
    %36 = vector.broadcast %34 : vector<128x1xf32> to vector<128x128xf32>
    %37 = vector.broadcast %35 : vector<1x128xf32> to vector<128x128xf32>
    %38 = arith.mulf %36, %37 : vector<128x128xf32>
    %39 = arith.addf %33, %38 : vector<128x128xf32>
    %c0_27 = arith.constant 0 : index
    %c0_28 = arith.constant 0 : index
    %40 = vector.load %arg12[%c0_27, %c0_28] : memref<1x128xf32, #tpu.memory_space<vmem>>, vector<1x128xf32>
    %41 = vector.broadcast %40 : vector<1x128xf32> to vector<128x128xf32>
    %42 = arith.addf %39, %41 : vector<128x128xf32>
    %cst_29 = arith.constant 0.000000e+00 : f32
    %43 = vector.broadcast %cst_29 : f32 to vector<128x128xf32>
    %44 = arith.maximumf %42, %43 : vector<128x128xf32>
    %45 = arith.truncf %44 : vector<128x128xf32> to vector<128x128xbf16>
    %c0_30 = arith.constant 0 : index
    %c0_31 = arith.constant 0 : index
    %46 = vector.load %arg13[%c0_30, %c0_31] : memref<128x256xbf16, #tpu.memory_space<vmem>>, vector<128x256xbf16>
    %cst_32 = arith.constant dense<0.000000e+00> : vector<128x256xf32>
    %47 = tpu.matmul %45, %46, %cst_32 {dimension_numbers = #tpu.dot_dimension_numbers<[1], [0], [0], [1], [0, 0, 1, 1], [], []>} : vector<128x128xbf16>, vector<128x256xbf16>, vector<128x256xf32> -> vector<128x256xf32>
    %c0_33 = arith.constant 0 : index
    %c0_34 = arith.constant 0 : index
    %48 = vector.load %arg14[%c0_33, %c0_34] : memref<1x256xf32, #tpu.memory_space<vmem>>, vector<1x256xf32>
    %49 = vector.broadcast %48 : vector<1x256xf32> to vector<128x256xf32>
    %50 = arith.addf %47, %49 : vector<128x256xf32>
    %cst_35 = arith.constant 0.000000e+00 : f32
    %51 = vector.broadcast %cst_35 : f32 to vector<128x256xf32>
    %52 = arith.maximumf %50, %51 : vector<128x256xf32>
    %53 = arith.truncf %52 : vector<128x256xf32> to vector<128x256xbf16>
    %c0_36 = arith.constant 0 : index
    %c0_37 = arith.constant 0 : index
    %54 = vector.load %arg15[%c0_36, %c0_37] : memref<256x896xbf16, #tpu.memory_space<vmem>>, vector<256x896xbf16>
    %cst_38 = arith.constant dense<0.000000e+00> : vector<128x896xf32>
    %55 = tpu.matmul %53, %54, %cst_38 {dimension_numbers = #tpu.dot_dimension_numbers<[1], [0], [0], [1], [0, 0, 1, 1], [], []>} : vector<128x256xbf16>, vector<256x896xbf16>, vector<128x896xf32> -> vector<128x896xf32>
    %c0_39 = arith.constant 0 : index
    %c0_40 = arith.constant 0 : index
    %56 = vector.load %arg16[%c0_39, %c0_40] : memref<1x896xf32, #tpu.memory_space<vmem>>, vector<1x896xf32>
    %57 = vector.broadcast %56 : vector<1x896xf32> to vector<128x896xf32>
    %58 = arith.addf %55, %57 : vector<128x896xf32>
    %59 = arith.negf %58 : vector<128x896xf32>
    %60 = math.exp %59 : vector<128x896xf32>
    %cst_41 = arith.constant 1.000000e+00 : f32
    %61 = vector.broadcast %cst_41 : f32 to vector<128x896xf32>
    %62 = arith.addf %61, %60 : vector<128x896xf32>
    %63 = arith.divf %61, %62 : vector<128x896xf32>
    %c0_42 = arith.constant 0 : index
    %c0_43 = arith.constant 0 : index
    %64 = vector.load %arg17[%c0_42, %c0_43] : memref<128x896xf32, #tpu.memory_space<vmem>>, vector<128x896xf32>
    tpu.vector_store %arg17[%c0_42, %c0_43], %63 {strides = array<i32>} : memref<128x896xf32, #tpu.memory_space<vmem>>, vector<128x896xf32>,
    %c0_44 = arith.constant 0 : index
    %c0_45 = arith.constant 0 : index
    %65 = vector.load %arg18[%c0_44, %c0_45] : memref<128x32xf32, #tpu.memory_space<vmem>>, vector<128x32xf32>
    tpu.vector_store %arg18[%c0_44, %c0_45], %22 {strides = array<i32>} : memref<128x32xf32, #tpu.memory_space<vmem>>, vector<128x32xf32>,
    return
  }
  func.func @transform_0(%arg0: i32) -> (i32, i32) {
    %c0_i32 = arith.constant 0 : i32
    %c0_i32_0 = arith.constant 0 : i32
    return %arg0, %c0_i32 : i32, i32
  }
  func.func @transform_1(%arg0: i32) -> (i32, i32) {
    %c0_i32 = arith.constant 0 : i32
    %c0_i32_0 = arith.constant 0 : i32
    return %arg0, %c0_i32 : i32, i32
  }
  func.func @transform_2(%arg0: i32) -> (i32, i32) {
    %c0_i32 = arith.constant 0 : i32
    %c0_i32_0 = arith.constant 0 : i32
    return %arg0, %c0_i32 : i32, i32
  }
  func.func @transform_3(%arg0: i32) -> (i32, i32) {
    %c0_i32 = arith.constant 0 : i32
    %c0_i32_0 = arith.constant 0 : i32
    %c0_i32_1 = arith.constant 0 : i32
    return %c0_i32, %c0_i32_0 : i32, i32
  }
  func.func @transform_4(%arg0: i32) -> (i32, i32) {
    %c0_i32 = arith.constant 0 : i32
    %c0_i32_0 = arith.constant 0 : i32
    %c0_i32_1 = arith.constant 0 : i32
    return %c0_i32, %c0_i32_0 : i32, i32
  }
  func.func @transform_5(%arg0: i32) -> (i32, i32) {
    %c0_i32 = arith.constant 0 : i32
    %c0_i32_0 = arith.constant 0 : i32
    %c0_i32_1 = arith.constant 0 : i32
    return %c0_i32, %c0_i32_0 : i32, i32
  }
  func.func @transform_6(%arg0: i32) -> (i32, i32) {
    %c0_i32 = arith.constant 0 : i32
    %c0_i32_0 = arith.constant 0 : i32
    %c0_i32_1 = arith.constant 0 : i32
    return %c0_i32, %c0_i32_0 : i32, i32
  }
  func.func @transform_7(%arg0: i32) -> (i32, i32) {
    %c0_i32 = arith.constant 0 : i32
    %c0_i32_0 = arith.constant 0 : i32
    %c0_i32_1 = arith.constant 0 : i32
    return %c0_i32, %c0_i32_0 : i32, i32
  }
  func.func @transform_8(%arg0: i32) -> (i32, i32) {
    %c0_i32 = arith.constant 0 : i32
    %c0_i32_0 = arith.constant 0 : i32
    %c0_i32_1 = arith.constant 0 : i32
    return %c0_i32, %c0_i32_0 : i32, i32
  }
  func.func @transform_9(%arg0: i32) -> (i32, i32) {
    %c0_i32 = arith.constant 0 : i32
    %c0_i32_0 = arith.constant 0 : i32
    %c0_i32_1 = arith.constant 0 : i32
    return %c0_i32, %c0_i32_0 : i32, i32
  }
  func.func @transform_10(%arg0: i32) -> (i32, i32) {
    %c0_i32 = arith.constant 0 : i32
    %c0_i32_0 = arith.constant 0 : i32
    %c0_i32_1 = arith.constant 0 : i32
    return %c0_i32, %c0_i32_0 : i32, i32
  }
  func.func @transform_11(%arg0: i32) -> (i32, i32) {
    %c0_i32 = arith.constant 0 : i32
    %c0_i32_0 = arith.constant 0 : i32
    %c0_i32_1 = arith.constant 0 : i32
    return %c0_i32, %c0_i32_0 : i32, i32
  }
  func.func @transform_12(%arg0: i32) -> (i32, i32) {
    %c0_i32 = arith.constant 0 : i32
    %c0_i32_0 = arith.constant 0 : i32
    %c0_i32_1 = arith.constant 0 : i32
    return %c0_i32, %c0_i32_0 : i32, i32
  }
  func.func @transform_13(%arg0: i32) -> (i32, i32) {
    %c0_i32 = arith.constant 0 : i32
    %c0_i32_0 = arith.constant 0 : i32
    %c0_i32_1 = arith.constant 0 : i32
    return %c0_i32, %c0_i32_0 : i32, i32
  }
  func.func @transform_14(%arg0: i32) -> (i32, i32) {
    %c0_i32 = arith.constant 0 : i32
    %c0_i32_0 = arith.constant 0 : i32
    %c0_i32_1 = arith.constant 0 : i32
    return %c0_i32, %c0_i32_0 : i32, i32
  }
  func.func @transform_15(%arg0: i32) -> (i32, i32) {
    %c0_i32 = arith.constant 0 : i32
    %c0_i32_0 = arith.constant 0 : i32
    %c0_i32_1 = arith.constant 0 : i32
    return %c0_i32, %c0_i32_0 : i32, i32
  }
  func.func @transform_16(%arg0: i32) -> (i32, i32) {
    %c0_i32 = arith.constant 0 : i32
    %c0_i32_0 = arith.constant 0 : i32
    return %arg0, %c0_i32 : i32, i32
  }
  func.func @transform_17(%arg0: i32) -> (i32, i32) {
    %c0_i32 = arith.constant 0 : i32
    %c0_i32_0 = arith.constant 0 : i32
    return %arg0, %c0_i32 : i32, i32
  }
}

</mosaic_0001>

<bundles_post_ra>
// kernel: cvae_forward.1
= control target key start
LH: loop header
LB: loop body
LE: loop exit
PB: predicated region body
PF: predicated region fallthrough
CT: control target
= control target key end

     0   :  { %s6943_s24 = smov 0   ;;  %s8924_s0 = inlined_call_operand.vmem [shape: f32[256,896], index: 0, kind: input, shape index: {}]   ;;  %s8925_s1 = inlined_call_operand.vmem [shape: f32[256,16], index: 1, kind: input, shape index: {}]   ;;  %s8926_s2 = inlined_call_operand.vmem [shape: f32[256,1], index: 2, kind: input, shape index: {}]   ;;  %s8927_s3 = inlined_call_operand.vmem [shape: bf16[896,256], index: 3, kind: input, shape index: {}]   ;;  %s8928_s4 = inlined_call_operand.vmem [shape: f32[1,256], index: 4, kind: input, shape index: {}]   ;;  %s8929_s5 = inlined_call_operand.vmem [shape: bf16[256,128], index: 5, kind: input, shape index: {}]   ;;  %s8930_s6 = inlined_call_operand.vmem [shape: f32[1,128], index: 6, kind: input, shape index: {}]   ;;  %s8931_s7 = inlined_call_operand.vmem [shape: bf16[128,32], index: 7, kind: input, shape index: {}]   ;;  %s8932_s8 = inlined_call_operand.vmem [shape: f32[1,32], index: 8, kind: input, shape index: {}]   ;;  %s8933_s9 = inlined_call_operand.vmem [shape: bf16[16,128], index: 9, kind: input, shape index: {}]   ;;  %s8934_s10 = inlined_call_operand.vmem [shape: f32[1,128], index: 10, kind: input, shape index: {}]   ;;  %s8935_s11 = inlined_call_operand.vmem [shape: f32[1,128], index: 11, kind: input, shape index: {}]   ;;  %s8936_s12 = inlined_call_operand.vmem [shape: bf16[128,256], index: 12, kind: input, shape index: {}]   ;;  %s8937_s13 = inlined_call_operand.vmem [shape: f32[1,256], index: 13, kind: input, shape index: {}]   ;;  %s8938_s14 = inlined_call_operand.vmem [shape: bf16[256,896], index: 14, kind: input, shape index: {}]   ;;  %s8939_s15 = inlined_call_operand.vmem [shape: f32[1,896], index: 15, kind: input, shape index: {}]   ;;  %s8940_s16 = inlined_call_operand.vmem [shape: f32[256,896], index: 16, kind: output, shape index: {0}]   ;;  %s8941_s17 = inlined_call_operand.vmem [shape: f32[256,32], index: 17, kind: output, shape index: {1}]  }
   0x1   :  { %8942 = sst [smem:[#allocation2_spill]] %s8924_s0 }
   0x2   :  { %8943 = sst [smem:[#allocation3_spill]] %s8925_s1 }
   0x3 LB: > { %s5219_s25 = sadd.s32 4294967295, %s6849_s24   ;;  %p5223_p0 = scmp.ge.s32.totalorder %s6849_s24, 1  ;;  %s6849_s24 = sphi %s6943_s24, %s28_s24  }
   0x4   : > { %p514_p1 = scmp.lt.s32.totalorder %s6849_s24, 3 }
   0x6   : > { %p515_p2 = pnand %p5223_p0, %p514_p1 }
   0x7   : > { %v5985_v0 = vld [vmem:[%s8927_s3 + $0x4] ss:$8 sps:$4 sm:$0xff] (!%p515_p2)   ;;  %v5987_v1 = vld [vmem:[%s8927_s3] ss:$8 sps:$4 sm:$0xff] (!%p515_p2)   ;;  %v5988_v2 = vld [vmem:[%s8927_s3 + $0x14] ss:$8 sps:$4 sm:$0xff] (!%p515_p2)  }
   0x8   : > { %518 = sbr.rel (%p515_p2) target bundleno = 1977 (0x7b9), region = 84  ;;  %1468 = vmatprep.subr.bf16.mxu0 (!%p515_p2), %v5985_v0  ;;  %v5990_v3 = vld [vmem:[%s8927_s3 + $0x10] ss:$8 sps:$4 sm:$0xff] (!%p515_p2)   ;;  %s5224_s1 = sshll.u32 (!%p515_p2), %s5219_s25, 4  ;;  %v5991_v4 = vld [vmem:[%s8927_s3 + $0x24] ss:$8 sps:$4 sm:$0xff] (!%p515_p2)  }
   0x9   : > { %1469 = vmatpush1.bf16.msra.mxu0 (!%p515_p2), %v5987_v1  ;;  %p584_p3 = scmp.lt.s32.totalorder (!%p515_p2), %s5224_s1, 31  ;;  %v5993_v5 = vld [vmem:[%s8927_s3 + $0x20] ss:$8 sps:$4 sm:$0xff] (!%p515_p2)   ;;  %v5994_v6 = vld [vmem:[%s8927_s3 + $0x34] ss:$8 sps:$4 sm:$0xff] (!%p515_p2)   ;;  %s8944_s26 = sld [smem:[#allocation2_spill]] (!%p515_p2) }
   0xa   : > { %1470 = vmatprep.subr.bf16.mxu0 (!%p515_p2), %v5988_v2  ;;  %v5996_v7 = vld [vmem:[%s8927_s3 + $0x30] ss:$8 sps:$4 sm:$0xff] (!%p515_p2)   ;;  %v5997_v8 = vld [vmem:[%s8927_s3 + $0x44] ss:$8 sps:$4 sm:$0xff] (!%p515_p2)   ;;  %v5999_v9 = vld [vmem:[%s8927_s3 + $0x40] ss:$8 sps:$4 sm:$0xff] (!%p515_p2)  }
   0xb   : > { %v6000_v10 = vld [vmem:[%s8927_s3 + $0x54] ss:$8 sps:$4 sm:$0xff] (!%p515_p2)   ;;  %v6002_v11 = vld [vmem:[%s8927_s3 + $0x50] ss:$8 sps:$4 sm:$0xff] (!%p515_p2)   ;;  %v6003_v12 = vld [vmem:[%s8927_s3 + $0x64] ss:$8 sps:$4 sm:$0xff] (!%p515_p2)  }
   0xc   : > { %v6005_v16 = vld [vmem:[%s8927_s3 + $0x60] ss:$8 sps:$4 sm:$0xff] (!%p515_p2)   ;;  %v6006_v17 = vld [vmem:[%s8927_s3 + $0x74] ss:$8 sps:$4 sm:$0xff] (!%p515_p2)   ;;  %v6008_v18 = vld [vmem:[%s8927_s3 + $0x70] ss:$8 sps:$4 sm:$0xff] (!%p515_p2)  }
   0xd   : > { %1471 = vmatpush1.bf16.msra.mxu0 (!%p515_p2), %v5990_v3  ;;  %v6009_v19 = vld [vmem:[%s8927_s3 + $0x84] ss:$8 sps:$4 sm:$0xff] (!%p515_p2)   ;;  %v6011_v20 = vld [vmem:[%s8927_s3 + $0x80] ss:$8 sps:$4 sm:$0xff] (!%p515_p2)   ;;  %v6012_v21 = vld [vmem:[%s8927_s3 + $0x94] ss:$8 sps:$4 sm:$0xff] (!%p515_p2)  }
   0xe   : > { %1472 = vmatprep.subr.bf16.mxu0 (!%p515_p2), %v5991_v4  ;;  %v6014_v22 = vld [vmem:[%s8927_s3 + $0x90] ss:$8 sps:$4 sm:$0xff] (!%p515_p2)   ;;  %v6015_v23 = vld [vmem:[%s8927_s3 + $0xa4] ss:$8 sps:$4 sm:$0xff] (!%p515_p2)   ;;  %v6017_v24 = vld [vmem:[%s8927_s3 + $0xa0] ss:$8 sps:$4 sm:$0xff] (!%p515_p2)  }
   0xf   : > { %s8947_s1 = smov (!%p584_p3, %s5224_s1), 31  ;;  %v6018_v25 = vld [vmem:[%s8927_s3 + $0xb4] ss:$8 sps:$4 sm:$0xff]   ;;  %v6020_v26 = vld [vmem:[%s8927_s3 + $0xb0] ss:$8 sps:$4 sm:$0xff]   ;;  %vm5086_vm0 = vcmask 261120  }
  0x10   : > { %s5972_s30 = smul.u32 56, %s8947_s1  ;;  %v6021_v27 = vld [vmem:[%s8927_s3 + $0xc4] ss:$8 sps:$4 sm:$0xff]   ;;  %v6023_v28 = vld [vmem:[%s8927_s3 + $0xc0] ss:$8 sps:$4 sm:$0xff]   ;;  %s6852_s20 = smov 112  }
  0x11   : > { %1473 = vmatpush1.bf16.msra.mxu0 %v5993_v5  ;;  %v6024_v29 = vld [vmem:[%s8927_s3 + $0xd4] ss:$8 sps:$4 sm:$0xff]   ;;  %v6026_v30 = vld [vmem:[%s8927_s3 + $0xd0] ss:$8 sps:$4 sm:$0xff]   ;;  %v6027_v31 = vld [vmem:[%s8927_s3 + $0xe4] ss:$8 sps:$4 sm:$0xff]  }
  0x12   : > { %1474 = vmatprep.subr.bf16.mxu0 %v5994_v6  ;;  %s6992_s27 = scalar_lea.vmem %s8944_s26, %s5972_s30  ;;  %v6029_v32 = vld [vmem:[%s8927_s3 + $0xe0] ss:$8 sps:$4 sm:$0xff]   ;;  %v6030_v33 = vld [vmem:[%s8927_s3 + $0xf4] ss:$8 sps:$4 sm:$0xff]   ;;  %v6032_v34 = vld [vmem:[%s8927_s3 + $0xf0] ss:$8 sps:$4 sm:$0xff]  }
  0x13   : > { %v617_v13 = vld [vmem:[%s6992_s27 + $0x8] sm:$0xff]  ;;  %v624_v14 = vld [vmem:[%s6992_s27 + $0x40] sm:$0xff]  ;;  %v623_v36 = vld [vmem:[%s6992_s27 + $0x38] sm:$0xff]  ;;  %s8945_s0 = sld [smem:[#allocation3_spill]]  ;;  %vm2687_vm1 = vcmask 130048  }
  0x14   : > { %v729_v15 = vpack.c.bf16 %v624_v14, %v617_v13  ;;  %v616_v35 = vld [vmem:[%s6992_s27] sm:$0xff]  ;;  %v631_v38 = vld [vmem:[%s6992_s27 + $0x78] sm:$0xff]  ;;  %v638_v39 = vld [vmem:[%s6992_s27 + $0xb0] sm:$0xff] }
  0x15   : > { %1475 = vmatpush1.bf16.msra.mxu0 %v5996_v7  ;;  %v6035_v37 = vld [vmem:[%s8927_s3 + $0x104] ss:$8 sps:$4 sm:$0xff]   ;;  %v728_v40 = vpack.c.bf16 %v623_v36, %v616_v35  ;;  %v6033_v41 = vld [vmem:[%s8927_s3 + $0x100] ss:$8 sps:$4 sm:$0xff]   ;;  %v736_v42 = vpack.c.bf16 %v638_v39, %v631_v38  ;;  %v6038_v43 = vld [vmem:[%s8927_s3 + $0x114] ss:$8 sps:$4 sm:$0xff]  }
  0x16   : > { %1476 = vmatprep.subr.bf16.mxu0 %v5997_v8  ;;  %1500 = vmatprep.mubr.bf16.mxu0 %v729_v15  ;;  %v6036_v44 = vld [vmem:[%s8927_s3 + $0x110] ss:$8 sps:$4 sm:$0xff]   ;;  %v637_v46 = vld [vmem:[%s6992_s27 + $0xa8] sm:$0xff]  ;;  %v652_v49 = vld [vmem:[%s6992_s27 + $0x120] sm:$0xff] }
  0x17   : > { %v630_v45 = vld [vmem:[%s6992_s27 + $0x70] sm:$0xff]  ;;  %v6041_v47 = vld [vmem:[%s8927_s3 + $0x124] ss:$8 sps:$4 sm:$0xff]   ;;  %v6039_v51 = vld [vmem:[%s8927_s3 + $0x120] ss:$8 sps:$4 sm:$0xff]  }
  0x18   : > { %v645_v48 = vld [vmem:[%s6992_s27 + $0xe8] sm:$0xff]  ;;  %v735_v50 = vpack.c.bf16 %v637_v46, %v630_v45  ;;  %v6044_v53 = vld [vmem:[%s8927_s3 + $0x134] ss:$8 sps:$4 sm:$0xff]   ;;  %v6042_v54 = vld [vmem:[%s8927_s3 + $0x130] ss:$8 sps:$4 sm:$0xff]  }
  0x19   : > { %1477 = vmatpush1.bf16.msra.mxu0 %v5999_v9  ;;  %v743_v52 = vpack.c.bf16 %v652_v49, %v645_v48  ;;  %v644_v55 = vld [vmem:[%s6992_s27 + $0xe0] sm:$0xff]  ;;  %v651_v56 = vld [vmem:[%s6992_s27 + $0x118] sm:$0xff]  ;;  %v666_v59 = vld [vmem:[%s6992_s27 + $0x190] sm:$0xff] }
  0x1a   : > { %1478 = vmatprep.subr.bf16.mxu0 %v6000_v10  ;;  %v6047_v57 = vld [vmem:[%s8927_s3 + $0x144] ss:$8 sps:$4 sm:$0xff]   ;;  %v659_v58 = vld [vmem:[%s6992_s27 + $0x158] sm:$0xff]  ;;  %v742_v60 = vpack.c.bf16 %v651_v56, %v644_v55  ;;  %v6045_v61 = vld [vmem:[%s8927_s3 + $0x140] ss:$8 sps:$4 sm:$0xff]   ;;  %v6851_v56 = vmov 0  }
  0x1b   : > { %v750_v62 = vpack.c.bf16 %v666_v59, %v659_v58  ;;  %v6050_v63 = vld [vmem:[%s8927_s3 + $0x154] ss:$8 sps:$4 sm:$0xff]   ;;  %v6048_v0 = vld [vmem:[%s8927_s3 + $0x150] ss:$8 sps:$4 sm:$0xff]   ;;  %v665_v2 = vld [vmem:[%s6992_s27 + $0x188] sm:$0xff]  ;;  %5984 = vset.pattern.permute.xlu1 %v6851_v56  ;;  %5983 = vset.pattern.permute.xlu0 %v6851_v56 }
  0x1c   : > { %v658_v1 = vld [vmem:[%s6992_s27 + $0x150] sm:$0xff]  ;;  %v6053_v3 = vld [vmem:[%s8927_s3 + $0x164] ss:$8 sps:$4 sm:$0xff]   ;;  %v6051_v7 = vld [vmem:[%s8927_s3 + $0x160] ss:$8 sps:$4 sm:$0xff]  }
  0x1d   : > { %1479 = vmatpush1.bf16.msra.mxu0 %v6002_v11  ;;  %v673_v4 = vld [vmem:[%s6992_s27 + $0x1c8] sm:$0xff]  ;;  %v680_v5 = vld [vmem:[%s6992_s27 + $0x200] sm:$0xff]  ;;  %v749_v6 = vpack.c.bf16 %v665_v2, %v658_v1  ;;  %v6056_v9 = vld [vmem:[%s8927_s3 + $0x174] ss:$8 sps:$4 sm:$0xff]  }
  0x1e   : > { %1480 = vmatprep.subr.bf16.mxu0 %v6003_v12  ;;  %v757_v8 = vpack.c.bf16 %v680_v5, %v673_v4  ;;  %v6054_v10 = vld [vmem:[%s8927_s3 + $0x170] ss:$8 sps:$4 sm:$0xff]   ;;  %v672_v11 = vld [vmem:[%s6992_s27 + $0x1c0] sm:$0xff]  ;;  %v6074_v38 = vld [vmem:[%s8927_s3 + $0x1d4] ss:$8 sps:$4 sm:$0xff]  }
  0x1f   : > { %v679_v12 = vld [vmem:[%s6992_s27 + $0x1f8] sm:$0xff]  ;;  %v6059_v13 = vld [vmem:[%s8927_s3 + $0x184] ss:$8 sps:$4 sm:$0xff]   ;;  %v694_v15 = vld [vmem:[%s6992_s27 + $0x270] sm:$0xff] }
  0x20   : > { %v687_v14 = vld [vmem:[%s6992_s27 + $0x238] sm:$0xff]  ;;  %v722_v35 = vld [vmem:[%s6992_s27 + $0x350] sm:$0xff]  ;;  %v6069_v36 = vld [vmem:[%s8927_s3 + $0x1c0] ss:$8 sps:$4 sm:$0xff]  }
  0x21   : > { %1481 = vmatpush1.bf16.msra.mxu0 %v6005_v16  ;;  %v756_v16 = vpack.c.bf16 %v679_v12, %v672_v11  ;;  %v626_v45 = vld [vmem:[%s6992_s27 + $0x50] sm:$0xff]  ;;  %v6075_v46 = vld [vmem:[%s8927_s3 + $0x1e0] ss:$8 sps:$4 sm:$0xff]   ;;  %v647_v1 = vld [vmem:[%s6992_s27 + $0xf8] sm:$0xff] }
  0x22   : > { %1482 = vmatprep.subr.bf16.mxu0 %v6006_v17  ;;  %v6057_v17 = vld [vmem:[%s8927_s3 + $0x180] ss:$8 sps:$4 sm:$0xff]   ;;  %v6080_v48 = vld [vmem:[%s8927_s3 + $0x1f4] ss:$8 sps:$4 sm:$0xff]  }
  0x23   : > { %v640_v55 = vld [vmem:[%s6992_s27 + $0xc0] sm:$0xff]  ;;  %v6086_v59 = vld [vmem:[%s8927_s3 + $0x214] ss:$8 sps:$4 sm:$0xff]   ;;  %v661_v11 = vld [vmem:[%s6992_s27 + $0x168] sm:$0xff] }
  0x24   : > { %v654_v2 = vld [vmem:[%s6992_s27 + $0x130] sm:$0xff]  ;;  %v668_v12 = vld [vmem:[%s6992_s27 + $0x1a0] sm:$0xff] }
  0x25   : > { %1483 = vmatpush1.bf16.msra.mxu0 %v6008_v18  ;;  %v764_v18 = vpack.c.bf16 %v694_v15, %v687_v14  ;;  %v6092_v5 = vld [vmem:[%s8927_s3 + $0x234] ss:$8 sps:$4 sm:$0xff]  }
  0x26   : > { %1484 = vmatprep.subr.bf16.mxu0 %v6009_v19  ;;  %v6062_v19 = vld [vmem:[%s8927_s3 + $0x194] ss:$8 sps:$4 sm:$0xff]  }
  0x27   : > { %v6098_v15 = vld [vmem:[%s8927_s3 + $0x254] ss:$8 sps:$4 sm:$0xff]  }
  0x29   : > { %1485 = vmatpush1.bf16.msra.mxu0 %v6011_v20  ;;  %v6060_v20 = vld [vmem:[%s8927_s3 + $0x190] ss:$8 sps:$4 sm:$0xff]  }
  0x2a   : > { %1486 = vmatprep.subr.bf16.mxu0 %v6012_v21  ;;  %v686_v21 = vld [vmem:[%s6992_s27 + $0x230] sm:$0xff] }
  0x2d   : > { %1487 = vmatpush1.bf16.msra.mxu0 %v6014_v22  ;;  %v693_v22 = vld [vmem:[%s6992_s27 + $0x268] sm:$0xff] }
  0x2e   : > { %1488 = vmatprep.subr.bf16.mxu0 %v6015_v23  ;;  %v6065_v23 = vld [vmem:[%s8927_s3 + $0x1a4] ss:$8 sps:$4 sm:$0xff]  }
  0x31   : > { %1489 = vmatpush1.bf16.msra.mxu0 %v6017_v24  ;;  %v701_v24 = vld [vmem:[%s6992_s27 + $0x2a8] sm:$0xff] }
  0x32   : > { %1490 = vmatprep.subr.bf16.mxu0 %v6018_v25  ;;  %v708_v25 = vld [vmem:[%s6992_s27 + $0x2e0] sm:$0xff] }
  0x35   : > { %1491 = vmatpush1.bf16.msra.mxu0 %v6020_v26  ;;  %v6063_v26 = vld [vmem:[%s8927_s3 + $0x1a0] ss:$8 sps:$4 sm:$0xff]  }
  0x36   : > { %1492 = vmatprep.subr.bf16.mxu0 %v6021_v27  ;;  %v763_v27 = vpack.c.bf16 %v693_v22, %v686_v21  ;;  %v675_v21 = vld [vmem:[%s6992_s27 + $0x1d8] sm:$0xff]  ;;  %v682_v22 = vld [vmem:[%s6992_s27 + $0x210] sm:$0xff] }
  0x39   : > { %1493 = vmatpush1.bf16.msra.mxu0 %v6023_v28  ;;  %v6068_v28 = vld [vmem:[%s8927_s3 + $0x1b4] ss:$8 sps:$4 sm:$0xff]  }
  0x3a   : > { %1494 = vmatprep.subr.bf16.mxu0 %v6024_v29  ;;  %v771_v29 = vpack.c.bf16 %v708_v25, %v701_v24  ;;  %v6104_v25 = vld [vmem:[%s8927_s3 + $0x274] ss:$8 sps:$4 sm:$0xff]  }
  0x3d   : > { %1495 = vmatpush1.bf16.msra.mxu0 %v6026_v30  ;;  %v6066_v30 = vld [vmem:[%s8927_s3 + $0x1b0] ss:$8 sps:$4 sm:$0xff]  }
  0x3e   : > { %1496 = vmatprep.subr.bf16.mxu0 %v6027_v31  ;;  %v700_v31 = vld [vmem:[%s6992_s27 + $0x2a0] sm:$0xff] }
  0x41   : > { %1497 = vmatpush1.bf16.msra.mxu0 %v6029_v32  ;;  %v707_v32 = vld [vmem:[%s6992_s27 + $0x2d8] sm:$0xff] }
  0x42   : > { %1498 = vmatprep.subr.bf16.mxu0 %v6030_v33  ;;  %v6071_v33 = vld [vmem:[%s8927_s3 + $0x1c4] ss:$8 sps:$4 sm:$0xff]  }
  0x45   : > { %1499 = vmatpush1.bf16.msra.mxu0 %v6032_v34  ;;  %v715_v34 = vld [vmem:[%s6992_s27 + $0x318] sm:$0xff] }
  0x46   : > { %1581 = vmatprep.subr.bf16.mxu0 %v6035_v37  ;;  %v770_v37 = vpack.c.bf16 %v707_v32, %v700_v31  ;;  %v778_v39 = vpack.c.bf16 %v722_v35, %v715_v34  ;;  %v689_v31 = vld [vmem:[%s6992_s27 + $0x248] sm:$0xff]  ;;  %v696_v32 = vld [vmem:[%s6992_s27 + $0x280] sm:$0xff]  ;;  %v6110_v35 = vld [vmem:[%s8927_s3 + $0x294] ss:$8 sps:$4 sm:$0xff]  }
  0x48   : > { %1501 = vmatmul.mubr.bf16.vlgmr.msra.gmra.mrb[0].mxu0 %v728_v40  ;;  %v6072_v40 = vld [vmem:[%s8927_s3 + $0x1d0] ss:$8 sps:$4 sm:$0xff]  }
  0x49   : > { %1582 = vmatpush1.bf16.msra.mxu0 %v6033_v41  ;;  %1510 = vmatprep.mubr.bf16.mxu0 %v736_v42  ;;  %v714_v41 = vld [vmem:[%s6992_s27 + $0x310] sm:$0xff]  ;;  %v721_v42 = vld [vmem:[%s6992_s27 + $0x348] sm:$0xff] }
  0x4a   : > { %1583 = vmatprep.subr.bf16.mxu0 %v6038_v43  ;;  %v6077_v43 = vld [vmem:[%s8927_s3 + $0x1e4] ss:$8 sps:$4 sm:$0xff]  }
  0x4d   : > { %1584 = vmatpush1.bf16.msra.mxu0 %v6036_v44  ;;  %v619_v44 = vld [vmem:[%s6992_s27 + $0x18] sm:$0xff] }
  0x4e   : > { %1585 = vmatprep.subr.bf16.mxu0 %v6041_v47  ;;  %v777_v47 = vpack.c.bf16 %v721_v42, %v714_v41  ;;  %v731_v49 = vpack.c.bf16 %v626_v45, %v619_v44  ;;  %v703_v41 = vld [vmem:[%s6992_s27 + $0x2b8] sm:$0xff]  ;;  %v710_v42 = vld [vmem:[%s6992_s27 + $0x2f0] sm:$0xff] }
  0x4f   : > { %v6116_v45 = vld [vmem:[%s8927_s3 + $0x2b4] ss:$8 sps:$4 sm:$0xff]  }
  0x50   : > { %1511 = vmatmul.mubr.bf16.gmra.mrb[4].mxu0 %v735_v50  ;;  %v6078_v50 = vld [vmem:[%s8927_s3 + $0x1f0] ss:$8 sps:$4 sm:$0xff]  }
  0x51   : > { %1586 = vmatpush1.bf16.msra.mxu0 %v6039_v51  ;;  %1520 = vmatprep.mubr.bf16.mxu0 %v743_v52  ;;  %v618_v51 = vld [vmem:[%s6992_s27 + $0x10] sm:$0xff]  ;;  %v625_v52 = vld [vmem:[%s6992_s27 + $0x48] sm:$0xff] }
  0x52   : > { %1587 = vmatprep.subr.bf16.mxu0 %v6044_v53  ;;  %v6083_v53 = vld [vmem:[%s8927_s3 + $0x204] ss:$8 sps:$4 sm:$0xff]   ;;  %v730_v58 = vpack.c.bf16 %v625_v52, %v618_v51 }
  0x53   : > { %v717_v51 = vld [vmem:[%s6992_s27 + $0x328] sm:$0xff]  ;;  %v724_v52 = vld [vmem:[%s6992_s27 + $0x360] sm:$0xff] }
  0x55   : > { %1588 = vmatpush1.bf16.msra.mxu0 %v6042_v54  ;;  %v633_v54 = vld [vmem:[%s6992_s27 + $0x88] sm:$0xff] }
  0x56   : > { %1589 = vmatprep.subr.bf16.mxu0 %v6047_v57  ;;  %v6081_v57 = vld [vmem:[%s8927_s3 + $0x200] ss:$8 sps:$4 sm:$0xff]  }
  0x58   : > { %1521 = vmatmul.mubr.bf16.gmra.mrb[8].mxu0 %v742_v60  ;;  %v738_v60 = vpack.c.bf16 %v640_v55, %v633_v54  ;;  %v780_v55 = vpack.c.bf16 %v724_v52, %v717_v51 }
  0x59   : > { %1590 = vmatpush1.bf16.msra.mxu0 %v6045_v61  ;;  %1530 = vmatprep.mubr.bf16.mxu0 %v750_v62  ;;  %v6084_v61 = vld [vmem:[%s8927_s3 + $0x210] ss:$8 sps:$4 sm:$0xff]   ;;  %v632_v62 = vld [vmem:[%s6992_s27 + $0x80] sm:$0xff] }
  0x5a   : > { %1591 = vmatprep.subr.bf16.mxu0 %v6050_v63  ;;  %v639_v63 = vld [vmem:[%s6992_s27 + $0xb8] sm:$0xff] }
  0x5b   : > { %v737_v4 = vpack.c.bf16 %v639_v63, %v632_v62  ;;  %v621_v62 = vld [vmem:[%s6992_s27 + $0x28] sm:$0xff]  ;;  %v628_v63 = vld [vmem:[%s6992_s27 + $0x60] sm:$0xff] }
  0x5d   : > { %1592 = vmatpush1.bf16.msra.mxu0 %v6048_v0  ;;  %v6089_v0 = vld [vmem:[%s8927_s3 + $0x224] ss:$8 sps:$4 sm:$0xff]  }
  0x5e   : > { %1593 = vmatprep.subr.bf16.mxu0 %v6053_v3  ;;  %v6087_v3 = vld [vmem:[%s8927_s3 + $0x220] ss:$8 sps:$4 sm:$0xff]  }
  0x60   : > { %1531 = vmatmul.mubr.bf16.gmra.mrb[12].mxu0 %v749_v6  ;;  %v745_v6 = vpack.c.bf16 %v654_v2, %v647_v1  ;;  %v6123_v1 = vld [vmem:[%s8927_s3 + $0x2e0] ss:$8 sps:$4 sm:$0xff]   ;;  %v733_v2 = vpack.c.bf16 %v628_v63, %v621_v62  ;;  %v690_v63 = vld [vmem:[%s6992_s27 + $0x250] sm:$0xff] }
  0x61   : > { %1594 = vmatpush1.bf16.msra.mxu0 %v6051_v7  ;;  %1540 = vmatprep.mubr.bf16.mxu0 %v757_v8  ;;  %v6090_v7 = vld [vmem:[%s8927_s3 + $0x230] ss:$8 sps:$4 sm:$0xff]  }
  0x62   : > { %1595 = vmatprep.subr.bf16.mxu0 %v6056_v9  ;;  %v646_v8 = vld [vmem:[%s6992_s27 + $0xf0] sm:$0xff]  ;;  %v653_v9 = vld [vmem:[%s6992_s27 + $0x128] sm:$0xff] }
  0x63   : > { %v744_v14 = vpack.c.bf16 %v653_v9, %v646_v8  ;;  %v620_v8 = vld [vmem:[%s6992_s27 + $0x20] sm:$0xff]  ;;  %v627_v9 = vld [vmem:[%s6992_s27 + $0x58] sm:$0xff] }
  0x65   : > { %1596 = vmatpush1.bf16.msra.mxu0 %v6054_v10  ;;  %v6095_v10 = vld [vmem:[%s8927_s3 + $0x244] ss:$8 sps:$4 sm:$0xff]  }
  0x66   : > { %1597 = vmatprep.subr.bf16.mxu0 %v6059_v13  ;;  %v6093_v13 = vld [vmem:[%s8927_s3 + $0x240] ss:$8 sps:$4 sm:$0xff]  }
  0x68   : > { %1541 = vmatmul.mubr.bf16.gmra.mrb[16].mxu0 %v756_v16  ;;  %v752_v16 = vpack.c.bf16 %v668_v12, %v661_v11  ;;  %v635_v11 = vld [vmem:[%s6992_s27 + $0x98] sm:$0xff]  ;;  %v642_v12 = vld [vmem:[%s6992_s27 + $0xd0] sm:$0xff] }
  0x69   : > { %1598 = vmatpush1.bf16.msra.mxu0 %v6057_v17  ;;  %1550 = vmatprep.mubr.bf16.mxu0 %v764_v18  ;;  %v6096_v17 = vld [vmem:[%s8927_s3 + $0x250] ss:$8 sps:$4 sm:$0xff]   ;;  %v660_v18 = vld [vmem:[%s6992_s27 + $0x160] sm:$0xff] }
  0x6a   : > { %1599 = vmatprep.subr.bf16.mxu0 %v6062_v19  ;;  %v667_v19 = vld [vmem:[%s6992_s27 + $0x198] sm:$0xff] }
  0x6b   : > { %v751_v24 = vpack.c.bf16 %v667_v19, %v660_v18  ;;  %v6134_v18 = vld [vmem:[%s8927_s3 + $0x314] ss:$8 sps:$4 sm:$0xff]  }
  0x6c   : > { %v6158_v19 = vld [vmem:[%s8929_s5 + $0x10] sm:$0xff]  }
  0x6d   : > { %1600 = vmatpush1.bf16.msra.mxu0 %v6060_v20  ;;  %v6101_v20 = vld [vmem:[%s8927_s3 + $0x264] ss:$8 sps:$4 sm:$0xff]  }
  0x6e   : > { %1601 = vmatprep.subr.bf16.mxu0 %v6065_v23  ;;  %v6099_v23 = vld [vmem:[%s8927_s3 + $0x260] ss:$8 sps:$4 sm:$0xff]  }
  0x70   : > { %1551 = vmatmul.mubr.bf16.gmra.mrb[20].mxu0 %v763_v27  ;;  %v6102_v27 = vld [vmem:[%s8927_s3 + $0x270] ss:$8 sps:$4 sm:$0xff]  }
  0x71   : > { %1602 = vmatpush1.bf16.msra.mxu0 %v6063_v26  ;;  %1560 = vmatprep.mubr.bf16.mxu0 %v771_v29  ;;  %v759_v26 = vpack.c.bf16 %v682_v22, %v675_v21  ;;  %v681_v29 = vld [vmem:[%s6992_s27 + $0x208] sm:$0xff]  ;;  %v634_v21 = vld [vmem:[%s6992_s27 + $0x90] sm:$0xff] }
  0x72   : > { %1603 = vmatprep.subr.bf16.mxu0 %v6068_v28  ;;  %v674_v28 = vld [vmem:[%s6992_s27 + $0x1d0] sm:$0xff]  ;;  %v641_v22 = vld [vmem:[%s6992_s27 + $0xc8] sm:$0xff] }
  0x73   : > { %v758_v34 = vpack.c.bf16 %v681_v29, %v674_v28  ;;  %v739_v28 = vpack.c.bf16 %v641_v22, %v634_v21  ;;  %v6161_v29 = vld [vmem:[%s8929_s5 + $0x60] sm:$0xff]   ;;  %v657_v21 = vld [vmem:[%s6992_s27 + $0x148] sm:$0xff] }
  0x75   : > { %1604 = vmatpush1.bf16.msra.mxu0 %v6066_v30  ;;  %v6107_v30 = vld [vmem:[%s8927_s3 + $0x284] ss:$8 sps:$4 sm:$0xff]  }
  0x76   : > { %1605 = vmatprep.subr.bf16.mxu0 %v6071_v33  ;;  %v6105_v33 = vld [vmem:[%s8927_s3 + $0x280] ss:$8 sps:$4 sm:$0xff]  }
  0x78   : > { %1561 = vmatmul.mubr.bf16.gmra.mrb[24].mxu0 %v770_v37  ;;  %v6108_v37 = vld [vmem:[%s8927_s3 + $0x290] ss:$8 sps:$4 sm:$0xff]  }
  0x79   : > { %1606 = vmatpush1.bf16.msra.mxu0 %v6069_v36  ;;  %1570 = vmatprep.mubr.bf16.mxu0 %v778_v39  ;;  %v766_v36 = vpack.c.bf16 %v696_v32, %v689_v31  ;;  %v695_v39 = vld [vmem:[%s6992_s27 + $0x278] sm:$0xff]  ;;  %v6135_v31 = vld [vmem:[%s8927_s3 + $0x320] ss:$8 sps:$4 sm:$0xff]  }
  0x7a   : > { %1607 = vmatprep.subr.bf16.mxu0 %v6074_v38  ;;  %v688_v38 = vld [vmem:[%s6992_s27 + $0x240] sm:$0xff]  ;;  %v6140_v32 = vld [vmem:[%s8927_s3 + $0x334] ss:$8 sps:$4 sm:$0xff]  }
  0x7b   : > { %v765_v44 = vpack.c.bf16 %v695_v39, %v688_v38  ;;  %v663_v38 = vld [vmem:[%s6992_s27 + $0x178] sm:$0xff]  ;;  %v670_v39 = vld [vmem:[%s6992_s27 + $0x1b0] sm:$0xff] }
  0x7d   : > { %1608 = vmatpush1.bf16.msra.mxu0 %v6072_v40  ;;  %v6113_v40 = vld [vmem:[%s8927_s3 + $0x2a4] ss:$8 sps:$4 sm:$0xff]  }
  0x7e   : > { %1609 = vmatprep.subr.bf16.mxu0 %v6077_v43  ;;  %v6111_v43 = vld [vmem:[%s8927_s3 + $0x2a0] ss:$8 sps:$4 sm:$0xff]  }
  0x80   : > { %1571 = vmatmul.mubr.bf16.gmra.mrb[28].mxu0 %v777_v47  ;;  %v6114_v47 = vld [vmem:[%s8927_s3 + $0x2b0] ss:$8 sps:$4 sm:$0xff]  }
  0x81   : > { %1610 = vmatpush1.bf16.msra.mxu0 %v6075_v46  ;;  %1613 = vmatprep.mubr.bf16.mxu0 %v731_v49  ;;  %v773_v46 = vpack.c.bf16 %v710_v42, %v703_v41  ;;  %v709_v49 = vld [vmem:[%s6992_s27 + $0x2e8] sm:$0xff]  ;;  %v754_v42 = vpack.c.bf16 %v670_v39, %v663_v38  ;;  %v6165_v39 = vld [vmem:[%s8929_s5 + $0x70] sm:$0xff]  }
  0x82   : > { %1611 = vmatprep.subr.bf16.mxu0 %v6080_v48  ;;  %v702_v48 = vld [vmem:[%s6992_s27 + $0x2b0] sm:$0xff]  ;;  %v6164_v38 = vld [vmem:[%s8929_s5 + $0x28] sm:$0xff]  }
  0x83   : > { %v772_v54 = vpack.c.bf16 %v709_v49, %v702_v48  ;;  %v677_v48 = vld [vmem:[%s6992_s27 + $0x1e8] sm:$0xff]  ;;  %v684_v49 = vld [vmem:[%s6992_s27 + $0x220] sm:$0xff] }
  0x84   : > { %v761_v52 = vpack.c.bf16 %v684_v49, %v677_v48 }
  0x85   : > { %1612 = vmatpush1.bf16.msra.mxu0 %v6078_v50  ;;  %v6119_v50 = vld [vmem:[%s8927_s3 + $0x2c4] ss:$8 sps:$4 sm:$0xff]  }
  0x86   : > { %1694 = vmatprep.subr.bf16.mxu0 %v6083_v53  ;;  %v6117_v53 = vld [vmem:[%s8927_s3 + $0x2c0] ss:$8 sps:$4 sm:$0xff]  }
  0x88   : > { %1614 = vmatmul.mubr.bf16.vlgmr.msra.gmra.mrb[0].mxu0 %v730_v58  ;;  %v6120_v58 = vld [vmem:[%s8927_s3 + $0x2d0] ss:$8 sps:$4 sm:$0xff]  }
  0x89   : > { %1695 = vmatpush1.bf16.msra.mxu0 %v6081_v57  ;;  %1623 = vmatprep.mubr.bf16.mxu0 %v738_v60  ;;  %v6122_v57 = vld [vmem:[%s8927_s3 + $0x2d4] ss:$8 sps:$4 sm:$0xff]  }
  0x8a   : > { %1696 = vmatprep.subr.bf16.mxu0 %v6086_v59  ;;  %v716_v59 = vld [vmem:[%s6992_s27 + $0x320] sm:$0xff]  ;;  %v723_v60 = vld [vmem:[%s6992_s27 + $0x358] sm:$0xff] }
  0x8d   : > { %1697 = vmatpush1.bf16.msra.mxu0 %v6084_v61  ;;  %v6125_v61 = vld [vmem:[%s8927_s3 + $0x2e4] ss:$8 sps:$4 sm:$0xff]  }
  0x8e   : > { %1698 = vmatprep.subr.bf16.mxu0 %v6089_v0  ;;  %v779_v0 = vpack.c.bf16 %v723_v60, %v716_v59  ;;  %v691_v59 = vld [vmem:[%s6992_s27 + $0x258] sm:$0xff]  ;;  %v698_v60 = vld [vmem:[%s6992_s27 + $0x290] sm:$0xff] }
  0x8f   : > { %v768_v62 = vpack.c.bf16 %v698_v60, %v691_v59 }
  0x90   : > { %1624 = vmatmul.mubr.bf16.gmra.mrb[4].mxu0 %v737_v4  ;;  %v6153_v4 = vld [vmem:[%s8929_s5 + $0x40] sm:$0xff]  }
  0x91   : > { %1699 = vmatpush1.bf16.msra.mxu0 %v6087_v3  ;;  %1633 = vmatprep.mubr.bf16.mxu0 %v745_v6  ;;  %v6128_v3 = vld [vmem:[%s8927_s3 + $0x2f4] ss:$8 sps:$4 sm:$0xff]   ;;  %v6155_v6 = vld [vmem:[%s8929_s5 + $0x48] sm:$0xff]  }
  0x92   : > { %1700 = vmatprep.subr.bf16.mxu0 %v6092_v5  ;;  %v6154_v5 = vld [vmem:[%s8929_s5] sm:$0xff]   ;;  %5625 = vmatprep.subr.bf16.mxu1 %v6153_v4 }
  0x93   : > { %5626 = vmatpush3.bf16.msra.mxu1 %v6154_v5  ;;  %v704_v5 = vld [vmem:[%s6992_s27 + $0x2c0] sm:$0xff] }
  0x94   : > { %5627 = vmatprep.subr.bf16.mxu1 %v6155_v6  ;;  %v711_v6 = vld [vmem:[%s6992_s27 + $0x2f8] sm:$0xff] }
  0x95   : > { %1701 = vmatpush1.bf16.msra.mxu0 %v6090_v7  ;;  %v6126_v7 = vld [vmem:[%s8927_s3 + $0x2f0] ss:$8 sps:$4 sm:$0xff]  }
  0x96   : > { %1702 = vmatprep.subr.bf16.mxu0 %v6095_v10  ;;  %v6131_v10 = vld [vmem:[%s8927_s3 + $0x304] ss:$8 sps:$4 sm:$0xff]  }
  0x98   : > { %1634 = vmatmul.mubr.bf16.gmra.mrb[8].mxu0 %v744_v14  ;;  %v732_v14 = vpack.c.bf16 %v627_v9, %v620_v8  ;;  %v726_v8 = vld [vmem:[%s6992_s27 + $0x370] sm:$0xff]  ;;  %v774_v9 = vpack.c.bf16 %v711_v6, %v704_v5  ;;  %v6170_v5 = vld [vmem:[%s8931_s7 + $0x8] sm:$0xff]  }
  0x99   : > { %1703 = vmatpush1.bf16.msra.mxu0 %v6093_v13  ;;  %1643 = vmatprep.mubr.bf16.mxu0 %v752_v16  ;;  %v6156_v13 = vld [vmem:[%s8929_s5 + $0x8] sm:$0xff]  }
  0x9a   : > { %1704 = vmatprep.subr.bf16.mxu0 %v6098_v15  ;;  %v6157_v15 = vld [vmem:[%s8929_s5 + $0x50] sm:$0xff]   ;;  %v6129_v16 = vld [vmem:[%s8927_s3 + $0x300] ss:$8 sps:$4 sm:$0xff]   ;;  %5628 = vmatpush3.bf16.msra.mxu1 %v6156_v13 }
  0x9b   : > { %5629 = vmatprep.subr.bf16.mxu1 %v6157_v15  ;;  %v629_v15 = vld [vmem:[%s6992_s27 + $0x68] sm:$0xff] }
  0x9d   : > { %1705 = vmatpush1.bf16.msra.mxu0 %v6096_v17  ;;  %v740_v17 = vpack.c.bf16 %v642_v12, %v635_v11  ;;  %v718_v11 = vld [vmem:[%s6992_s27 + $0x330] sm:$0xff]  ;;  %v725_v12 = vld [vmem:[%s6992_s27 + $0x368] sm:$0xff] }
  0x9e   : > { %1706 = vmatprep.subr.bf16.mxu0 %v6101_v20  ;;  %v6159_v20 = vld [vmem:[%s8929_s5 + $0x58] sm:$0xff]   ;;  %5630 = vmatpush3.bf16.msra.mxu1 %v6158_v19  ;;  %v781_v13 = vpack.c.bf16 %v725_v12, %v718_v11 }
  0x9f   : > { %5631 = vmatprep.subr.bf16.mxu1 %v6159_v20  ;;  %v650_v20 = vld [vmem:[%s6992_s27 + $0x110] sm:$0xff] }
  0xa0   : > { %1644 = vmatmul.mubr.bf16.gmra.mrb[12].mxu0 %v751_v24  ;;  %v649_v24 = vld [vmem:[%s6992_s27 + $0x108] sm:$0xff]  ;;  %v748_v22 = vpack.c.bf16 %v657_v21, %v650_v20  ;;  %v6172_v21 = vld [vmem:[%s8931_s7 + $0x18] sm:$0xff]  }
  0xa1   : > { %1707 = vmatpush1.bf16.msra.mxu0 %v6099_v23  ;;  %1653 = vmatprep.mubr.bf16.mxu0 %v759_v26  ;;  %v6132_v23 = vld [vmem:[%s8927_s3 + $0x310] ss:$8 sps:$4 sm:$0xff]   ;;  %v6137_v26 = vld [vmem:[%s8927_s3 + $0x324] ss:$8 sps:$4 sm:$0xff]  }
  0xa2   : > { %1708 = vmatprep.subr.bf16.mxu0 %v6104_v25  ;;  %v656_v25 = vld [vmem:[%s6992_s27 + $0x140] sm:$0xff] }
  0xa5   : > { %1709 = vmatpush1.bf16.msra.mxu0 %v6102_v27  ;;  %v6160_v27 = vld [vmem:[%s8929_s5 + $0x18] sm:$0xff]  }
  0xa6   : > { %1710 = vmatprep.subr.bf16.mxu0 %v6107_v30  ;;  %v747_v30 = vpack.c.bf16 %v656_v25, %v649_v24  ;;  %5632 = vmatpush3.bf16.msra.mxu1 %v6160_v27  ;;  %v671_v24 = vld [vmem:[%s6992_s27 + $0x1b8] sm:$0xff]  ;;  %v685_v27 = vld [vmem:[%s6992_s27 + $0x228] sm:$0xff] }
  0xa7   : > { %5633 = vmatprep.subr.bf16.mxu1 %v6161_v29  ;;  %v692_v29 = vld [vmem:[%s6992_s27 + $0x260] sm:$0xff] }
  0xa8   : > { %1654 = vmatmul.mubr.bf16.gmra.mrb[16].mxu0 %v758_v34  ;;  %v6163_v34 = vld [vmem:[%s8929_s5 + $0x68] sm:$0xff]  }
  0xa9   : > { %1711 = vmatpush1.bf16.msra.mxu0 %v6105_v33  ;;  %1663 = vmatprep.mubr.bf16.mxu0 %v766_v36  ;;  %v6162_v33 = vld [vmem:[%s8929_s5 + $0x20] sm:$0xff]   ;;  %v655_v36 = vld [vmem:[%s6992_s27 + $0x138] sm:$0xff] }
  0xaa   : > { %1712 = vmatprep.subr.bf16.mxu0 %v6110_v35  ;;  %v648_v35 = vld [vmem:[%s6992_s27 + $0x100] sm:$0xff]  ;;  %5634 = vmatpush3.bf16.msra.mxu1 %v6162_v33  ;;  %v713_v33 = vld [vmem:[%s6992_s27 + $0x308] sm:$0xff] }
  0xab   : > { %v746_v41 = vpack.c.bf16 %v655_v36, %v648_v35  ;;  %5635 = vmatprep.subr.bf16.mxu1 %v6163_v34  ;;  %v720_v35 = vld [vmem:[%s6992_s27 + $0x340] sm:$0xff]  ;;  %v727_v36 = vld [vmem:[%s6992_s27 + $0x378] sm:$0xff] }
  0xad   : > { %1713 = vmatpush1.bf16.msra.mxu0 %v6108_v37  ;;  %v6138_v37 = vld [vmem:[%s8927_s3 + $0x330] ss:$8 sps:$4 sm:$0xff]  }
  0xae   : > { %1714 = vmatprep.subr.bf16.mxu0 %v6113_v40  ;;  %v6143_v40 = vld [vmem:[%s8927_s3 + $0x344] ss:$8 sps:$4 sm:$0xff]   ;;  %5636 = vmatpush3.bf16.msra.mxu1 %v6164_v38 }
  0xaf   : > { %5637 = vmatprep.subr.bf16.mxu1 %v6165_v39 }
  0xb0   : > { %1664 = vmatmul.mubr.bf16.gmra.mrb[20].mxu0 %v765_v44  ;;  %v6146_v44 = vld [vmem:[%s8927_s3 + $0x354] ss:$8 sps:$4 sm:$0xff]  }
  0xb1   : > { %1715 = vmatpush1.bf16.msra.mxu0 %v6111_v43  ;;  %1673 = vmatprep.mubr.bf16.mxu0 %v773_v46  ;;  %v6141_v43 = vld [vmem:[%s8927_s3 + $0x340] ss:$8 sps:$4 sm:$0xff]  }
  0xb2   : > { %1716 = vmatprep.subr.bf16.mxu0 %v6116_v45  ;;  %v662_v45 = vld [vmem:[%s6992_s27 + $0x170] sm:$0xff]  ;;  %v669_v46 = vld [vmem:[%s6992_s27 + $0x1a8] sm:$0xff] }
  0xb3   : > { %v753_v51 = vpack.c.bf16 %v669_v46, %v662_v45 }
  0xb5   : > { %1717 = vmatpush1.bf16.msra.mxu0 %v6114_v47  ;;  %v6144_v47 = vld [vmem:[%s8927_s3 + $0x350] ss:$8 sps:$4 sm:$0xff]  }
  0xb6   : > { %1718 = vmatprep.subr.bf16.mxu0 %v6119_v50  ;;  %v6149_v50 = vld [vmem:[%s8927_s3 + $0x364] ss:$8 sps:$4 sm:$0xff]  }
  0xb8   : > { %1674 = vmatmul.mubr.bf16.gmra.mrb[24].mxu0 %v772_v54  ;;  %v6152_v54 = vld [vmem:[%s8927_s3 + $0x374] ss:$8 sps:$4 sm:$0xff]  }
  0xb9   : > { %1719 = vmatpush1.bf16.msra.mxu0 %v6117_v53  ;;  %1683 = vmatprep.mubr.bf16.mxu0 %v780_v55  ;;  %v6147_v53 = vld [vmem:[%s8927_s3 + $0x360] ss:$8 sps:$4 sm:$0xff]  }
  0xba   : > { %1720 = vmatprep.subr.bf16.mxu0 %v6122_v57  ;;  %v676_v55 = vld [vmem:[%s6992_s27 + $0x1e0] sm:$0xff]  ;;  %v683_v57 = vld [vmem:[%s6992_s27 + $0x218] sm:$0xff] }
  0xbd   : > { %1721 = vmatpush1.bf16.msra.mxu0 %v6120_v58  ;;  %v6150_v58 = vld [vmem:[%s8927_s3 + $0x370] ss:$8 sps:$4 sm:$0xff]  }
  0xbe   : > { %1722 = vmatprep.subr.bf16.mxu0 %v6125_v61  ;;  %v760_v61 = vpack.c.bf16 %v683_v57, %v676_v55 }
  0xc0   : > { %1684 = vmatmul.mubr.bf16.gmra.mrb[28].mxu0 %v779_v0  ;;  %v697_v0 = vld [vmem:[%s6992_s27 + $0x288] sm:$0xff] }
  0xc1   : > { %1723 = vmatpush1.bf16.msra.mxu0 %v6123_v1  ;;  %1726 = vmatprep.mubr.bf16.mxu0 %v733_v2  ;;  %v705_v1 = vld [vmem:[%s6992_s27 + $0x2c8] sm:$0xff]  ;;  %v712_v2 = vld [vmem:[%s6992_s27 + $0x300] sm:$0xff] }
  0xc2   : > { %1724 = vmatprep.subr.bf16.mxu0 %v6128_v3  ;;  %v767_v3 = vpack.c.bf16 %v697_v0, %v690_v63  ;;  %v775_v4 = vpack.c.bf16 %v712_v2, %v705_v1 }
  0xc5   : > { %1725 = vmatpush1.bf16.msra.mxu0 %v6126_v7  ;;  %v719_v7 = vld [vmem:[%s6992_s27 + $0x338] sm:$0xff] }
  0xc6   : > { %1807 = vmatprep.subr.bf16.mxu0 %v6131_v10  ;;  %v782_v10 = vpack.c.bf16 %v726_v8, %v719_v7 }
  0xc8   : > { %1727 = vmatmul.mubr.bf16.vlgmr.msra.gmra.mrb[0].mxu0 %v732_v14  ;;  %v622_v14 = vld [vmem:[%s6992_s27 + $0x30] sm:$0xff] }
  0xc9   : > { %1808 = vmatpush1.bf16.msra.mxu0 %v6129_v16  ;;  %1736 = vmatprep.mubr.bf16.mxu0 %v740_v17  ;;  %v734_v16 = vpack.c.bf16 %v629_v15, %v622_v14  ;;  %v636_v17 = vld [vmem:[%s6992_s27 + $0xa0] sm:$0xff] }
  0xca   : > { %1809 = vmatprep.subr.bf16.mxu0 %v6134_v18  ;;  %v643_v18 = vld [vmem:[%s6992_s27 + $0xd8] sm:$0xff] }
  0xcb   : > { %v741_v19 = vpack.c.bf16 %v643_v18, %v636_v17 }
  0xcd   : > { %1810 = vmatpush1.bf16.msra.mxu0 %v6132_v23  ;;  %v664_v23 = vld [vmem:[%s6992_s27 + $0x180] sm:$0xff] }
  0xce   : > { %1811 = vmatprep.subr.bf16.mxu0 %v6137_v26  ;;  %v755_v25 = vpack.c.bf16 %v671_v24, %v664_v23  ;;  %v678_v26 = vld [vmem:[%s6992_s27 + $0x1f0] sm:$0xff] }
  0xd0   : > { %1737 = vmatmul.mubr.bf16.gmra.mrb[4].mxu0 %v739_v28  ;;  %v762_v28 = vpack.c.bf16 %v685_v27, %v678_v26 }
  0xd1   : > { %1746 = vmatprep.mubr.bf16.mxu0 %v747_v30  ;;  %1812 = vmatpush1.bf16.msra.mxu0 %v6135_v31  ;;  %v699_v30 = vld [vmem:[%s6992_s27 + $0x298] sm:$0xff] }
  0xd2   : > { %1813 = vmatprep.subr.bf16.mxu0 %v6140_v32  ;;  %v769_v31 = vpack.c.bf16 %v699_v30, %v692_v29  ;;  %v706_v32 = vld [vmem:[%s6992_s27 + $0x2d0] sm:$0xff]  ;;  %v6173_v29 = vld [vmem:[%s8931_s7 + $0x20] sm:$0xff]   ;;  %s7565_s27 = sshll.u32 %s8947_s1, 3 }
  0xd3   : > { %v776_v34 = vpack.c.bf16 %v713_v33, %v706_v32  ;;  %s7576_s19 = scalar_lea.vmem %s8941_s17, %s7565_s27  ;;  %s7708_s23 = scalar_lea.vmem %s8926_s2, %s7565_s27 }
  0xd4   : > { %s7735_s18 = scalar_lea.vmem %s8945_s0, %s7565_s27 }
  0xd5   : > { %1814 = vmatpush1.bf16.msra.mxu0 %v6138_v37  ;;  %v783_v37 = vpack.c.bf16 %v727_v36, %v720_v35 }
  0xd6   : > { %1815 = vmatprep.subr.bf16.mxu0 %v6143_v40  ;;  %v6166_v40 = vld [vmem:[%s8929_s5 + $0x30] sm:$0xff]  }
  0xd7   : > { %5638 = vmatpush3.bf16.msra.mxu1 %v6166_v40 }
  0xd8   : > { %1747 = vmatmul.mubr.bf16.gmra.mrb[8].mxu0 %v746_v41  ;;  %v6167_v41 = vld [vmem:[%s8929_s5 + $0x78] sm:$0xff]  }
  0xd9   : > { %1756 = vmatprep.mubr.bf16.mxu0 %v754_v42  ;;  %1816 = vmatpush1.bf16.msra.mxu0 %v6141_v43  ;;  %v6168_v42 = vld [vmem:[%s8929_s5 + $0x38] sm:$0xff]   ;;  %v6169_v43 = vld [vmem:[%s8931_s7] sm:$0xff]  }
  0xda   : > { %1817 = vmatprep.subr.bf16.mxu0 %v6146_v44  ;;  %5639 = vmatprep.subr.bf16.mxu1 %v6167_v41  ;;  %v898_v44 = vlaneseq }
  0xdb   : > { %5640 = vmatpush3.bf16.msra.mxu1 %v6168_v42 }
  0xdc   : > { %5778 = vmatprep.subr.bf16.mxu1 %v6169_v43  ;;  %v7470_v45 = vshrl.u32 %v898_v44, 7 }
  0xdd   : > { %1818 = vmatpush1.bf16.msra.mxu0 %v6144_v47  ;;  %v896_v47 = vld [vmem:[%s8928_s4] sm:$0x3] }
  0xde   : > { %1819 = vmatprep.subr.bf16.mxu0 %v6149_v50  ;;  %v7473_v46 = vsub.s32 0, %v7470_v45  ;;  %v7479_v48 = vsub.s32 1, %v7470_v45 }
  0xe0   : > { %1757 = vmatmul.mubr.bf16.gmra.mrb[12].mxu0 %v753_v51  ;;  %v7482_v49 = vrot.slane %v896_v47, %v7473_v46  ;;  %v7485_v50 = vrot.slane %v896_v47, %v7479_v48 }
  0xe1   : > { %1766 = vmatprep.mubr.bf16.mxu0 %v761_v52  ;;  %1820 = vmatpush1.bf16.msra.mxu0 %v6147_v53 }
  0xe2   : > { %1821 = vmatprep.subr.bf16.mxu0 %v6152_v54 }
  0xe5   : > { %1822 = vmatpush1.bf16.msra.mxu0 %v6150_v58 }
  0xe8   : > { %1767 = vmatmul.mubr.bf16.gmra.mrb[16].mxu0 %v760_v61 }
  0xe9   : > { %1776 = vmatprep.mubr.bf16.mxu0 %v768_v62 }
  0xf0   : > { %1777 = vmatmul.mubr.bf16.gmra.mrb[20].mxu0 %v767_v3 }
  0xf1   : > { %1786 = vmatprep.mubr.bf16.mxu0 %v775_v4 }
  0xf8   : > { %1787 = vmatmul.mubr.bf16.gmra.mrb[24].mxu0 %v774_v9 }
  0xf9   : > { %1796 = vmatprep.mubr.bf16.mxu0 %v782_v10 }
 0x100   : > { %1797 = vmatmul.mubr.bf16.gmra.mrb[28].mxu0 %v781_v13  ;;  %v6171_v13 = vld [vmem:[%s8931_s7 + $0x10] sm:$0xff]  }
 0x101   : > { %1839 = vmatprep.mubr.bf16.mxu0 %v6851_v56 }
 0x108   : > { %1840 = vmatmul.mubr.bf16.vlgmr.msra.gmra.mrb[0].mxu0 %v734_v16 }
 0x109   : > { %1849 = vmatprep.mubr.bf16.mxu0 %v6851_v56 }
 0x110   : > { %1850 = vmatmul.mubr.bf16.gmra.mrb[4].mxu0 %v741_v19 }
 0x111   : > { %1859 = vmatprep.mubr.bf16.mxu0 %v6851_v56 }
 0x118   : > { %1860 = vmatmul.mubr.bf16.gmra.mrb[8].mxu0 %v748_v22 }
 0x119   : > { %1869 = vmatprep.mubr.bf16.mxu0 %v6851_v56 }
 0x120   : > { %1870 = vmatmul.mubr.bf16.gmra.mrb[12].mxu0 %v755_v25 }
 0x121   : > { %1879 = vmatprep.mubr.bf16.mxu0 %v6851_v56 }
 0x128   : > { %1880 = vmatmul.mubr.bf16.gmra.mrb[16].mxu0 %v762_v28 }
 0x129   : > { %1889 = vmatprep.mubr.bf16.mxu0 %v6851_v56 }
 0x130   : > { %1890 = vmatmul.mubr.bf16.gmra.mrb[20].mxu0 %v769_v31 }
 0x131   : > { %1899 = vmatprep.mubr.bf16.mxu0 %v6851_v56 }
 0x138   : > { %1900 = vmatmul.mubr.bf16.gmra.mrb[24].mxu0 %v776_v34 }
 0x139   : > { %1909 = vmatprep.mubr.bf16.mxu0 %v6851_v56 }
 0x140   : > { %1910 = vmatmul.mubr.bf16.gmra.mrb[28].mxu0 %v783_v37  ;;  %v6174_v37 = vld [vmem:[%s8931_s7 + $0x28] sm:$0xff]  }
 0x1db   : > { %v1841_v51 = vpop.f32.mrb[0].mxu0 }
 0x1dc   : > { %v5844_v52 = vadd.f32 %v1841_v51, %v7482_v49  ;;  %v1843_v53 = vpop.f32.mrb[1].mxu0 }
 0x1dd   : > { %v5845_v54 = vadd.f32 %v1843_v53, %v7485_v50  ;;  %v1845_v55 = vpop.f32.mrb[2].mxu0 }
 0x1de   : > { %v5846_v57 = vadd.f32 %v1845_v55, %v7482_v49  ;;  %v1847_v58 = vpop.f32.mrb[3].mxu0  ;;  %v1920_v60 = vmax.f32 %v5844_v52, 0.0 }
 0x1df   : > { %v5847_v59 = vadd.f32 %v1847_v58, %v7485_v50  ;;  %v1921_v62 = vmax.f32 %v5845_v54, 0.0 }
 0x1e0   : > { %v1922_v61 = vmax.f32 %v5846_v57, 0.0 }
 0x1e1   : > { %v1923_v63 = vmax.f32 %v5847_v59, 0.0 }
 0x1e2   : > { %v1952_v0 = vpack.c.bf16 %v1922_v61, %v1920_v60 }
 0x1e3   : > { %v1851_v1 = vpop.f32.mrb[4].mxu0  ;;  %v1953_v2 = vpack.c.bf16 %v1923_v63, %v1921_v62 }
 0x1e4   : > { %v5848_v3 = vadd.f32 %v1851_v1, %v7482_v49  ;;  %v1853_v4 = vpop.f32.mrb[5].mxu0 }
 0x1e5   : > { %v5849_v6 = vadd.f32 %v1853_v4, %v7485_v50  ;;  %v1855_v7 = vpop.f32.mrb[6].mxu0  ;;  %2135 = vmatprep.mubr.bf16.mxu1 %v1953_v2 }
 0x1e6   : > { %v5850_v8 = vadd.f32 %v1855_v7, %v7482_v49  ;;  %v1857_v9 = vpop.f32.mrb[7].mxu0  ;;  %2136 = vmatmul.mubr.bf16.vlgmr.msra.gmra.mrb[0].mxu1 %v1952_v0  ;;  %v1924_v11 = vmax.f32 %v5848_v3, 0.0 }
 0x1e7   : > { %v5851_v10 = vadd.f32 %v1857_v9, %v7485_v50  ;;  %5779 = vmatpush3.bf16.msra.mxu1 %v6169_v43  ;;  %v1925_v14 = vmax.f32 %v5849_v6, 0.0 }
 0x1e8   : > { %v1926_v12 = vmax.f32 %v5850_v8, 0.0  ;;  %5780 = vmatprep.subr.bf16.mxu1 %v6170_v5 }
 0x1e9   : > { %v1927_v15 = vmax.f32 %v5851_v10, 0.0 }
 0x1ea   : > { %v1954_v16 = vpack.c.bf16 %v1926_v12, %v1924_v11 }
 0x1eb   : > { %v1955_v17 = vpack.c.bf16 %v1927_v15, %v1925_v14  ;;  %v1861_v18 = vpop.f32.mrb[8].mxu0  ;;  %5781 = vmatpush3.bf16.msra.mxu1 %v6170_v5 }
 0x1ec   : > { %v5852_v19 = vadd.f32 %v1861_v18, %v7482_v49  ;;  %v1863_v20 = vpop.f32.mrb[9].mxu0  ;;  %5782 = vmatprep.subr.bf16.mxu1 %v6171_v13 }
 0x1ed   : > { %v5853_v22 = vadd.f32 %v1863_v20, %v7485_v50  ;;  %v1865_v23 = vpop.f32.mrb[10].mxu0  ;;  %2143 = vmatprep.mubr.bf16.mxu1 %v1955_v17 }
 0x1ee   : > { %v5854_v24 = vadd.f32 %v1865_v23, %v7482_v49  ;;  %v1867_v25 = vpop.f32.mrb[11].mxu0  ;;  %2144 = vmatmul.mubr.bf16.gmra.mrb[4].mxu1 %v1954_v16  ;;  %v1928_v27 = vmax.f32 %v5852_v19, 0.0 }
 0x1ef   : > { %v5855_v26 = vadd.f32 %v1867_v25, %v7485_v50  ;;  %5783 = vmatpush3.bf16.msra.mxu1 %v6171_v13  ;;  %v1929_v30 = vmax.f32 %v5853_v22, 0.0 }
 0x1f0   : > { %v1930_v28 = vmax.f32 %v5854_v24, 0.0  ;;  %5784 = vmatprep.subr.bf16.mxu1 %v6172_v21 }
 0x1f1   : > { %v1931_v31 = vmax.f32 %v5855_v26, 0.0 }
 0x1f2   : > { %v1956_v32 = vpack.c.bf16 %v1930_v28, %v1928_v27 }
 0x1f3   : > { %v1957_v33 = vpack.c.bf16 %v1931_v31, %v1929_v30  ;;  %v1871_v34 = vpop.f32.mrb[12].mxu0  ;;  %5785 = vmatpush3.bf16.msra.mxu1 %v6172_v21 }
 0x1f4   : > { %v5856_v35 = vadd.f32 %v1871_v34, %v7482_v49  ;;  %v1873_v36 = vpop.f32.mrb[13].mxu0  ;;  %5786 = vmatprep.subr.bf16.mxu1 %v6173_v29 }
 0x1f5   : > { %v5857_v38 = vadd.f32 %v1873_v36, %v7485_v50  ;;  %v1875_v39 = vpop.f32.mrb[14].mxu0  ;;  %2151 = vmatprep.mubr.bf16.mxu1 %v1957_v33 }
 0x1f6   : > { %v5858_v40 = vadd.f32 %v1875_v39, %v7482_v49  ;;  %v1877_v41 = vpop.f32.mrb[15].mxu0  ;;  %2152 = vmatmul.mubr.bf16.gmra.mrb[8].mxu1 %v1956_v32  ;;  %v1932_v43 = vmax.f32 %v5856_v35, 0.0 }
 0x1f7   : > { %v5859_v42 = vadd.f32 %v1877_v41, %v7485_v50  ;;  %5787 = vmatpush3.bf16.msra.mxu1 %v6173_v29  ;;  %v1933_v47 = vmax.f32 %v5857_v38, 0.0 }
 0x1f8   : > { %v1934_v44 = vmax.f32 %v5858_v40, 0.0  ;;  %5788 = vmatprep.subr.bf16.mxu1 %v6174_v37 }
 0x1f9   : > { %v1935_v51 = vmax.f32 %v5859_v42, 0.0 }
 0x1fa   : > { %v1958_v52 = vpack.c.bf16 %v1934_v44, %v1932_v43 }
 0x1fb   : > { %v1959_v53 = vpack.c.bf16 %v1935_v51, %v1933_v47  ;;  %v1881_v54 = vpop.f32.mrb[16].mxu0  ;;  %5789 = vmatpush3.bf16.msra.mxu1 %v6174_v37 }
 0x1fc   : > { %v5860_v55 = vadd.f32 %v1881_v54, %v7482_v49  ;;  %v1883_v57 = vpop.f32.mrb[17].mxu0 }
 0x1fd   : > { %v5861_v58 = vadd.f32 %v1883_v57, %v7485_v50  ;;  %v1885_v59 = vpop.f32.mrb[18].mxu0  ;;  %2159 = vmatprep.mubr.bf16.mxu1 %v1959_v53  ;;  %v7543_v53 = vld [vmem:[%s8930_s6] ss:$0 sm:$0xff] }
 0x1fe   : > { %v5862_v60 = vadd.f32 %v1885_v59, %v7482_v49  ;;  %v1887_v61 = vpop.f32.mrb[19].mxu0  ;;  %2160 = vmatmul.mubr.bf16.gmra.mrb[12].mxu1 %v1958_v52  ;;  %v1936_v63 = vmax.f32 %v5860_v55, 0.0  ;;  %v6175_v52 = vld [vmem:[%s8931_s7 + $0x30] sm:$0xff]  }
 0x1ff   : > { %v5863_v62 = vadd.f32 %v1887_v61, %v7485_v50  ;;  %v1937_v1 = vmax.f32 %v5861_v58, 0.0  ;;  %5790 = vmatprep.subr.bf16.mxu1 %v6175_v52 }
 0x200   : > { %v1938_v0 = vmax.f32 %v5862_v60, 0.0  ;;  %5791 = vmatpush3.bf16.msra.mxu1 %v6175_v52 }
 0x201   : > { %v1939_v2 = vmax.f32 %v5863_v62, 0.0 }
 0x202   : > { %v1960_v3 = vpack.c.bf16 %v1938_v0, %v1936_v63 }
 0x203   : > { %v1961_v4 = vpack.c.bf16 %v1939_v2, %v1937_v1  ;;  %v1891_v5 = vpop.f32.mrb[20].mxu0 }
 0x204   : > { %v5864_v6 = vadd.f32 %v1891_v5, %v7482_v49  ;;  %v1893_v7 = vpop.f32.mrb[21].mxu0 }
 0x205   : > { %v5865_v8 = vadd.f32 %v1893_v7, %v7485_v50  ;;  %v1895_v9 = vpop.f32.mrb[22].mxu0  ;;  %2167 = vmatprep.mubr.bf16.mxu1 %v1961_v4 }
 0x206   : > { %v5866_v10 = vadd.f32 %v1895_v9, %v7482_v49  ;;  %v1897_v11 = vpop.f32.mrb[23].mxu0  ;;  %2168 = vmatmul.mubr.bf16.gmra.mrb[16].mxu1 %v1960_v3  ;;  %v1940_v13 = vmax.f32 %v5864_v6, 0.0 }
 0x207   : > { %v5867_v12 = vadd.f32 %v1897_v11, %v7485_v50  ;;  %v1941_v15 = vmax.f32 %v5865_v8, 0.0 }
 0x208   : > { %v1942_v14 = vmax.f32 %v5866_v10, 0.0 }
 0x209   : > { %v1943_v16 = vmax.f32 %v5867_v12, 0.0 }
 0x20a   : > { %v1962_v17 = vpack.c.bf16 %v1942_v14, %v1940_v13 }
 0x20b   : > { %v1963_v18 = vpack.c.bf16 %v1943_v16, %v1941_v15  ;;  %v1901_v19 = vpop.f32.mrb[24].mxu0 }
 0x20c   : > { %v5868_v20 = vadd.f32 %v1901_v19, %v7482_v49  ;;  %v1903_v21 = vpop.f32.mrb[25].mxu0 }
 0x20d   : > { %v5869_v22 = vadd.f32 %v1903_v21, %v7485_v50  ;;  %v1905_v23 = vpop.f32.mrb[26].mxu0  ;;  %2175 = vmatprep.mubr.bf16.mxu1 %v1963_v18 }
 0x20e   : > { %v5870_v24 = vadd.f32 %v1905_v23, %v7482_v49  ;;  %v1907_v25 = vpop.f32.mrb[27].mxu0  ;;  %2176 = vmatmul.mubr.bf16.gmra.mrb[20].mxu1 %v1962_v17  ;;  %v1944_v27 = vmax.f32 %v5868_v20, 0.0 }
 0x20f   : > { %v5871_v26 = vadd.f32 %v1907_v25, %v7485_v50  ;;  %v1945_v29 = vmax.f32 %v5869_v22, 0.0 }
 0x210   : > { %v1946_v28 = vmax.f32 %v5870_v24, 0.0 }
 0x211   : > { %v1947_v30 = vmax.f32 %v5871_v26, 0.0 }
 0x212   : > { %v1964_v31 = vpack.c.bf16 %v1946_v28, %v1944_v27 }
 0x213   : > { %v1965_v32 = vpack.c.bf16 %v1947_v30, %v1945_v29  ;;  %v1911_v33 = vpop.f32.mrb[28].mxu0 }
 0x214   : > { %v5872_v34 = vadd.f32 %v1911_v33, %v7482_v49  ;;  %v1913_v35 = vpop.f32.mrb[29].mxu0 }
 0x215   : > { %v5873_v36 = vadd.f32 %v1913_v35, %v7485_v50  ;;  %v1915_v37 = vpop.f32.mrb[30].mxu0  ;;  %2183 = vmatprep.mubr.bf16.mxu1 %v1965_v32 }
 0x216   : > { %v5874_v38 = vadd.f32 %v1915_v37, %v7482_v49  ;;  %v1917_v39 = vpop.f32.mrb[31].mxu0  ;;  %2184 = vmatmul.mubr.bf16.gmra.mrb[24].mxu1 %v1964_v31  ;;  %v1948_v41 = vmax.f32 %v5872_v34, 0.0  ;;  %v6176_v49 = vld [vmem:[%s8931_s7 + $0x38] sm:$0xff]  }
 0x217   : > { %v5875_v40 = vadd.f32 %v1917_v39, %v7485_v50  ;;  %v1949_v43 = vmax.f32 %v5873_v36, 0.0  ;;  %5792 = vmatprep.subr.bf16.mxu1 %v6176_v49 }
 0x218   : > { %v1950_v42 = vmax.f32 %v5874_v38, 0.0  ;;  %5793 = vmatpush3.bf16.msra.mxu1 %v6176_v49 }
 0x219   : > { %v1951_v44 = vmax.f32 %v5875_v40, 0.0 }
 0x21a   : > { %v1966_v47 = vpack.c.bf16 %v1950_v42, %v1948_v41 }
 0x21b   : > { %v1967_v51 = vpack.c.bf16 %v1951_v44, %v1949_v43 }
 0x21d   : > { %2191 = vmatprep.mubr.bf16.mxu1 %v1967_v51 }
 0x21e   : > { %2192 = vmatmul.mubr.bf16.gmra.mrb[28].mxu1 %v1966_v47 }
 0x2b9   : > { %v5641_v50 = vpop.f32.mrb[0].mxu1 }
 0x2ba   : > { %v5642_v54 = vpop.f32.mrb[1].mxu1 }
 0x2bb   : > { %v5643_v55 = vadd.f32 %v5642_v54, %v5641_v50  ;;  %v5644_v57 = vpop.f32.mrb[2].mxu1 }
 0x2bc   : > { %v5645_v58 = vpop.f32.mrb[3].mxu1 }
 0x2bd   : > { %v2138_v59 = vadd.f32 %v5643_v55, %v7543_v53  ;;  %v5646_v60 = vadd.f32 %v5645_v58, %v5644_v57 }
 0x2bf   : > { %v2141_v61 = vadd.f32 %v5646_v60, %v7543_v53  ;;  %v2200_v62 = vmax.f32 %v2138_v59, 0.0 }
 0x2c1   : > { %v2201_v63 = vmax.f32 %v2141_v61, 0.0  ;;  %v5647_v0 = vpop.f32.mrb[4].mxu1 }
 0x2c2   : > { %v5648_v1 = vpop.f32.mrb[5].mxu1 }
 0x2c3   : > { %v5649_v2 = vadd.f32 %v5648_v1, %v5647_v0  ;;  %v5650_v3 = vpop.f32.mrb[6].mxu1  ;;  %v2216_v4 = vpack.c.bf16 %v2201_v63, %v2200_v62 }
 0x2c4   : > { %v5651_v5 = vpop.f32.mrb[7].mxu1 }
 0x2c5   : > { %v2146_v6 = vadd.f32 %v5649_v2, %v7543_v53  ;;  %v5652_v7 = vadd.f32 %v5651_v5, %v5650_v3  ;;  %5794 = vmatprep.mubr.bf16.mxu1 %v2216_v4 }
 0x2c7   : > { %v2149_v8 = vadd.f32 %v5652_v7, %v7543_v53  ;;  %v2202_v9 = vmax.f32 %v2146_v6, 0.0 }
 0x2c9   : > { %v2203_v10 = vmax.f32 %v2149_v8, 0.0  ;;  %v5653_v11 = vpop.f32.mrb[8].mxu1 }
 0x2ca   : > { %v5654_v12 = vpop.f32.mrb[9].mxu1 }
 0x2cb   : > { %v2217_v13 = vpack.c.bf16 %v2203_v10, %v2202_v9  ;;  %v5655_v14 = vadd.f32 %v5654_v12, %v5653_v11  ;;  %v5656_v15 = vpop.f32.mrb[10].mxu1 }
 0x2cc   : > { %v5657_v16 = vpop.f32.mrb[11].mxu1 }
 0x2cd   : > { %v2154_v17 = vadd.f32 %v5655_v14, %v7543_v53  ;;  %v5658_v18 = vadd.f32 %v5657_v16, %v5656_v15  ;;  %5795 = vmatmul.mubr.bf16.vlgmr.msra.gmra.mrb[32].mxu1 %v2217_v13 }
 0x2cf   : > { %v2157_v19 = vadd.f32 %v5658_v18, %v7543_v53  ;;  %v2204_v20 = vmax.f32 %v2154_v17, 0.0 }
 0x2d1   : > { %v2205_v21 = vmax.f32 %v2157_v19, 0.0  ;;  %v5659_v22 = vpop.f32.mrb[12].mxu1  ;;  %v6177_v19 = vld [vmem:[%s8933_s9] sm:$0xff]  }
 0x2d2   : > { %v5660_v23 = vpop.f32.mrb[13].mxu1  ;;  %5810 = vmatprep.subr.bf16.mxu1 %v6177_v19 }
 0x2d3   : > { %v5661_v24 = vadd.f32 %v5660_v23, %v5659_v22  ;;  %v5662_v25 = vpop.f32.mrb[14].mxu1  ;;  %v2218_v26 = vpack.c.bf16 %v2205_v21, %v2204_v20  ;;  %5811 = vmatpush3.bf16.msra.mxu1 %v6177_v19  ;;  %v7570_v20 = vld [vmem:[%s8932_s8] ss:$0 sm:$0xff] }
 0x2d4   : > { %v5663_v27 = vpop.f32.mrb[15].mxu1 }
 0x2d5   : > { %v2162_v28 = vadd.f32 %v5661_v24, %v7543_v53  ;;  %v5664_v29 = vadd.f32 %v5663_v27, %v5662_v25  ;;  %5798 = vmatprep.mubr.bf16.mxu1 %v2218_v26 }
 0x2d7   : > { %v2165_v30 = vadd.f32 %v5664_v29, %v7543_v53  ;;  %v2206_v31 = vmax.f32 %v2162_v28, 0.0 }
 0x2d9   : > { %v2207_v32 = vmax.f32 %v2165_v30, 0.0  ;;  %v5665_v33 = vpop.f32.mrb[16].mxu1 }
 0x2da   : > { %v5666_v34 = vpop.f32.mrb[17].mxu1 }
 0x2db   : > { %v5667_v35 = vadd.f32 %v5666_v34, %v5665_v33  ;;  %v5668_v36 = vpop.f32.mrb[18].mxu1  ;;  %v2219_v37 = vpack.c.bf16 %v2207_v32, %v2206_v31 }
 0x2dc   : > { %v5669_v38 = vpop.f32.mrb[19].mxu1 }
 0x2dd   : > { %v2170_v39 = vadd.f32 %v5667_v35, %v7543_v53  ;;  %v5670_v40 = vadd.f32 %v5669_v38, %v5668_v36  ;;  %5799 = vmatmul.mubr.bf16.gmra.mrb[36].mxu1 %v2219_v37 }
 0x2df   : > { %v2173_v41 = vadd.f32 %v5670_v40, %v7543_v53  ;;  %v2208_v42 = vmax.f32 %v2170_v39, 0.0 }
 0x2e1   : > { %v2209_v43 = vmax.f32 %v2173_v41, 0.0  ;;  %v5671_v44 = vpop.f32.mrb[20].mxu1 }
 0x2e2   : > { %v5672_v47 = vpop.f32.mrb[21].mxu1 }
 0x2e3   : > { %v5673_v51 = vadd.f32 %v5672_v47, %v5671_v44  ;;  %v5674_v52 = vpop.f32.mrb[22].mxu1  ;;  %v2220_v49 = vpack.c.bf16 %v2209_v43, %v2208_v42 }
 0x2e4   : > { %v5675_v50 = vpop.f32.mrb[23].mxu1 }
 0x2e5   : > { %v2178_v54 = vadd.f32 %v5673_v51, %v7543_v53  ;;  %v5676_v55 = vadd.f32 %v5675_v50, %v5674_v52  ;;  %5802 = vmatprep.mubr.bf16.mxu1 %v2220_v49 }
 0x2e7   : > { %v2181_v57 = vadd.f32 %v5676_v55, %v7543_v53  ;;  %v2210_v58 = vmax.f32 %v2178_v54, 0.0 }
 0x2e9   : > { %v2211_v59 = vmax.f32 %v2181_v57, 0.0  ;;  %v5677_v60 = vpop.f32.mrb[24].mxu1 }
 0x2ea   : > { %v5678_v61 = vpop.f32.mrb[25].mxu1 }
 0x2eb   : > { %v5679_v62 = vadd.f32 %v5678_v61, %v5677_v60  ;;  %v5680_v63 = vpop.f32.mrb[26].mxu1  ;;  %v2221_v0 = vpack.c.bf16 %v2211_v59, %v2210_v58 }
 0x2ec   : > { %v5681_v1 = vpop.f32.mrb[27].mxu1 }
 0x2ed   : > { %v2186_v2 = vadd.f32 %v5679_v62, %v7543_v53  ;;  %v5682_v3 = vadd.f32 %v5681_v1, %v5680_v63  ;;  %5803 = vmatmul.mubr.bf16.gmra.mrb[40].mxu1 %v2221_v0 }
 0x2ef   : > { %v2189_v4 = vadd.f32 %v5682_v3, %v7543_v53  ;;  %v2212_v5 = vmax.f32 %v2186_v2, 0.0 }
 0x2f1   : > { %v2213_v6 = vmax.f32 %v2189_v4, 0.0  ;;  %v5683_v7 = vpop.f32.mrb[28].mxu1 }
 0x2f2   : > { %v5684_v8 = vpop.f32.mrb[29].mxu1 }
 0x2f3   : > { %v5685_v9 = vadd.f32 %v5684_v8, %v5683_v7  ;;  %v5686_v10 = vpop.f32.mrb[30].mxu1  ;;  %v2222_v11 = vpack.c.bf16 %v2213_v6, %v2212_v5 }
 0x2f4   : > { %v5687_v12 = vpop.f32.mrb[31].mxu1 }
 0x2f5   : > { %v2194_v13 = vadd.f32 %v5685_v9, %v7543_v53  ;;  %v5688_v14 = vadd.f32 %v5687_v12, %v5686_v10  ;;  %5806 = vmatprep.mubr.bf16.mxu1 %v2222_v11 }
 0x2f7   : > { %v2197_v15 = vadd.f32 %v5688_v14, %v7543_v53  ;;  %v2214_v16 = vmax.f32 %v2194_v13, 0.0 }
 0x2f9   : > { %v2215_v17 = vmax.f32 %v2197_v15, 0.0 }
 0x2fb   : > { %v2223_v18 = vpack.c.bf16 %v2215_v17, %v2214_v16 }
 0x2fd   : > { %5807 = vmatmul.mubr.bf16.gmra.mrb[44].mxu1 %v2223_v18 }
 0x3a0   : > { %v5796_v53 = vpop.f32.mrb[32].mxu1 }
 0x3a1   : > { %v7579_v21 = vadd.f32 %v5796_v53, %v7570_v20  ;;  %v2329_v22 = vpop.f32.mrb[33].mxu1 }
 0x3a2   : > { %v7582_v23 = vadd.f32 %v7570_v20, %v2329_v22  ;;  %v5797_v24 = vpop.f32.mrb[34].mxu1 }
 0x3a3   : > { %v2394_v25 = vmul.f32 0.5, %v7579_v21  ;;  %5089 = vst.msk [vmem:[%s7576_s19 + $0x10] sm:$0xff] %vm5086_vm0, %v7579_v21  ;;  %v7589_v26 = vadd.f32 %v5797_v24, %v7570_v20  ;;  %v2332_v27 = vpop.f32.mrb[35].mxu1 }
 0x3a4   : > { %v2392_v28 = vmul.f32 0.5, %v7582_v23  ;;  %5087 = vst.msk [vmem:[%s7576_s19] sm:$0xff] %vm5086_vm0, %v7582_v23  ;;  %v7596_v29 = vadd.f32 %v7570_v20, %v2332_v27 }
 0x3a5   : > { %v2412_v30 = vmul.f32 1.442695, %v2394_v25  ;;  %v2395_v31 = vmul.f32 0.5, %v7589_v26  ;;  %5090 = vst.msk [vmem:[%s7576_s19 + $0x18] sm:$0xff] %vm5086_vm0, %v7589_v26 }
 0x3a6   : > { %v2408_v32 = vmul.f32 1.442695, %v2392_v28  ;;  %v2393_v33 = vmul.f32 0.5, %v7596_v29  ;;  %5088 = vst.msk [vmem:[%s7576_s19 + $0x8] sm:$0xff] %vm5086_vm0, %v7596_v29 }
 0x3a7   : > { %6362 = vpow2.f32 %v2412_v30  ;;  %v2414_v34 = vmul.f32 1.442695, %v2395_v31 }
 0x3a8   : > { %6364 = vpow2.f32 %v2408_v32  ;;  %v2410_v35 = vmul.f32 1.442695, %v2393_v33 }
 0x3a9   : > { %6366 = vpow2.f32 %v2414_v34 }
 0x3aa   : > { %6368 = vpow2.f32 %v2410_v35 }
 0x3b0   : > { %v5800_v36 = vpop.f32.mrb[36].mxu1 }
 0x3b1   : > { %v6363_v37 = vpop.eup %6362  ;;  %v7607_v38 = vadd.f32 %v5800_v36, %v7570_v20  ;;  %v2345_v39 = vpop.f32.mrb[37].mxu1 }
 0x3b2   : > { %v6365_v40 = vpop.eup %6364  ;;  %v7610_v41 = vadd.f32 %v7570_v20, %v2345_v39  ;;  %2476 = vrot.lane.b32.xlu1 %v6363_v37, %s6852_s20  ;;  %v5801_v42 = vpop.f32.mrb[38].mxu1 }
 0x3b3   : > { %5093 = vst.msk [vmem:[%s7576_s19 + $0x30] sm:$0xff] %vm5086_vm0, %v7607_v38  ;;  %v7617_v43 = vadd.f32 %v5801_v42, %v7570_v20  ;;  %v2348_v44 = vpop.f32.mrb[39].mxu1  ;;  %2472 = vrot.lane.b32.xlu0 %v6365_v40, %s6852_s20  ;;  %v2398_v47 = vmul.f32 0.5, %v7607_v38  ;;  %v6367_v49 = vpop.eup %6366 }
 0x3b4   : > { %v2396_v51 = vmul.f32 0.5, %v7610_v41  ;;  %5091 = vst.msk [vmem:[%s7576_s19 + $0x20] sm:$0xff] %vm5086_vm0, %v7610_v41  ;;  %v7626_v52 = vadd.f32 %v7570_v20, %v2348_v44  ;;  %v6369_v50 = vpop.eup %6368 }
 0x3b5   : > { %5094 = vst.msk [vmem:[%s7576_s19 + $0x38] sm:$0xff] %vm5086_vm0, %v7617_v43  ;;  %v2399_v55 = vmul.f32 0.5, %v7617_v43  ;;  %v2420_v58 = vmul.f32 1.442695, %v2398_v47 }
 0x3b6   : > { %v2416_v54 = vmul.f32 1.442695, %v2396_v51  ;;  %v2397_v57 = vmul.f32 0.5, %v7626_v52  ;;  %5092 = vst.msk [vmem:[%s7576_s19 + $0x28] sm:$0xff] %vm5086_vm0, %v7626_v52  ;;  %2478 = vrot.lane.b32.xlu1 %v6367_v49, %s6852_s20  ;;  %v2562_v49 = vld [vmem:[%s7708_s23] sm:$0xff] }
 0x3b7   : > { %2474 = vrot.lane.b32.xlu0 %v6369_v50, %s6852_s20  ;;  %v2422_v60 = vmul.f32 1.442695, %v2399_v55  ;;  %v2563_v50 = vld [vmem:[%s7708_s23 + $0x8] sm:$0xff]  ;;  %v2564_v55 = vld [vmem:[%s7708_s23 + $0x10] sm:$0xff] }
 0x3b8   : > { %6370 = vpow2.f32 %v2416_v54  ;;  %v2418_v59 = vmul.f32 1.442695, %v2397_v57  ;;  %v2565_v54 = vld [vmem:[%s7708_s23 + $0x18] sm:$0xff]  ;;  %v2567_v57 = vld [vmem:[%s7708_s23 + $0x28] sm:$0xff] }
 0x3ba   : > { %6372 = vpow2.f32 %v2418_v59  ;;  %v2566_v59 = vld [vmem:[%s7708_s23 + $0x20] sm:$0xff] }
 0x3bb   : > { %6374 = vpow2.f32 %v2420_v58  ;;  %v6180_v58 = vld [vmem:[%s8936_s12 + $0x4] ss:$8 sps:$4 sm:$0xff]  }
 0x3bc   : > { %6376 = vpow2.f32 %v2422_v60  ;;  %2964 = vmatprep.subr.bf16.mxu1 %v6180_v58  ;;  %v2569_v60 = vld [vmem:[%s7708_s23 + $0x38] sm:$0xff] }
 0x3bd   : > { %v6187_v58 = vld [vmem:[%s8936_s12 + $0x30] ss:$8 sps:$4 sm:$0xff]  }
 0x3c0   : > { %v5804_v61 = vpop.f32.mrb[40].mxu1 }
 0x3c1   : > { %v7639_v62 = vadd.f32 %v5804_v61, %v7570_v20  ;;  %v2361_v63 = vpop.f32.mrb[41].mxu1  ;;  %v2568_v61 = vld [vmem:[%s7708_s23 + $0x30] sm:$0xff] }
 0x3c2   : > { %v6371_v0 = vpop.eup %6370  ;;  %v7642_v1 = vadd.f32 %v7570_v20, %v2361_v63  ;;  %v5805_v2 = vpop.f32.mrb[42].mxu1  ;;  %v2571_v63 = vld [vmem:[%s7708_s23 + $0x48] sm:$0xff] }
 0x3c3   : > { %5097 = vst.msk [vmem:[%s7576_s19 + $0x50] sm:$0xff] %vm5086_vm0, %v7639_v62  ;;  %v7648_v3 = vadd.f32 %v5805_v2, %v7570_v20  ;;  %v2364_v4 = vpop.f32.mrb[43].mxu1  ;;  %2480 = vrot.lane.b32.xlu0 %v6371_v0, %s6852_s20  ;;  %v2402_v6 = vmul.f32 0.5, %v7639_v62  ;;  %v2570_v0 = vld [vmem:[%s7708_s23 + $0x40] sm:$0xff]  ;;  %v2573_v2 = vld [vmem:[%s7708_s23 + $0x58] sm:$0xff] }
 0x3c4   : > { %v6373_v5 = vpop.eup %6372  ;;  %v2400_v7 = vmul.f32 0.5, %v7642_v1  ;;  %5095 = vst.msk [vmem:[%s7576_s19 + $0x40] sm:$0xff] %vm5086_vm0, %v7642_v1  ;;  %v7657_v8 = vadd.f32 %v7570_v20, %v2364_v4  ;;  %v2572_v4 = vld [vmem:[%s7708_s23 + $0x50] sm:$0xff] }
 0x3c5   : > { %5098 = vst.msk [vmem:[%s7576_s19 + $0x58] sm:$0xff] %vm5086_vm0, %v7648_v3  ;;  %2482 = vrot.lane.b32.xlu1 %v6373_v5, %s6852_s20  ;;  %v6375_v9 = vpop.eup %6374  ;;  %v2403_v11 = vmul.f32 0.5, %v7648_v3  ;;  %v2428_v14 = vmul.f32 1.442695, %v2402_v6  ;;  %v2575_v5 = vld [vmem:[%s7708_s23 + $0x68] sm:$0xff]  ;;  %v2574_v6 = vld [vmem:[%s7708_s23 + $0x60] sm:$0xff] }
 0x3c6   : > { %v2424_v10 = vmul.f32 1.442695, %v2400_v7  ;;  %v2401_v12 = vmul.f32 0.5, %v7657_v8  ;;  %5096 = vst.msk [vmem:[%s7576_s19 + $0x48] sm:$0xff] %vm5086_vm0, %v7657_v8  ;;  %v6377_v13 = vpop.eup %6376  ;;  %v2577_v7 = vld [vmem:[%s7708_s23 + $0x78] sm:$0xff] }
 0x3c7   : > { %2484 = vrot.lane.b32.xlu0 %v6375_v9, %s6852_s20  ;;  %v2430_v16 = vmul.f32 1.442695, %v2403_v11  ;;  %v2576_v9 = vld [vmem:[%s7708_s23 + $0x70] sm:$0xff]  ;;  %v2440_v11 = vld [vmem:[%s7735_s18] sm:$0xff] }
 0x3c8   : > { %6378 = vpow2.f32 %v2424_v10  ;;  %v2426_v15 = vmul.f32 1.442695, %v2401_v12 }
 0x3c9   : > { %2486 = vrot.lane.b32.xlu1 %v6377_v13, %s6852_s20  ;;  %v2442_v13 = vld [vmem:[%s7735_s18 + $0x10] sm:$0xff] }
 0x3ca   : > { %6380 = vpow2.f32 %v2426_v15  ;;  %v2441_v15 = vld [vmem:[%s7735_s18 + $0x8] sm:$0xff] }
 0x3cb   : > { %6382 = vpow2.f32 %v2428_v14  ;;  %v2443_v14 = vld [vmem:[%s7735_s18 + $0x18] sm:$0xff] }
 0x3cc   : > { %6384 = vpow2.f32 %v2430_v16 }
 0x3d0   : > { %v5808_v17 = vpop.f32.mrb[44].mxu1 }
 0x3d1   : > { %v7671_v18 = vadd.f32 %v5808_v17, %v7570_v20  ;;  %v2377_v19 = vpop.f32.mrb[45].mxu1 }
 0x3d2   : > { %v6379_v53 = vpop.eup %6378  ;;  %v7674_v22 = vadd.f32 %v7570_v20, %v2377_v19  ;;  %v5809_v24 = vpop.f32.mrb[46].mxu1 }
 0x3d3   : > { %5101 = vst.msk [vmem:[%s7576_s19 + $0x70] sm:$0xff] %vm5086_vm0, %v7671_v18  ;;  %v7680_v25 = vadd.f32 %v5809_v24, %v7570_v20  ;;  %v2380_v27 = vpop.f32.mrb[47].mxu1  ;;  %2488 = vrot.lane.b32.xlu0 %v6379_v53, %s6852_s20  ;;  %v2406_v30 = vmul.f32 0.5, %v7671_v18 }
 0x3d4   : > { %v6381_v28 = vpop.eup %6380  ;;  %v2404_v31 = vmul.f32 0.5, %v7674_v22  ;;  %5099 = vst.msk [vmem:[%s7576_s19 + $0x60] sm:$0xff] %vm5086_vm0, %v7674_v22  ;;  %v7689_v32 = vadd.f32 %v7570_v20, %v2380_v27 }
 0x3d5   : > { %5102 = vst.msk [vmem:[%s7576_s19 + $0x78] sm:$0xff] %vm5086_vm0, %v7680_v25  ;;  %2490 = vrot.lane.b32.xlu1 %v6381_v28, %s6852_s20  ;;  %v6383_v33 = vpop.eup %6382  ;;  %v2407_v35 = vmul.f32 0.5, %v7680_v25  ;;  %v2436_v20 = vmul.f32 1.442695, %v2406_v30 }
 0x3d6   : > { %v2432_v34 = vmul.f32 1.442695, %v2404_v31  ;;  %v2405_v36 = vmul.f32 0.5, %v7689_v32  ;;  %5100 = vst.msk [vmem:[%s7576_s19 + $0x68] sm:$0xff] %vm5086_vm0, %v7689_v32  ;;  %v6385_v37 = vpop.eup %6384  ;;  %s8435_s19 = scalar_lea.vmem %s8940_s16, %s5972_s30 }
 0x3d7   : > { %2492 = vrot.lane.b32.xlu0 %v6383_v33, %s6852_s20  ;;  %v2438_v40 = vmul.f32 1.442695, %v2407_v35  ;;  %v6178_v35 = vld [vmem:[%s8936_s12] ss:$8 sps:$4 sm:$0xff]  }
 0x3d8   : > { %6386 = vpow2.f32 %v2432_v34  ;;  %v2434_v39 = vmul.f32 1.442695, %v2405_v36 }
 0x3d9   : > { %2494 = vrot.lane.b32.xlu1 %v6385_v37, %s6852_s20  ;;  %v6183_v37 = vld [vmem:[%s8936_s12 + $0x14] ss:$8 sps:$4 sm:$0xff]  }
 0x3da   : > { %6388 = vpow2.f32 %v2434_v39 }
 0x3db   : > { %6390 = vpow2.f32 %v2436_v20  ;;  %v2445_v20 = vld [vmem:[%s7735_s18 + $0x28] sm:$0xff] }
 0x3dc   : > { %6392 = vpow2.f32 %v2438_v40  ;;  %v6184_v40 = vld [vmem:[%s8936_s12 + $0x20] ss:$8 sps:$4 sm:$0xff]  }
 0x3e2   : > { %v6387_v42 = vpop.eup %6386 }
 0x3e3   : > { %2496 = vrot.lane.b32.xlu0 %v6387_v42, %s6852_s20 }
 0x3e4   : > { %v6389_v44 = vpop.eup %6388 }
 0x3e5   : > { %2498 = vrot.lane.b32.xlu1 %v6389_v44, %s6852_s20  ;;  %v6391_v47 = vpop.eup %6390  ;;  %v2446_v44 = vld [vmem:[%s7735_s18 + $0x30] sm:$0xff] }
 0x3e6   : > { %v6393_v51 = vpop.eup %6392 }
 0x3e7   : > { %2500 = vrot.lane.b32.xlu0 %v6391_v47, %s6852_s20  ;;  %v6189_v47 = vld [vmem:[%s8936_s12 + $0x34] ss:$8 sps:$4 sm:$0xff]  }
 0x3e9   : > { %2502 = vrot.lane.b32.xlu1 %v6393_v51, %s6852_s20 }
 0x3eb   : > { %2581 = vperm.xlu0 %5983, %v2562_v49  }
 0x3ed   : > { %2586 = vperm.xlu1 %5984, %v2563_v50   ;;  %v2447_v50 = vld [vmem:[%s7735_s18 + $0x38] sm:$0xff] }
 0x3ef   : > { %2596 = vperm.xlu0 %5983, %v2565_v54  }
 0x3f1   : > { %2591 = vperm.xlu1 %5984, %v2564_v55  }
 0x3f3   : > { %2606 = vperm.xlu0 %5983, %v2567_v57  }
 0x3f5   : > { %2601 = vperm.xlu1 %5984, %v2566_v59  }
 0x3f7   : > { %2616 = vperm.xlu0 %5983, %v2569_v60   ;;  %v6192_v60 = vld [vmem:[%s8936_s12 + $0x44] ss:$8 sps:$4 sm:$0xff]  }
 0x3f9   : > { %2611 = vperm.xlu1 %5984, %v2568_v61  }
 0x3fb   : > { %2626 = vperm.xlu0 %5983, %v2571_v63  }
 0x3fd   : > { %2621 = vperm.xlu1 %5984, %v2570_v0   ;;  %v6190_v0 = vld [vmem:[%s8936_s12 + $0x40] ss:$8 sps:$4 sm:$0xff]  }
 0x3ff   : > { %2636 = vperm.xlu0 %5983, %v2573_v2  }
 0x401   : > { %2631 = vperm.xlu1 %5984, %v2572_v4   ;;  %v2448_v4 = vld [vmem:[%s7735_s18 + $0x40] sm:$0xff] }
 0x403   : > { %2646 = vperm.xlu0 %5983, %v2575_v5  }
 0x405   : > { %2641 = vperm.xlu1 %5984, %v2574_v6   ;;  %v2449_v6 = vld [vmem:[%s7735_s18 + $0x48] sm:$0xff] }
 0x407   : > { %2656 = vperm.xlu0 %5983, %v2577_v7  }
 0x409   : > { %2651 = vperm.xlu1 %5984, %v2576_v9  }
 0x424   : > { %v2477_v10 = vpop.permute.xlu1 %2476 }
 0x425   : > { %v2473_v12 = vpop.permute.xlu0 %2472  ;;  %v2522_v19 = vmul.f32 %v2477_v10, %v2442_v13 }
 0x426   : > { %v2520_v16 = vmul.f32 %v2473_v12, %v2440_v11  ;;  %v2451_v11 = vld [vmem:[%s7735_s18 + $0x58] sm:$0xff] }
 0x427   : > { %v2538_v33 = vadd.f32 %v2522_v19, %v7579_v21  ;;  %v6181_v21 = vld [vmem:[%s8936_s12 + $0x10] ss:$8 sps:$4 sm:$0xff]  }
 0x428   : > { %v2479_v17 = vpop.permute.xlu1 %2478  ;;  %v2536_v30 = vadd.f32 %v2520_v16, %v7582_v23  ;;  %v2444_v23 = vld [vmem:[%s7735_s18 + $0x20] sm:$0xff] }
 0x429   : > { %v2523_v53 = vmul.f32 %v2479_v17, %v2443_v14  ;;  %v2475_v24 = vpop.permute.xlu0 %2474 }
 0x42a   : > { %v2521_v27 = vmul.f32 %v2475_v24, %v2441_v15 }
 0x42b   : > { %v2539_v28 = vadd.f32 %v2523_v53, %v7589_v26  ;;  %v6186_v26 = vld [vmem:[%s8936_s12 + $0x24] ss:$8 sps:$4 sm:$0xff]  }
 0x42c   : > { %v2537_v31 = vadd.f32 %v2521_v27, %v7596_v29  ;;  %v2452_v27 = vld [vmem:[%s7735_s18 + $0x60] sm:$0xff] }
 0x42d   : > { %v2553_v36 = vpack.c.bf16 %v2539_v28, %v2538_v33 }
 0x42e   : > { %v2552_v34 = vpack.c.bf16 %v2537_v31, %v2536_v30 }
 0x430   : > { %5812 = vmatprep.mubr.msk.bf16.mxu1 %vm2687_vm1, %v2552_v34 }
 0x431   : > { %5813 = vmatmul.mubr.msk.bf16.vlgmr.msra.gmra.mrb[48].mxu1 %vm2687_vm1, %v2553_v36 }
 0x432   : > { %2965 = vmatpush1.bf16.msra.mxu1 %v6178_v35  ;;  %v2455_v35 = vld [vmem:[%s7735_s18 + $0x78] sm:$0xff] }
 0x433   : > { %2966 = vmatprep.subr.bf16.mxu1 %v6183_v37 }
 0x435   : > { %v2481_v29 = vpop.permute.xlu0 %2480 }
 0x436   : > { %v2524_v39 = vmul.f32 %v2481_v29, %v2444_v23  ;;  %2967 = vmatpush1.bf16.msra.mxu1 %v6181_v21 }
 0x437   : > { %v2483_v42 = vpop.permute.xlu1 %2482  ;;  %2968 = vmatprep.subr.bf16.mxu1 %v6186_v26 }
 0x438   : > { %v2525_v51 = vmul.f32 %v2483_v42, %v2445_v20  ;;  %v2540_v54 = vadd.f32 %v2524_v39, %v7610_v41  ;;  %v6201_v39 = vld [vmem:[%s8936_s12 + $0x74] ss:$8 sps:$4 sm:$0xff]   ;;  %v6204_v42 = vld [vmem:[%s8938_s14 + $0x4] ss:$28 sps:$4 sm:$0xff]  }
 0x439   : > { %v2485_v49 = vpop.permute.xlu0 %2484 }
 0x43a   : > { %v2541_v55 = vadd.f32 %v2525_v51, %v7626_v52  ;;  %v2526_v57 = vmul.f32 %v2485_v49, %v2446_v44  ;;  %2969 = vmatpush1.bf16.msra.mxu1 %v6184_v40  ;;  %v6199_v40 = vld [vmem:[%s8936_s12 + $0x70] ss:$8 sps:$4 sm:$0xff]   ;;  %v6213_v51 = vld [vmem:[%s8938_s14 + $0x4c] ss:$28 sps:$4 sm:$0xff]  }
 0x43b   : > { %v2487_v59 = vpop.permute.xlu1 %2486  ;;  %2970 = vmatprep.subr.bf16.mxu1 %v6189_v47  ;;  %v6205_v44 = vld [vmem:[%s8938_s14 + $0x10] ss:$28 sps:$4 sm:$0xff]   ;;  %v6211_v49 = vld [vmem:[%s8938_s14 + $0x48] ss:$28 sps:$4 sm:$0xff]  }
 0x43c   : > { %v2554_v61 = vpack.c.bf16 %v2541_v55, %v2540_v54  ;;  %v2527_v63 = vmul.f32 %v2487_v59, %v2447_v50  ;;  %v2542_v41 = vadd.f32 %v2526_v57, %v7607_v38  ;;  %v6207_v47 = vld [vmem:[%s8938_s14 + $0x14] ss:$28 sps:$4 sm:$0xff]   ;;  %v6219_v50 = vld [vmem:[%s8938_s14 + $0x84] ss:$28 sps:$4 sm:$0xff]   ;;  %v6225_v55 = vld [vmem:[%s8938_s14 + $0xbc] ss:$28 sps:$4 sm:$0xff]  }
 0x43d   : > { %4092 = vmatprep.subr.bf16.mxu0 %v6207_v47  ;;  %v6217_v54 = vld [vmem:[%s8938_s14 + $0x80] ss:$28 sps:$4 sm:$0xff]   ;;  %v6223_v57 = vld [vmem:[%s8938_s14 + $0xb8] ss:$28 sps:$4 sm:$0xff]   ;;  %v6229_v59 = vld [vmem:[%s8938_s14 + $0xf0] ss:$28 sps:$4 sm:$0xff]  }
 0x43e   : > { %v2543_v52 = vadd.f32 %v2527_v63, %v7617_v43  ;;  %5816 = vmatprep.mubr.msk.bf16.mxu1 %vm2687_vm1, %v2554_v61  ;;  %2971 = vmatpush1.bf16.msra.mxu1 %v6187_v58  ;;  %v2450_v43 = vld [vmem:[%s7735_s18 + $0x50] sm:$0xff]  ;;  %v6235_v61 = vld [vmem:[%s8938_s14 + $0x128] ss:$28 sps:$4 sm:$0xff]  }
 0x43f   : > { %2972 = vmatprep.subr.bf16.mxu1 %v6192_v60  ;;  %4093 = vmatpush1.bf16.msra.mxu0 %v6205_v44  ;;  %v6231_v58 = vld [vmem:[%s8938_s14 + $0xf4] ss:$28 sps:$4 sm:$0xff]   ;;  %v6237_v60 = vld [vmem:[%s8938_s14 + $0x12c] ss:$28 sps:$4 sm:$0xff]   ;;  %v6243_v63 = vld [vmem:[%s8938_s14 + $0x164] ss:$28 sps:$4 sm:$0xff]  }
 0x440   : > { %v2555_v2 = vpack.c.bf16 %v2543_v52, %v2542_v41  ;;  %4094 = vmatprep.subr.bf16.mxu0 %v6213_v51  ;;  %v6241_v41 = vld [vmem:[%s8938_s14 + $0x160] ss:$28 sps:$4 sm:$0xff]   ;;  %v6208_v44 = vld [vmem:[%s8938_s14 + $0x38] ss:$28 sps:$4 sm:$0xff]  }
 0x441   : > { %v6249_v52 = vld [vmem:[%s8938_s14 + $0x19c] ss:$28 sps:$4 sm:$0xff]   ;;  %v6216_v47 = vld [vmem:[%s8938_s14 + $0x74] ss:$28 sps:$4 sm:$0xff]  }
 0x442   : > { %5817 = vmatmul.mubr.msk.bf16.gmra.mrb[52].mxu1 %vm2687_vm1, %v2555_v2  ;;  %v6255_v2 = vld [vmem:[%s8938_s14 + $0x1d4] ss:$28 sps:$4 sm:$0xff]  }
 0x443   : > { %2973 = vmatpush1.bf16.msra.mxu1 %v6190_v0  ;;  %4095 = vmatpush1.bf16.msra.mxu0 %v6211_v49  ;;  %v6247_v0 = vld [vmem:[%s8938_s14 + $0x198] ss:$28 sps:$4 sm:$0xff]  }
 0x444   : > { %4096 = vmatprep.subr.bf16.mxu0 %v6219_v50 }
 0x445   : > { %v2489_v5 = vpop.permute.xlu0 %2488 }
 0x446   : > { %v2528_v7 = vmul.f32 %v2489_v5, %v2448_v4  ;;  %v6253_v4 = vld [vmem:[%s8938_s14 + $0x1d0] ss:$28 sps:$4 sm:$0xff]  }
 0x447   : > { %v2491_v38 = vpop.permute.xlu1 %2490  ;;  %4097 = vmatpush1.bf16.msra.mxu0 %v6217_v54  ;;  %v6261_v5 = vld [vmem:[%s8938_s14 + $0x20c] ss:$28 sps:$4 sm:$0xff]  }
 0x448   : > { %v2529_v9 = vmul.f32 %v2491_v38, %v2449_v6  ;;  %v2544_v12 = vadd.f32 %v2528_v7, %v7642_v1  ;;  %v2453_v1 = vld [vmem:[%s7735_s18 + $0x68] sm:$0xff]  ;;  %4098 = vmatprep.subr.bf16.mxu0 %v6225_v55  ;;  %v6267_v7 = vld [vmem:[%s8938_s14 + $0x244] ss:$28 sps:$4 sm:$0xff]  }
 0x449   : > { %v2493_v10 = vpop.permute.xlu0 %2492  ;;  %v6259_v6 = vld [vmem:[%s8938_s14 + $0x208] ss:$28 sps:$4 sm:$0xff]   ;;  %v6265_v38 = vld [vmem:[%s8938_s14 + $0x240] ss:$28 sps:$4 sm:$0xff]  }
 0x44a   : > { %v2545_v13 = vadd.f32 %v2529_v9, %v7657_v8  ;;  %v2530_v14 = vmul.f32 %v2493_v10, %v2450_v43  ;;  %v2454_v8 = vld [vmem:[%s7735_s18 + $0x70] sm:$0xff]  ;;  %v6273_v43 = vld [vmem:[%s8938_s14 + $0x27c] ss:$28 sps:$4 sm:$0xff]  }
 0x44b   : > { %v2495_v15 = vpop.permute.xlu1 %2494  ;;  %4099 = vmatpush1.bf16.msra.mxu0 %v6223_v57  ;;  %v6271_v9 = vld [vmem:[%s8938_s14 + $0x278] ss:$28 sps:$4 sm:$0xff]   ;;  %v6214_v57 = vld [vmem:[%s8938_s14 + $0x70] ss:$28 sps:$4 sm:$0xff]  }
 0x44c   : > { %v2556_v16 = vpack.c.bf16 %v2545_v13, %v2544_v12  ;;  %v2531_v17 = vmul.f32 %v2495_v15, %v2451_v11  ;;  %v2546_v19 = vadd.f32 %v2530_v14, %v7639_v62  ;;  %4100 = vmatprep.subr.bf16.mxu0 %v6231_v58  ;;  %v6279_v10 = vld [vmem:[%s8938_s14 + $0x2b4] ss:$28 sps:$4 sm:$0xff]   ;;  %v6285_v13 = vld [vmem:[%s8938_s14 + $0x2ec] ss:$28 sps:$4 sm:$0xff]  }
 0x44d   : > { %v6277_v11 = vld [vmem:[%s8938_s14 + $0x2b0] ss:$28 sps:$4 sm:$0xff]   ;;  %v6283_v15 = vld [vmem:[%s8938_s14 + $0x2e8] ss:$28 sps:$4 sm:$0xff]  }
 0x44e   : > { %v2547_v53 = vadd.f32 %v2531_v17, %v7648_v3  ;;  %5820 = vmatprep.mubr.msk.bf16.mxu1 %vm2687_vm1, %v2556_v16  ;;  %v7913_v16 = vld [vmem:[%s8934_s10] ss:$0 sm:$0xff] }
 0x44f   : > { %4101 = vmatpush1.bf16.msra.mxu0 %v6229_v59 }
 0x450   : > { %v2557_v24 = vpack.c.bf16 %v2547_v53, %v2546_v19  ;;  %4102 = vmatprep.subr.bf16.mxu0 %v6237_v60 }
 0x452   : > { %5821 = vmatmul.mubr.msk.bf16.gmra.mrb[56].mxu1 %vm2687_vm1, %v2557_v24 }
 0x453   : > { %4103 = vmatpush1.bf16.msra.mxu0 %v6235_v61  ;;  %v6222_v61 = vld [vmem:[%s8938_s14 + $0xac] ss:$28 sps:$4 sm:$0xff]  }
 0x454   : > { %4104 = vmatprep.subr.bf16.mxu0 %v6243_v63 }
 0x455   : > { %v2497_v28 = vpop.permute.xlu0 %2496 }
 0x456   : > { %v2532_v30 = vmul.f32 %v2497_v28, %v2452_v27 }
 0x457   : > { %v2499_v31 = vpop.permute.xlu1 %2498  ;;  %4105 = vmatpush1.bf16.msra.mxu0 %v6241_v41 }
 0x458   : > { %v2533_v33 = vmul.f32 %v2499_v31, %v2453_v1  ;;  %v2548_v36 = vadd.f32 %v2532_v30, %v7674_v22  ;;  %v6195_v22 = vld [vmem:[%s8936_s12 + $0x54] ss:$8 sps:$4 sm:$0xff]   ;;  %4106 = vmatprep.subr.bf16.mxu0 %v6249_v52  ;;  %v7922_v30 = vld [vmem:[%s8935_s11] ss:$0 sm:$0xff] }
 0x459   : > { %v2501_v34 = vpop.permute.xlu0 %2500  ;;  %2974 = vmatprep.subr.bf16.mxu1 %v6195_v22 }
 0x45a   : > { %v2549_v62 = vadd.f32 %v2533_v33, %v7689_v32  ;;  %v2534_v37 = vmul.f32 %v2501_v34, %v2454_v8  ;;  %v6193_v32 = vld [vmem:[%s8936_s12 + $0x50] ss:$8 sps:$4 sm:$0xff]  }
 0x45b   : > { %v2503_v3 = vpop.permute.xlu1 %2502  ;;  %2975 = vmatpush1.bf16.msra.mxu1 %v6193_v32  ;;  %4107 = vmatpush1.bf16.msra.mxu0 %v6247_v0 }
 0x45c   : > { %v2558_v21 = vpack.c.bf16 %v2549_v62, %v2548_v36  ;;  %v2535_v23 = vmul.f32 %v2503_v3, %v2455_v35  ;;  %v2550_v26 = vadd.f32 %v2534_v37, %v7671_v18  ;;  %v6198_v18 = vld [vmem:[%s8936_s12 + $0x64] ss:$8 sps:$4 sm:$0xff]   ;;  %4108 = vmatprep.subr.bf16.mxu0 %v6255_v2 }
 0x45d   : > { %2976 = vmatprep.subr.bf16.mxu1 %v6198_v18 }
 0x45e   : > { %v2551_v29 = vadd.f32 %v2535_v23, %v7680_v25  ;;  %5824 = vmatprep.mubr.msk.bf16.mxu1 %vm2687_vm1, %v2558_v21  ;;  %v6196_v25 = vld [vmem:[%s8936_s12 + $0x60] ss:$8 sps:$4 sm:$0xff]  }
 0x45f   : > { %2977 = vmatpush1.bf16.msra.mxu1 %v6196_v25  ;;  %4109 = vmatpush1.bf16.msra.mxu0 %v6253_v4  ;;  %v6202_v25 = vld [vmem:[%s8938_s14] ss:$28 sps:$4 sm:$0xff]  }
 0x460   : > { %v2559_v20 = vpack.c.bf16 %v2551_v29, %v2550_v26  ;;  %2978 = vmatprep.subr.bf16.mxu1 %v6201_v39  ;;  %4110 = vmatprep.subr.bf16.mxu0 %v6261_v5 }
 0x462   : > { %5825 = vmatmul.mubr.msk.bf16.gmra.mrb[60].mxu1 %vm2687_vm1, %v2559_v20 }
 0x463   : > { %2996 = vmatprep.mubr.bf16.mxu1 %v6851_v56  ;;  %2979 = vmatpush1.bf16.msra.mxu1 %v6199_v40  ;;  %v6210_v40 = vld [vmem:[%s8938_s14 + $0x3c] ss:$28 sps:$4 sm:$0xff]  }
 0x464   : > { %3866 = vmatprep.subr.bf16.mxu1 %v6204_v42  ;;  %4111 = vmatpush1.bf16.msra.mxu0 %v6259_v6 }
 0x465   : > { %4112 = vmatprep.subr.bf16.mxu0 %v6267_v7  ;;  %v6220_v7 = vld [vmem:[%s8938_s14 + $0xa8] ss:$28 sps:$4 sm:$0xff]  }
 0x468   : > { %4113 = vmatpush1.bf16.msra.mxu0 %v6265_v38 }
 0x469   : > { %4114 = vmatprep.subr.bf16.mxu0 %v6273_v43  ;;  %v6228_v43 = vld [vmem:[%s8938_s14 + $0xe4] ss:$28 sps:$4 sm:$0xff]  }
 0x46a   : > { %v2582_v14 = vpop.permute.xlu0 %2581 }
 0x46b   : > { %v2665_v53 = vmul.f32 %v7913_v16, %v2582_v14 }
 0x46c   : > { %4115 = vmatpush1.bf16.msra.mxu0 %v6271_v9  ;;  %v2587_v12 = vpop.permute.xlu1 %2586 }
 0x46d   : > { %4116 = vmatprep.subr.bf16.mxu0 %v6279_v10  ;;  %v2666_v28 = vmul.f32 %v7913_v16, %v2587_v12 }
 0x46e   : > { %v2597_v24 = vpop.permute.xlu0 %2596 }
 0x46f   : > { %v2668_v27 = vmul.f32 %v7913_v16, %v2597_v24  ;;  %v6234_v24 = vld [vmem:[%s8938_s14 + $0x11c] ss:$28 sps:$4 sm:$0xff]  }
 0x470   : > { %4117 = vmatpush1.bf16.msra.mxu0 %v6277_v11  ;;  %v2592_v17 = vpop.permute.xlu1 %2591 }
 0x471   : > { %4118 = vmatprep.subr.bf16.mxu0 %v6285_v13  ;;  %v2667_v19 = vmul.f32 %v7913_v16, %v2592_v17  ;;  %v6226_v17 = vld [vmem:[%s8938_s14 + $0xe0] ss:$28 sps:$4 sm:$0xff]  }
 0x472   : > { %v2607_v42 = vpop.permute.xlu0 %2606 }
 0x473   : > { %v2670_v63 = vmul.f32 %v7913_v16, %v2607_v42 }
 0x474   : > { %4119 = vmatpush1.bf16.msra.mxu0 %v6283_v15  ;;  %v2602_v32 = vpop.permute.xlu1 %2601 }
 0x475   : > { %v2669_v50 = vmul.f32 %v7913_v16, %v2602_v32 }
 0x476   : > { %v2617_v54 = vpop.permute.xlu0 %2616 }
 0x477   : > { %v2672_v58 = vmul.f32 %v7913_v16, %v2617_v54 }
 0x478   : > { %v2612_v51 = vpop.permute.xlu1 %2611 }
 0x479   : > { %v2671_v49 = vmul.f32 %v7913_v16, %v2612_v51 }
 0x47c   : > { %v2622_v12 = vpop.permute.xlu1 %2621 }
 0x504   : > { %v5814_v1 = vpop.f32.mrb[48].mxu1 }
 0x505   : > { %v2755_v31 = vadd.f32 %v5814_v1, %v2667_v19  ;;  %v2746_v8 = vpop.f32.mrb[49].mxu1  ;;  %v2627_v19 = vpop.permute.xlu0 %2626  ;;  %v6240_v1 = vld [vmem:[%s8938_s14 + $0x154] ss:$28 sps:$4 sm:$0xff]  }
 0x506   : > { %v2747_v33 = vadd.f32 %v2746_v8, %v2665_v53  ;;  %v5815_v34 = vpop.f32.mrb[50].mxu1  ;;  %v2673_v8 = vmul.f32 %v7913_v16, %v2622_v12 }
 0x507   : > { %v2818_v35 = vadd.f32 %v7922_v30, %v2755_v31  ;;  %v2758_v36 = vadd.f32 %v5815_v34, %v2668_v27  ;;  %v2749_v62 = vpop.f32.mrb[51].mxu1  ;;  %v6232_v27 = vld [vmem:[%s8938_s14 + $0x118] ss:$28 sps:$4 sm:$0xff]  }
 0x508   : > { %v2816_v37 = vadd.f32 %v7922_v30, %v2747_v33  ;;  %v2750_v3 = vadd.f32 %v2749_v62, %v2666_v28  ;;  %v2632_v28 = vpop.permute.xlu1 %2631 }
 0x509   : > { %v2819_v21 = vadd.f32 %v7922_v30, %v2758_v36  ;;  %v2834_v26 = vmax.f32 %v2818_v35, 0.0  ;;  %v2675_v31 = vmul.f32 %v7913_v16, %v2632_v28  ;;  %v2637_v33 = vpop.permute.xlu0 %2636 }
 0x50a   : > { %v2817_v23 = vadd.f32 %v7922_v30, %v2750_v3  ;;  %v2832_v20 = vmax.f32 %v2816_v37, 0.0  ;;  %v2676_v35 = vmul.f32 %v7913_v16, %v2637_v33  ;;  %v6238_v37 = vld [vmem:[%s8938_s14 + $0x150] ss:$28 sps:$4 sm:$0xff]   ;;  %v2674_v3 = vmul.f32 %v7913_v16, %v2627_v19 }
 0x50b   : > { %v2835_v29 = vmax.f32 %v2819_v21, 0.0 }
 0x50c   : > { %v2833_v22 = vmax.f32 %v2817_v23, 0.0 }
 0x50d   : > { %v2849_v18 = vpack.c.bf16 %v2835_v29, %v2834_v26  ;;  %v6246_v26 = vld [vmem:[%s8938_s14 + $0x18c] ss:$28 sps:$4 sm:$0xff]  }
 0x50e   : > { %v2848_v39 = vpack.c.bf16 %v2833_v22, %v2832_v20 }
 0x510   : > { %2997 = vmatmul.mubr.bf16.vlgmr.msra.gmra.mrb[64].mxu1 %v2848_v39  ;;  %v6244_v39 = vld [vmem:[%s8938_s14 + $0x188] ss:$28 sps:$4 sm:$0xff]  }
 0x511   : > { %3006 = vmatprep.mubr.bf16.mxu1 %v6851_v56  ;;  %3867 = vmatpush1.bf16.msra.mxu1 %v6202_v25 }
 0x512   : > { %3868 = vmatprep.subr.bf16.mxu1 %v6210_v40  ;;  %v2642_v40 = vpop.permute.xlu1 %2641 }
 0x515   : > { %v5818_v55 = vpop.f32.mrb[52].mxu1  ;;  %3869 = vmatpush1.bf16.msra.mxu1 %v6208_v44  ;;  %v6252_v44 = vld [vmem:[%s8938_s14 + $0x1c4] ss:$28 sps:$4 sm:$0xff]  }
 0x516   : > { %v2771_v59 = vadd.f32 %v5818_v55, %v2671_v49  ;;  %v2762_v60 = vpop.f32.mrb[53].mxu1  ;;  %3870 = vmatprep.subr.bf16.mxu1 %v6216_v47  ;;  %v2647_v49 = vpop.permute.xlu0 %2646 }
 0x517   : > { %v2763_v41 = vadd.f32 %v2762_v60, %v2669_v50  ;;  %v5819_v52 = vpop.f32.mrb[54].mxu1  ;;  %v2652_v60 = vpop.permute.xlu1 %2651 }
 0x518   : > { %v2822_v0 = vadd.f32 %v7922_v30, %v2771_v59  ;;  %v2774_v2 = vadd.f32 %v5819_v52, %v2672_v58  ;;  %v2765_v4 = vpop.f32.mrb[55].mxu1  ;;  %3007 = vmatmul.mubr.bf16.gmra.mrb[68].mxu1 %v2849_v18  ;;  %v6258_v59 = vld [vmem:[%s8938_s14 + $0x1fc] ss:$28 sps:$4 sm:$0xff]   ;;  %v2679_v52 = vmul.f32 %v7913_v16, %v2652_v60  ;;  %v6298_v60 = vld [vmem:[%s8938_s14 + $0x8] ss:$28 sps:$4 sm:$0xff]  }
 0x519   : > { %v2820_v5 = vadd.f32 %v7922_v30, %v2763_v41  ;;  %v2766_v6 = vadd.f32 %v2765_v4, %v2670_v63  ;;  %3016 = vmatprep.mubr.bf16.mxu1 %v6851_v56  ;;  %3871 = vmatpush1.bf16.msra.mxu1 %v6214_v57  ;;  %v6250_v57 = vld [vmem:[%s8938_s14 + $0x1c0] ss:$28 sps:$4 sm:$0xff]   ;;  %v6264_v41 = vld [vmem:[%s8938_s14 + $0x234] ss:$28 sps:$4 sm:$0xff]  }
 0x51a   : > { %v2823_v38 = vadd.f32 %v7922_v30, %v2774_v2  ;;  %3872 = vmatprep.subr.bf16.mxu1 %v6222_v61  ;;  %v2838_v10 = vmax.f32 %v2822_v0, 0.0  ;;  %v6256_v61 = vld [vmem:[%s8938_s14 + $0x1f8] ss:$28 sps:$4 sm:$0xff]   ;;  %v2657_v63 = vpop.permute.xlu0 %2656  ;;  %v2677_v0 = vmul.f32 %v7913_v16, %v2642_v40 }
 0x51b   : > { %v2821_v9 = vadd.f32 %v7922_v30, %v2766_v6  ;;  %v2836_v13 = vmax.f32 %v2820_v5, 0.0  ;;  %v2680_v4 = vmul.f32 %v7913_v16, %v2657_v63 }
 0x51c   : > { %v2839_v11 = vmax.f32 %v2823_v38, 0.0  ;;  %v2678_v38 = vmul.f32 %v7913_v16, %v2647_v49  ;;  %v6268_v16 = vld [vmem:[%s8938_s14 + $0x268] ss:$28 sps:$4 sm:$0xff]  }
 0x51d   : > { %v2837_v14 = vmax.f32 %v2821_v9, 0.0  ;;  %3873 = vmatpush1.bf16.msra.mxu1 %v6220_v7  ;;  %v6262_v7 = vld [vmem:[%s8938_s14 + $0x230] ss:$28 sps:$4 sm:$0xff]  }
 0x51e   : > { %v2851_v15 = vpack.c.bf16 %v2839_v11, %v2838_v10  ;;  %3874 = vmatprep.subr.bf16.mxu1 %v6228_v43  ;;  %v6270_v10 = vld [vmem:[%s8938_s14 + $0x26c] ss:$28 sps:$4 sm:$0xff]  }
 0x51f   : > { %v2850_v53 = vpack.c.bf16 %v2837_v14, %v2836_v13 }
 0x521   : > { %3017 = vmatmul.mubr.bf16.gmra.mrb[72].mxu1 %v2850_v53  ;;  %v6276_v53 = vld [vmem:[%s8938_s14 + $0x2a4] ss:$28 sps:$4 sm:$0xff]  }
 0x522   : > { %3026 = vmatprep.mubr.bf16.mxu1 %v6851_v56  ;;  %3875 = vmatpush1.bf16.msra.mxu1 %v6226_v17 }
 0x523   : > { %3876 = vmatprep.subr.bf16.mxu1 %v6234_v24 }
 0x525   : > { %v5822_v34 = vpop.f32.mrb[56].mxu1 }
 0x526   : > { %v2787_v36 = vadd.f32 %v5822_v34, %v2675_v31  ;;  %v2778_v62 = vpop.f32.mrb[57].mxu1  ;;  %3877 = vmatpush1.bf16.msra.mxu1 %v6232_v27  ;;  %v6280_v34 = vld [vmem:[%s8938_s14 + $0x2d8] ss:$28 sps:$4 sm:$0xff]  }
 0x527   : > { %v2779_v21 = vadd.f32 %v2778_v62, %v2673_v8  ;;  %v5823_v23 = vpop.f32.mrb[58].mxu1  ;;  %3878 = vmatprep.subr.bf16.mxu1 %v6240_v1  ;;  %v6274_v8 = vld [vmem:[%s8938_s14 + $0x2a0] ss:$28 sps:$4 sm:$0xff]  }
 0x528   : > { %v2826_v29 = vadd.f32 %v7922_v30, %v2787_v36  ;;  %v2790_v20 = vadd.f32 %v5823_v23, %v2676_v35  ;;  %v2781_v22 = vpop.f32.mrb[59].mxu1  ;;  %v6288_v35 = vld [vmem:[%s8938_s14 + $0x314] ss:$28 sps:$4 sm:$0xff]   ;;  %v6291_v36 = vld [vmem:[%s8938_s14 + $0x324] ss:$28 sps:$4 sm:$0xff]  }
 0x529   : > { %v2824_v32 = vadd.f32 %v7922_v30, %v2779_v21  ;;  %v2782_v18 = vadd.f32 %v2781_v22, %v2674_v3  ;;  %3027 = vmatmul.mubr.bf16.gmra.mrb[76].mxu1 %v2851_v15  ;;  %v6289_v62 = vld [vmem:[%s8938_s14 + $0x320] ss:$28 sps:$4 sm:$0xff]   ;;  %4120 = vmatprep.subr.bf16.mxu0 %v6291_v36  ;;  %v6292_v21 = vld [vmem:[%s8938_s14 + $0x348] ss:$28 sps:$4 sm:$0xff]   ;;  %v6295_v23 = vld [vmem:[%s8938_s14 + $0x358] ss:$28 sps:$4 sm:$0xff]  }
 0x52a   : > { %v2827_v25 = vadd.f32 %v7922_v30, %v2790_v20  ;;  %3036 = vmatprep.mubr.bf16.mxu1 %v6851_v56  ;;  %3879 = vmatpush1.bf16.msra.mxu1 %v6238_v37  ;;  %v2842_v47 = vmax.f32 %v2826_v29, 0.0  ;;  %v6294_v37 = vld [vmem:[%s8938_s14 + $0x34c] ss:$28 sps:$4 sm:$0xff]   ;;  %v6297_v3 = vld [vmem:[%s8938_s14 + $0x35c] ss:$28 sps:$4 sm:$0xff]  }
 0x52b   : > { %v2825_v42 = vadd.f32 %v7922_v30, %v2782_v18  ;;  %3880 = vmatprep.subr.bf16.mxu1 %v6246_v26  ;;  %v2840_v50 = vmax.f32 %v2824_v32, 0.0  ;;  %4121 = vmatpush1.bf16.msra.mxu0 %v6289_v62  ;;  %v6300_v26 = vld [vmem:[%s8938_s14 + $0xc] ss:$28 sps:$4 sm:$0xff]   ;;  %v8070_v29 = vld [vmem:[%s8938_s14 + $0x1d8] ss:$28 sps:$4 sm:$0xff]  }
 0x52c   : > { %v2843_v51 = vmax.f32 %v2827_v25, 0.0  ;;  %4122 = vmatprep.subr.bf16.mxu0 %v6297_v3  ;;  %v2872_v20 = vld [vmem:[%s8937_s13] sm:$0x3]  ;;  %v8178_v62 = vld [vmem:[%s8938_s14 + $0x2b8] ss:$28 sps:$4 sm:$0xff]  }
 0x52d   : > { %v2841_v54 = vmax.f32 %v2825_v42, 0.0  ;;  %v8077_v22 = vrot.slane %v2872_v20, %v7473_v46  ;;  %v8080_v32 = vrot.slane %v2872_v20, %v7479_v48 }
 0x52e   : > { %v2853_v55 = vpack.c.bf16 %v2843_v51, %v2842_v47  ;;  %3881 = vmatpush1.bf16.msra.mxu1 %v6244_v39 }
 0x52f   : > { %v2852_v58 = vpack.c.bf16 %v2841_v54, %v2840_v50  ;;  %3882 = vmatprep.subr.bf16.mxu1 %v6252_v44  ;;  %4123 = vmatpush1.bf16.msra.mxu0 %v6295_v23 }
 0x530   : > { %5714 = vmatprep.subr.bf16.mxu0 %v8070_v29 }
 0x531   : > { %3037 = vmatmul.mubr.bf16.gmra.mrb[80].mxu1 %v2852_v58 }
 0x532   : > { %3046 = vmatprep.mubr.bf16.mxu1 %v6851_v56  ;;  %3883 = vmatpush1.bf16.msra.mxu1 %v6250_v57 }
 0x533   : > { %3884 = vmatprep.subr.bf16.mxu1 %v6258_v59 }
 0x535   : > { %v5826_v2 = vpop.f32.mrb[60].mxu1 }
 0x536   : > { %v2803_v5 = vadd.f32 %v5826_v2, %v2679_v52  ;;  %v2794_v6 = vpop.f32.mrb[61].mxu1  ;;  %3885 = vmatpush1.bf16.msra.mxu1 %v6256_v61  ;;  %v8096_v61 = vld [vmem:[%s8938_s14 + $0x18] ss:$28 sps:$4 sm:$0xff]   ;;  %v6303_v52 = vld [vmem:[%s8938_s14 + $0x44] ss:$28 sps:$4 sm:$0xff]  }
 0x537   : > { %v2795_v43 = vadd.f32 %v2794_v6, %v2677_v0  ;;  %v5827_v9 = vpop.f32.mrb[62].mxu1  ;;  %3886 = vmatprep.subr.bf16.mxu1 %v6264_v41  ;;  %v8105_v0 = vld [vmem:[%s8938_s14 + $0x210] ss:$28 sps:$4 sm:$0xff]  }
 0x538   : > { %v2830_v11 = vadd.f32 %v7922_v30, %v2803_v5  ;;  %v2806_v12 = vadd.f32 %v5827_v9, %v2680_v4  ;;  %v2797_v13 = vpop.f32.mrb[63].mxu1 }
 0x539   : > { %v2828_v14 = vadd.f32 %v7922_v30, %v2795_v43  ;;  %v2798_v15 = vadd.f32 %v2797_v13, %v2678_v38  ;;  %3047 = vmatmul.mubr.bf16.gmra.mrb[84].mxu1 %v2853_v55  ;;  %v6301_v38 = vld [vmem:[%s8938_s14 + $0x40] ss:$28 sps:$4 sm:$0xff]   ;;  %v8121_v43 = vld [vmem:[%s8938_s14 + $0x50] ss:$28 sps:$4 sm:$0xff]  }
 0x53a   : > { %v2831_v17 = vadd.f32 %v7922_v30, %v2806_v12  ;;  %3056 = vmatprep.mubr.bf16.mxu1 %v6851_v56  ;;  %3887 = vmatpush1.bf16.msra.mxu1 %v6262_v7  ;;  %v2846_v24 = vmax.f32 %v2830_v11, 0.0  ;;  %v6306_v11 = vld [vmem:[%s8938_s14 + $0x7c] ss:$28 sps:$4 sm:$0xff]   ;;  %v8130_v12 = vld [vmem:[%s8938_s14 + $0x248] ss:$28 sps:$4 sm:$0xff]  }
 0x53b   : > { %v2829_v19 = vadd.f32 %v7922_v30, %v2798_v15  ;;  %3888 = vmatprep.subr.bf16.mxu1 %v6270_v10  ;;  %v2844_v28 = vmax.f32 %v2828_v14, 0.0  ;;  %v6282_v30 = vld [vmem:[%s8938_s14 + $0x2dc] ss:$28 sps:$4 sm:$0xff]  }
 0x53c   : > { %v2847_v27 = vmax.f32 %v2831_v17, 0.0 }
 0x53d   : > { %v2845_v1 = vmax.f32 %v2829_v19, 0.0  ;;  %v8143_v19 = vld [vmem:[%s8938_s14 + $0x88] ss:$28 sps:$4 sm:$0xff]  }
 0x53e   : > { %v2855_v31 = vpack.c.bf16 %v2847_v27, %v2846_v24  ;;  %3889 = vmatpush1.bf16.msra.mxu1 %v6268_v16  ;;  %v6304_v16 = vld [vmem:[%s8938_s14 + $0x78] ss:$28 sps:$4 sm:$0xff]   ;;  %v8152_v27 = vld [vmem:[%s8938_s14 + $0x280] ss:$28 sps:$4 sm:$0xff]  }
 0x53f   : > { %v2854_v33 = vpack.c.bf16 %v2845_v1, %v2844_v28  ;;  %3890 = vmatprep.subr.bf16.mxu1 %v6276_v53  ;;  %v6309_v24 = vld [vmem:[%s8938_s14 + $0xb4] ss:$28 sps:$4 sm:$0xff]  }
 0x541   : > { %3057 = vmatmul.mubr.bf16.gmra.mrb[88].mxu1 %v2854_v33 }
 0x542   : > { %3066 = vmatprep.mubr.bf16.mxu1 %v6851_v56  ;;  %3891 = vmatpush1.bf16.msra.mxu1 %v6274_v8  ;;  %v6286_v56 = vld [vmem:[%s8938_s14 + $0x310] ss:$28 sps:$4 sm:$0xff]  }
 0x543   : > { %3892 = vmatprep.subr.bf16.mxu1 %v6282_v30 }
 0x546   : > { %3893 = vmatpush1.bf16.msra.mxu1 %v6280_v34  ;;  %v6307_v34 = vld [vmem:[%s8938_s14 + $0xb0] ss:$28 sps:$4 sm:$0xff]  }
 0x547   : > { %3894 = vmatprep.subr.bf16.mxu1 %v6288_v35  ;;  %v8168_v35 = vld [vmem:[%s8938_s14 + $0xc0] ss:$28 sps:$4 sm:$0xff]  }
 0x549   : > { %3067 = vmatmul.mubr.bf16.gmra.mrb[92].mxu1 %v2855_v31 }
 0x54a   : > { %3895 = vmatpush1.bf16.msra.mxu1 %v6286_v56  ;;  %v6312_v56 = vld [vmem:[%s8938_s14 + $0xec] ss:$28 sps:$4 sm:$0xff]  }
 0x54b   : > { %3896 = vmatprep.subr.bf16.mxu1 %v6294_v37 }
 0x54e   : > { %3897 = vmatpush1.bf16.msra.mxu1 %v6292_v21 }
 0x54f   : > { %3979 = vmatprep.subr.bf16.mxu1 %v6300_v26 }
 0x5e3   : > { %v2998_v18 = vpop.f32.mrb[64].mxu1 }
 0x5e4   : > { %v2999_v25 = vadd.f32 %v2998_v18, %v8077_v22  ;;  %v3000_v39 = vpop.f32.mrb[65].mxu1 }
 0x5e5   : > { %v3001_v40 = vadd.f32 %v3000_v39, %v8080_v32  ;;  %v3002_v42 = vpop.f32.mrb[66].mxu1  ;;  %v8192_v39 = vld [vmem:[%s8938_s14 + $0xf8] ss:$28 sps:$4 sm:$0xff]  }
 0x5e6   : > { %v3003_v44 = vadd.f32 %v3002_v42, %v8077_v22  ;;  %v3004_v47 = vpop.f32.mrb[67].mxu1  ;;  %v3077_v49 = vmax.f32 %v2999_v25, 0.0  ;;  %v6310_v25 = vld [vmem:[%s8938_s14 + $0xe8] ss:$28 sps:$4 sm:$0xff]  }
 0x5e7   : > { %v3005_v51 = vadd.f32 %v3004_v47, %v8080_v32  ;;  %v3078_v54 = vmax.f32 %v3001_v40, 0.0  ;;  %v8201_v47 = vld [vmem:[%s8938_s14 + $0x2f0] ss:$28 sps:$4 sm:$0xff]  }
 0x5e8   : > { %v3079_v50 = vmax.f32 %v3003_v44, 0.0  ;;  %v6315_v44 = vld [vmem:[%s8938_s14 + $0x124] ss:$28 sps:$4 sm:$0xff]  }
 0x5e9   : > { %v3080_v55 = vmax.f32 %v3005_v51, 0.0 }
 0x5ea   : > { %v8086_v57 = vpack.c.bf16 %v3079_v50, %v3077_v49 }
 0x5eb   : > { %v8088_v58 = vpack.c.bf16 %v3080_v55, %v3078_v54  ;;  %v3008_v59 = vpop.f32.mrb[68].mxu1 }
 0x5ec   : > { %v3009_v63 = vadd.f32 %v3008_v59, %v8077_v22  ;;  %v3010_v41 = vpop.f32.mrb[69].mxu1  ;;  %v6313_v59 = vld [vmem:[%s8938_s14 + $0x120] ss:$28 sps:$4 sm:$0xff]  }
 0x5ed   : > { %v3011_v2 = vadd.f32 %v3010_v41, %v8080_v32  ;;  %v3012_v4 = vpop.f32.mrb[70].mxu1  ;;  %3898 = vmatprep.mubr.bf16.mxu1 %v8088_v58  ;;  %4124 = vmatprep.mubr.bf16.mxu0 %v8088_v58 }
 0x5ee   : > { %v3013_v5 = vadd.f32 %v3012_v4, %v8077_v22  ;;  %v3014_v6 = vpop.f32.mrb[71].mxu1  ;;  %3899 = vmatmul.mubr.bf16.vlgmr.msra.gmra.mrb[96].mxu1 %v8086_v57  ;;  %4125 = vmatmul.mubr.bf16.vlgmr.msra.gmra.mrb[32].mxu0 %v8086_v57  ;;  %v3081_v9 = vmax.f32 %v3009_v63, 0.0 }
 0x5ef   : > { %v3015_v7 = vadd.f32 %v3014_v6, %v8080_v32  ;;  %3980 = vmatpush1.bf16.msra.mxu1 %v6298_v60  ;;  %5715 = vmatpush3.bf16.msra.mxu0 %v8096_v61  ;;  %v3082_v13 = vmax.f32 %v3011_v2, 0.0  ;;  %v8217_v60 = vld [vmem:[%s8938_s14 + $0x130] ss:$28 sps:$4 sm:$0xff]   ;;  %v8226_v2 = vld [vmem:[%s8938_s14 + $0x328] ss:$28 sps:$4 sm:$0xff]  }
 0x5f0   : > { %v3083_v10 = vmax.f32 %v3013_v5, 0.0  ;;  %3981 = vmatprep.subr.bf16.mxu1 %v6303_v52  ;;  %5716 = vmatprep.subr.bf16.mxu0 %v8105_v0  ;;  %v6318_v52 = vld [vmem:[%s8938_s14 + $0x15c] ss:$28 sps:$4 sm:$0xff]  }
 0x5f1   : > { %v3084_v14 = vmax.f32 %v3015_v7, 0.0 }
 0x5f2   : > { %v8132_v15 = vpack.c.bf16 %v3083_v10, %v3081_v9  ;;  %v6316_v9 = vld [vmem:[%s8938_s14 + $0x158] ss:$28 sps:$4 sm:$0xff]   ;;  %v8239_v10 = vld [vmem:[%s8938_s14 + $0x168] ss:$28 sps:$4 sm:$0xff]  }
 0x5f3   : > { %v8134_v17 = vpack.c.bf16 %v3084_v14, %v3082_v13  ;;  %3982 = vmatpush1.bf16.msra.mxu1 %v6301_v38  ;;  %5717 = vmatpush3.bf16.msra.mxu0 %v8121_v43  ;;  %v6321_v14 = vld [vmem:[%s8938_s14 + $0x194] ss:$28 sps:$4 sm:$0xff]  }
 0x5f4   : > { %v3018_v53 = vpop.f32.mrb[72].mxu1  ;;  %3983 = vmatprep.subr.bf16.mxu1 %v6306_v11  ;;  %5718 = vmatprep.subr.bf16.mxu0 %v8130_v12 }
 0x5f5   : > { %v3019_v28 = vadd.f32 %v3018_v53, %v8077_v22  ;;  %v3020_v1 = vpop.f32.mrb[73].mxu1  ;;  %3908 = vmatprep.mubr.bf16.mxu1 %v8134_v17  ;;  %4134 = vmatprep.mubr.bf16.mxu0 %v8134_v17 }
 0x5f6   : > { %v3021_v31 = vadd.f32 %v3020_v1, %v8080_v32  ;;  %v3022_v8 = vpop.f32.mrb[74].mxu1  ;;  %3909 = vmatmul.mubr.bf16.gmra.mrb[100].mxu1 %v8132_v15  ;;  %4135 = vmatmul.mubr.bf16.gmra.mrb[36].mxu0 %v8132_v15 }
 0x5f7   : > { %v3023_v33 = vadd.f32 %v3022_v8, %v8077_v22  ;;  %v3024_v30 = vpop.f32.mrb[75].mxu1  ;;  %3984 = vmatpush1.bf16.msra.mxu1 %v6304_v16  ;;  %5719 = vmatpush3.bf16.msra.mxu0 %v8143_v19  ;;  %v3085_v37 = vmax.f32 %v3019_v28, 0.0  ;;  %v8249_v16 = vld [vmem:[%s8938_s14 + $0x360] ss:$28 sps:$4 sm:$0xff]   ;;  %v6319_v8 = vld [vmem:[%s8938_s14 + $0x190] ss:$28 sps:$4 sm:$0xff]  }
 0x5f8   : > { %v3025_v36 = vadd.f32 %v3024_v30, %v8080_v32  ;;  %3985 = vmatprep.subr.bf16.mxu1 %v6309_v24  ;;  %5720 = vmatprep.subr.bf16.mxu0 %v8152_v27  ;;  %v3086_v21 = vmax.f32 %v3021_v31, 0.0 }
 0x5f9   : > { %v3087_v3 = vmax.f32 %v3023_v33, 0.0  ;;  %v8265_v33 = vld [vmem:[%s8938_s14 + $0x1a0] ss:$28 sps:$4 sm:$0xff]  }
 0x5fa   : > { %v3088_v23 = vmax.f32 %v3025_v36, 0.0  ;;  %v6324_v36 = vld [vmem:[%s8938_s14 + $0x1cc] ss:$28 sps:$4 sm:$0xff]  }
 0x5fb   : > { %v8180_v26 = vpack.c.bf16 %v3087_v3, %v3085_v37  ;;  %3986 = vmatpush1.bf16.msra.mxu1 %v6307_v34  ;;  %5721 = vmatpush3.bf16.msra.mxu0 %v8168_v35 }
 0x5fc   : > { %v8183_v20 = vpack.c.bf16 %v3088_v23, %v3086_v21  ;;  %v3028_v18 = vpop.f32.mrb[76].mxu1  ;;  %3987 = vmatprep.subr.bf16.mxu1 %v6312_v56  ;;  %5722 = vmatprep.subr.bf16.mxu0 %v8178_v62 }
 0x5fd   : > { %v3029_v40 = vadd.f32 %v3028_v18, %v8077_v22  ;;  %v3030_v42 = vpop.f32.mrb[77].mxu1  ;;  %v6322_v18 = vld [vmem:[%s8938_s14 + $0x1c8] ss:$28 sps:$4 sm:$0xff]  }
 0x5fe   : > { %v3031_v51 = vadd.f32 %v3030_v42, %v8080_v32  ;;  %v3032_v49 = vpop.f32.mrb[78].mxu1  ;;  %3918 = vmatprep.mubr.bf16.mxu1 %v8183_v20  ;;  %4144 = vmatprep.mubr.bf16.mxu0 %v8183_v20  ;;  %v6329_v42 = vld [vmem:[%s8938_s14 + $0x204] ss:$28 sps:$4 sm:$0xff]  }
 0x5ff   : > { %v3033_v50 = vadd.f32 %v3032_v49, %v8077_v22  ;;  %v3034_v54 = vpop.f32.mrb[79].mxu1  ;;  %3919 = vmatmul.mubr.bf16.gmra.mrb[104].mxu1 %v8180_v26  ;;  %4145 = vmatmul.mubr.bf16.gmra.mrb[40].mxu0 %v8180_v26  ;;  %v3089_v63 = vmax.f32 %v3029_v40, 0.0 }
 0x600   : > { %v3035_v55 = vadd.f32 %v3034_v54, %v8080_v32  ;;  %3988 = vmatpush1.bf16.msra.mxu1 %v6310_v25  ;;  %5723 = vmatpush3.bf16.msra.mxu0 %v8192_v39  ;;  %v3090_v4 = vmax.f32 %v3031_v51, 0.0 }
 0x601   : > { %v3091_v41 = vmax.f32 %v3033_v50, 0.0  ;;  %3989 = vmatprep.subr.bf16.mxu1 %v6315_v44  ;;  %5724 = vmatprep.subr.bf16.mxu0 %v8201_v47 }
 0x602   : > { %v3092_v5 = vmax.f32 %v3035_v55, 0.0  ;;  %v6327_v55 = vld [vmem:[%s8938_s14 + $0x200] ss:$28 sps:$4 sm:$0xff]  }
 0x603   : > { %v8228_v6 = vpack.c.bf16 %v3091_v41, %v3089_v63  ;;  %v6334_v41 = vld [vmem:[%s8938_s14 + $0x23c] ss:$28 sps:$4 sm:$0xff]  }
 0x604   : > { %v8230_v7 = vpack.c.bf16 %v3092_v5, %v3090_v4  ;;  %v3038_v38 = vpop.f32.mrb[80].mxu1  ;;  %3990 = vmatpush1.bf16.msra.mxu1 %v6313_v59  ;;  %5725 = vmatpush3.bf16.msra.mxu0 %v8217_v60 }
 0x605   : > { %v3039_v11 = vadd.f32 %v3038_v38, %v8077_v22  ;;  %v3040_v13 = vpop.f32.mrb[81].mxu1  ;;  %3991 = vmatprep.subr.bf16.mxu1 %v6318_v52  ;;  %5726 = vmatprep.subr.bf16.mxu0 %v8226_v2 }
 0x606   : > { %v3041_v53 = vadd.f32 %v3040_v13, %v8080_v32  ;;  %v3042_v24 = vpop.f32.mrb[82].mxu1  ;;  %3928 = vmatprep.mubr.bf16.mxu1 %v8230_v7  ;;  %4154 = vmatprep.mubr.bf16.mxu0 %v8230_v7 }
 0x607   : > { %v3043_v28 = vadd.f32 %v3042_v24, %v8077_v22  ;;  %v3044_v1 = vpop.f32.mrb[83].mxu1  ;;  %3929 = vmatmul.mubr.bf16.gmra.mrb[108].mxu1 %v8228_v6  ;;  %4155 = vmatmul.mubr.bf16.gmra.mrb[44].mxu0 %v8228_v6  ;;  %v3093_v30 = vmax.f32 %v3039_v11, 0.0  ;;  %v6332_v11 = vld [vmem:[%s8938_s14 + $0x238] ss:$28 sps:$4 sm:$0xff]  }
 0x608   : > { %v3045_v31 = vadd.f32 %v3044_v1, %v8080_v32  ;;  %3992 = vmatpush1.bf16.msra.mxu1 %v6316_v9  ;;  %5727 = vmatpush3.bf16.msra.mxu0 %v8239_v10  ;;  %v3094_v56 = vmax.f32 %v3041_v53, 0.0  ;;  %v6339_v53 = vld [vmem:[%s8938_s14 + $0x274] ss:$28 sps:$4 sm:$0xff]  }
 0x609   : > { %v3095_v34 = vmax.f32 %v3043_v28, 0.0  ;;  %3993 = vmatprep.subr.bf16.mxu1 %v6321_v14  ;;  %5728 = vmatprep.subr.bf16.mxu0 %v8249_v16 }
 0x60a   : > { %v3096_v37 = vmax.f32 %v3045_v31, 0.0 }
 0x60b   : > { %v8271_v3 = vpack.c.bf16 %v3095_v34, %v3093_v30  ;;  %v6337_v30 = vld [vmem:[%s8938_s14 + $0x270] ss:$28 sps:$4 sm:$0xff]  }
 0x60c   : > { %v8273_v21 = vpack.c.bf16 %v3096_v37, %v3094_v56  ;;  %v3048_v23 = vpop.f32.mrb[84].mxu1  ;;  %3994 = vmatpush1.bf16.msra.mxu1 %v6319_v8  ;;  %5729 = vmatpush3.bf16.msra.mxu0 %v8265_v33  ;;  %v6344_v56 = vld [vmem:[%s8938_s14 + $0x2ac] ss:$28 sps:$4 sm:$0xff]  }
 0x60d   : > { %v3049_v25 = vadd.f32 %v3048_v23, %v8077_v22  ;;  %v3050_v40 = vpop.f32.mrb[85].mxu1  ;;  %3995 = vmatprep.subr.bf16.mxu1 %v6324_v36 }
 0x60e   : > { %v3051_v44 = vadd.f32 %v3050_v40, %v8080_v32  ;;  %v3052_v51 = vpop.f32.mrb[86].mxu1  ;;  %3938 = vmatprep.mubr.bf16.mxu1 %v8273_v21  ;;  %4164 = vmatprep.mubr.bf16.mxu0 %v8273_v21 }
 0x60f   : > { %v3053_v49 = vadd.f32 %v3052_v51, %v8077_v22  ;;  %v3054_v50 = vpop.f32.mrb[87].mxu1  ;;  %3939 = vmatmul.mubr.bf16.gmra.mrb[112].mxu1 %v8271_v3  ;;  %4165 = vmatmul.mubr.bf16.gmra.mrb[48].mxu0 %v8271_v3  ;;  %v3097_v59 = vmax.f32 %v3049_v25, 0.0 }
 0x610   : > { %v3055_v54 = vadd.f32 %v3054_v50, %v8080_v32  ;;  %3996 = vmatpush1.bf16.msra.mxu1 %v6322_v18  ;;  %v3098_v52 = vmax.f32 %v3051_v44, 0.0 }
 0x611   : > { %v3099_v63 = vmax.f32 %v3053_v49, 0.0  ;;  %3997 = vmatprep.subr.bf16.mxu1 %v6329_v42  ;;  %v6342_v42 = vld [vmem:[%s8938_s14 + $0x2a8] ss:$28 sps:$4 sm:$0xff]  }
 0x612   : > { %v3100_v4 = vmax.f32 %v3055_v54, 0.0  ;;  %v6349_v49 = vld [vmem:[%s8938_s14 + $0x2e4] ss:$28 sps:$4 sm:$0xff]  }
 0x613   : > { %v8296_v5 = vpack.c.bf16 %v3099_v63, %v3097_v59 }
 0x614   : > { %v8298_v38 = vpack.c.bf16 %v3100_v4, %v3098_v52  ;;  %v3058_v9 = vpop.f32.mrb[88].mxu1  ;;  %3998 = vmatpush1.bf16.msra.mxu1 %v6327_v55 }
 0x615   : > { %v3059_v13 = vadd.f32 %v3058_v9, %v8077_v22  ;;  %v3060_v14 = vpop.f32.mrb[89].mxu1  ;;  %3999 = vmatprep.subr.bf16.mxu1 %v6334_v41  ;;  %v6347_v41 = vld [vmem:[%s8938_s14 + $0x2e0] ss:$28 sps:$4 sm:$0xff]  }
 0x616   : > { %v3061_v24 = vadd.f32 %v3060_v14, %v8080_v32  ;;  %v3062_v28 = vpop.f32.mrb[90].mxu1  ;;  %3948 = vmatprep.mubr.bf16.mxu1 %v8298_v38  ;;  %4174 = vmatprep.mubr.bf16.mxu0 %v8298_v38  ;;  %v6354_v9 = vld [vmem:[%s8938_s14 + $0x31c] ss:$28 sps:$4 sm:$0xff]  }
 0x617   : > { %v3063_v1 = vadd.f32 %v3062_v28, %v8077_v22  ;;  %v3064_v31 = vpop.f32.mrb[91].mxu1  ;;  %3949 = vmatmul.mubr.bf16.gmra.mrb[116].mxu1 %v8296_v5  ;;  %4175 = vmatmul.mubr.bf16.gmra.mrb[52].mxu0 %v8296_v5  ;;  %v3101_v34 = vmax.f32 %v3059_v13, 0.0 }
 0x618   : > { %v3065_v8 = vadd.f32 %v3064_v31, %v8080_v32  ;;  %4000 = vmatpush1.bf16.msra.mxu1 %v6332_v11  ;;  %v3102_v37 = vmax.f32 %v3061_v24, 0.0  ;;  %v6357_v24 = vld [vmem:[%s8938_s14 + $0x350] ss:$28 sps:$4 sm:$0xff]  }
 0x619   : > { %v3103_v36 = vmax.f32 %v3063_v1, 0.0  ;;  %4001 = vmatprep.subr.bf16.mxu1 %v6339_v53  ;;  %v6359_v53 = vld [vmem:[%s8938_s14 + $0x354] ss:$28 sps:$4 sm:$0xff]  }
 0x61a   : > { %v3104_v23 = vmax.f32 %v3065_v8, 0.0 }
 0x61b   : > { %v8320_v18 = vpack.c.bf16 %v3103_v36, %v3101_v34 }
 0x61c   : > { %v8322_v25 = vpack.c.bf16 %v3104_v23, %v3102_v37  ;;  %v3068_v40 = vpop.f32.mrb[92].mxu1  ;;  %4002 = vmatpush1.bf16.msra.mxu1 %v6337_v30 }
 0x61d   : > { %v3069_v44 = vadd.f32 %v3068_v40, %v8077_v22  ;;  %v3070_v51 = vpop.f32.mrb[93].mxu1  ;;  %4003 = vmatprep.subr.bf16.mxu1 %v6344_v56 }
 0x61e   : > { %v3071_v50 = vadd.f32 %v3070_v51, %v8080_v32  ;;  %v3072_v54 = vpop.f32.mrb[94].mxu1  ;;  %3958 = vmatprep.mubr.bf16.mxu1 %v8322_v25  ;;  %4184 = vmatprep.mubr.bf16.mxu0 %v8322_v25 }
 0x61f   : > { %v3073_v55 = vadd.f32 %v3072_v54, %v8077_v22  ;;  %v3074_v59 = vpop.f32.mrb[95].mxu1  ;;  %3959 = vmatmul.mubr.bf16.gmra.mrb[120].mxu1 %v8320_v18  ;;  %4185 = vmatmul.mubr.bf16.gmra.mrb[56].mxu0 %v8320_v18  ;;  %v3105_v52 = vmax.f32 %v3069_v44, 0.0 }
 0x620   : > { %v3075_v63 = vadd.f32 %v3074_v59, %v8080_v32  ;;  %4004 = vmatpush1.bf16.msra.mxu1 %v6342_v42  ;;  %v3106_v22 = vmax.f32 %v3071_v50, 0.0  ;;  %v6352_v32 = vld [vmem:[%s8938_s14 + $0x318] ss:$28 sps:$4 sm:$0xff]  }
 0x621   : > { %v3107_v4 = vmax.f32 %v3073_v55, 0.0  ;;  %4005 = vmatprep.subr.bf16.mxu1 %v6349_v49 }
 0x622   : > { %v3108_v11 = vmax.f32 %v3075_v63, 0.0 }
 0x623   : > { %v3123_v13 = vpack.c.bf16 %v3107_v4, %v3105_v52 }
 0x624   : > { %v3124_v14 = vpack.c.bf16 %v3108_v11, %v3106_v22  ;;  %4006 = vmatpush1.bf16.msra.mxu1 %v6347_v41 }
 0x625   : > { %4007 = vmatprep.subr.bf16.mxu1 %v6354_v9 }
 0x626   : > { %3968 = vmatprep.mubr.bf16.mxu1 %v3124_v14  ;;  %4194 = vmatprep.mubr.bf16.mxu0 %v3124_v14 }
 0x627   : > { %3969 = vmatmul.mubr.bf16.gmra.mrb[124].mxu1 %v3123_v13  ;;  %4195 = vmatmul.mubr.bf16.gmra.mrb[60].mxu0 %v3123_v13 }
 0x628   : > { %4008 = vmatpush1.bf16.msra.mxu1 %v6352_v32  ;;  %4011 = vmatprep.mubr.bf16.mxu1 %v8088_v58 }
 0x629   : > { %4237 = vmatprep.mubr.bf16.mxu0 %v8088_v58  ;;  %4009 = vmatprep.subr.bf16.mxu1 %v6359_v53  ;;  %v3277_v58 = vsub.s32 5, %v7470_v45 }
 0x62c   : > { %4010 = vmatpush1.bf16.msra.mxu1 %v6357_v24 }
 0x62d   : > { %5828 = vmatprep.subr.bf16.mxu1 %v8070_v29  ;;  %v3273_v29 = vsub.s32 4, %v7470_v45 }
 0x62f   : > { %4012 = vmatmul.mubr.bf16.vlgmr.msra.gmra.mrb[128].mxu1 %v8086_v57  ;;  %4238 = vmatmul.mubr.bf16.vlgmr.msra.gmra.mrb[64].mxu0 %v8086_v57  ;;  %v3253_v57 = vld [vmem:[%s8939_s15] sm:$0xff] }
 0x630   : > { %4021 = vmatprep.mubr.bf16.mxu1 %v8134_v17  ;;  %5836 = vmatpush3.bf16.msra.mxu1 %v8096_v61  ;;  %v8403_v61 = vrot.slane %v3253_v57, %v7473_v46 }
 0x631   : > { %4245 = vmatprep.mubr.bf16.mxu0 %v8134_v17  ;;  %5829 = vmatprep.subr.bf16.mxu1 %v8105_v0  ;;  %v8405_v0 = vrot.slane %v3253_v57, %v3273_v29 }
 0x634   : > { %5837 = vmatpush3.bf16.msra.mxu1 %v8121_v43  ;;  %v8408_v43 = vrot.slane %v3253_v57, %v7479_v48 }
 0x635   : > { %5830 = vmatprep.subr.bf16.mxu1 %v8130_v12  ;;  %v8410_v12 = vrot.slane %v3253_v57, %v3277_v58 }
 0x637   : > { %4022 = vmatmul.mubr.bf16.gmra.mrb[132].mxu1 %v8132_v15  ;;  %4246 = vmatmul.mubr.bf16.gmra.mrb[68].mxu0 %v8132_v15 }
 0x638   : > { %4031 = vmatprep.mubr.bf16.mxu1 %v8183_v20  ;;  %5838 = vmatpush3.bf16.msra.mxu1 %v8143_v19 }
 0x639   : > { %5831 = vmatprep.subr.bf16.mxu1 %v8152_v27 }
 0x63c   : > { %5839 = vmatpush3.bf16.msra.mxu1 %v8168_v35 }
 0x63d   : > { %5832 = vmatprep.subr.bf16.mxu1 %v8178_v62 }
 0x63f   : > { %4032 = vmatmul.mubr.bf16.gmra.mrb[136].mxu1 %v8180_v26 }
 0x640   : > { %4041 = vmatprep.mubr.bf16.mxu1 %v8230_v7  ;;  %5840 = vmatpush3.bf16.msra.mxu1 %v8192_v39 }
 0x641   : > { %5833 = vmatprep.subr.bf16.mxu1 %v8201_v47 }
 0x644   : > { %5841 = vmatpush3.bf16.msra.mxu1 %v8217_v60 }
 0x645   : > { %5834 = vmatprep.subr.bf16.mxu1 %v8226_v2 }
 0x647   : > { %4042 = vmatmul.mubr.bf16.gmra.mrb[140].mxu1 %v8228_v6 }
 0x648   : > { %4051 = vmatprep.mubr.bf16.mxu1 %v8273_v21  ;;  %5842 = vmatpush3.bf16.msra.mxu1 %v8239_v10 }
 0x649   : > { %5835 = vmatprep.subr.bf16.mxu1 %v8249_v16 }
 0x64c   : > { %5843 = vmatpush3.bf16.msra.mxu1 %v8265_v33 }
 0x64f   : > { %4052 = vmatmul.mubr.bf16.gmra.mrb[144].mxu1 %v8271_v3 }
 0x650   : > { %4061 = vmatprep.mubr.bf16.mxu1 %v8298_v38 }
 0x657   : > { %4062 = vmatmul.mubr.bf16.gmra.mrb[148].mxu1 %v8296_v5 }
 0x658   : > { %4071 = vmatprep.mubr.bf16.mxu1 %v8322_v25 }
 0x65f   : > { %4072 = vmatmul.mubr.bf16.gmra.mrb[152].mxu1 %v8320_v18 }
 0x660   : > { %4081 = vmatprep.mubr.bf16.mxu1 %v3124_v14 }
 0x667   : > { %4082 = vmatmul.mubr.bf16.gmra.mrb[156].mxu1 %v3123_v13 }
 0x668   : > { %4253 = vmatprep.mubr.bf16.mxu1 %v8183_v20 }
 0x66f   : > { %4254 = vmatmul.mubr.bf16.vlgmr.msra.gmra.mrb[160].mxu1 %v8180_v26 }
 0x670   : > { %4261 = vmatprep.mubr.bf16.mxu1 %v8230_v7 }
 0x677   : > { %4262 = vmatmul.mubr.bf16.gmra.mrb[164].mxu1 %v8228_v6 }
 0x678   : > { %4269 = vmatprep.mubr.bf16.mxu1 %v8273_v21 }
 0x67f   : > { %4270 = vmatmul.mubr.bf16.gmra.mrb[168].mxu1 %v8271_v3 }
 0x680   : > { %4277 = vmatprep.mubr.bf16.mxu1 %v8298_v38 }
 0x687   : > { %4278 = vmatmul.mubr.bf16.gmra.mrb[172].mxu1 %v8296_v5 }
 0x688   : > { %4285 = vmatprep.mubr.bf16.mxu1 %v8322_v25 }
 0x68f   : > { %4286 = vmatmul.mubr.bf16.gmra.mrb[176].mxu1 %v8320_v18 }
 0x690   : > { %4293 = vmatprep.mubr.bf16.mxu1 %v3124_v14 }
 0x697   : > { %4294 = vmatmul.mubr.bf16.gmra.mrb[180].mxu1 %v3123_v13 }
 0x6c1   : > { %v3900_v15 = vpop.f32.mrb[96].mxu1  ;;  %v4126_v17 = vpop.f32.mrb[32].mxu0 }
 0x6c2   : > { %v3901_v19 = vadd.f32 %v3900_v15, %v8403_v61  ;;  %v4127_v27 = vadd.f32 %v4126_v17, %v8405_v0  ;;  %v3902_v35 = vpop.f32.mrb[97].mxu1  ;;  %v4128_v62 = vpop.f32.mrb[33].mxu0 }
 0x6c3   : > { %v3903_v26 = vadd.f32 %v3902_v35, %v8408_v43  ;;  %v4129_v46 = vadd.f32 %v4128_v62, %v8410_v12  ;;  %v3904_v20 = vpop.f32.mrb[98].mxu1  ;;  %v4130_v39 = vpop.f32.mrb[34].mxu0 }
 0x6c4   : > { %v5511_v47 = vmul.f32 -1.442695, %v3901_v19  ;;  %v5515_v60 = vmul.f32 -1.442695, %v4127_v27  ;;  %v3905_v48 = vadd.f32 %v3904_v20, %v8403_v61  ;;  %v4131_v2 = vadd.f32 %v4130_v39, %v8405_v0  ;;  %v3906_v6 = vpop.f32.mrb[99].mxu1  ;;  %v4132_v7 = vpop.f32.mrb[35].mxu0 }
 0x6c5   : > { %v5512_v10 = vmul.f32 -1.442695, %v3903_v26  ;;  %v5516_v16 = vmul.f32 -1.442695, %v4129_v46  ;;  %v3907_v33 = vadd.f32 %v3906_v6, %v8408_v43  ;;  %v4133_v3 = vadd.f32 %v4132_v7, %v8410_v12 }
 0x6c6   : > { %6394 = vpow2.f32 %v5511_v47  ;;  %v5518_v21 = vmul.f32 -1.442695, %v3905_v48  ;;  %v5522_v5 = vmul.f32 -1.442695, %v4131_v2 }
 0x6c7   : > { %6396 = vpow2.f32 %v5515_v60  ;;  %v5519_v38 = vmul.f32 -1.442695, %v3907_v33  ;;  %v5523_v28 = vmul.f32 -1.442695, %v4133_v3 }
 0x6c8   : > { %6398 = vpow2.f32 %v5512_v10 }
 0x6c9   : > { %6400 = vpow2.f32 %v5516_v16  ;;  %v3910_v1 = vpop.f32.mrb[100].mxu1  ;;  %v4136_v31 = vpop.f32.mrb[36].mxu0 }
 0x6ca   : > { %6402 = vpow2.f32 %v5518_v21  ;;  %v3911_v8 = vadd.f32 %v3910_v1, %v8403_v61  ;;  %v4137_v30 = vadd.f32 %v4136_v31, %v8405_v0  ;;  %v3912_v34 = vpop.f32.mrb[101].mxu1  ;;  %v4138_v36 = vpop.f32.mrb[37].mxu0 }
 0x6cb   : > { %6404 = vpow2.f32 %v5522_v5  ;;  %v3913_v56 = vadd.f32 %v3912_v34, %v8408_v43  ;;  %v4139_v37 = vadd.f32 %v4138_v36, %v8410_v12  ;;  %v3914_v23 = vpop.f32.mrb[102].mxu1  ;;  %v4140_v18 = vpop.f32.mrb[38].mxu0 }
 0x6cc   : > { %6406 = vpow2.f32 %v5519_v38  ;;  %v5525_v25 = vmul.f32 -1.442695, %v3911_v8  ;;  %v5529_v40 = vmul.f32 -1.442695, %v4137_v30  ;;  %v3915_v42 = vadd.f32 %v3914_v23, %v8403_v61  ;;  %v3916_v44 = vpop.f32.mrb[103].mxu1  ;;  %v4142_v51 = vpop.f32.mrb[39].mxu0 }
 0x6cd   : > { %6408 = vpow2.f32 %v5523_v28  ;;  %v5526_v49 = vmul.f32 -1.442695, %v3913_v56  ;;  %v5530_v50 = vmul.f32 -1.442695, %v4139_v37  ;;  %v4141_v20 = vadd.f32 %v4140_v18, %v8405_v0 }
 0x6ce   : > { %6410 = vpow2.f32 %v5525_v25  ;;  %v5532_v54 = vmul.f32 -1.442695, %v3915_v42  ;;  %v3917_v60 = vadd.f32 %v3916_v44, %v8408_v43  ;;  %v4143_v6 = vadd.f32 %v4142_v51, %v8410_v12 }
 0x6cf   : > { %6412 = vpow2.f32 %v5529_v40  ;;  %v5536_v28 = vmul.f32 -1.442695, %v4141_v20 }
 0x6d0   : > { %v6395_v55 = vpop.eup %6394  ;;  %6414 = vpow2.f32 %v5526_v49  ;;  %v5533_v36 = vmul.f32 -1.442695, %v3917_v60  ;;  %v5537_v25 = vmul.f32 -1.442695, %v4143_v6 }
 0x6d1   : > { %v6397_v59 = vpop.eup %6396  ;;  %v4638_v63 = vadd.f32 1.0, %v6395_v55  ;;  %6416 = vpow2.f32 %v5530_v50 }
 0x6d2   : > { %v6399_v41 = vpop.eup %6398  ;;  %v4642_v52 = vadd.f32 1.0, %v6397_v59  ;;  %6418 = vpow2.f32 %v5532_v54  ;;  %v3920_v4 = vpop.f32.mrb[104].mxu1 }
 0x6d3   : > { %v4146_v9 = vpop.f32.mrb[40].mxu0  ;;  %v6401_v22 = vpop.eup %6400  ;;  %6420 = vrcp.f32 %v4638_v63  ;;  %v4639_v11 = vadd.f32 1.0, %v6399_v41  ;;  %v3921_v33 = vadd.f32 %v3920_v4, %v8403_v61 }
 0x6d4   : > { %v3922_v13 = vpop.f32.mrb[105].mxu1  ;;  %v4148_v14 = vpop.f32.mrb[41].mxu0  ;;  %6422 = vrcp.f32 %v4642_v52  ;;  %v4643_v53 = vadd.f32 1.0, %v6401_v22  ;;  %v4147_v1 = vadd.f32 %v4146_v9, %v8405_v0 }
 0x6d5   : > { %v6403_v32 = vpop.eup %6402  ;;  %v3924_v24 = vpop.f32.mrb[106].mxu1  ;;  %6424 = vrcp.f32 %v4639_v11  ;;  %v3923_v56 = vadd.f32 %v3922_v13, %v8408_v43  ;;  %v4149_v40 = vadd.f32 %v4148_v14, %v8410_v12  ;;  %v5539_v51 = vmul.f32 -1.442695, %v3921_v33 }
 0x6d6   : > { %v4150_v29 = vpop.f32.mrb[42].mxu0  ;;  %v6405_v57 = vpop.eup %6404  ;;  %v4645_v58 = vadd.f32 1.0, %v6403_v32  ;;  %6426 = vrcp.f32 %v4643_v53  ;;  %v3925_v49 = vadd.f32 %v3924_v24, %v8403_v61  ;;  %v5543_v54 = vmul.f32 -1.442695, %v4147_v1 }
 0x6d7   : > { %v3926_v15 = vpop.f32.mrb[107].mxu1  ;;  %v6407_v17 = vpop.eup %6406  ;;  %v4649_v19 = vadd.f32 1.0, %v6405_v57  ;;  %v4151_v55 = vadd.f32 %v4150_v29, %v8405_v0  ;;  %v5540_v63 = vmul.f32 -1.442695, %v3923_v56  ;;  %v5544_v4 = vmul.f32 -1.442695, %v4149_v40 }
 0x6d8   : > { %v8425_v27 = vpop.f32.mrb[43].mxu0  ;;  %v6409_v35 = vpop.eup %6408  ;;  %6428 = vrcp.f32 %v4645_v58  ;;  %v4646_v62 = vadd.f32 1.0, %v6407_v17  ;;  %v3927_v41 = vadd.f32 %v3926_v15, %v8408_v43  ;;  %v5546_v14 = vmul.f32 -1.442695, %v3925_v49 }
 0x6d9   : > { %v6411_v26 = vpop.eup %6410  ;;  %6430 = vrcp.f32 %v4649_v19  ;;  %v4650_v46 = vadd.f32 1.0, %v6409_v35  ;;  %v4153_v9 = vadd.f32 %v8425_v27, %v8410_v12  ;;  %v5550_v57 = vmul.f32 -1.442695, %v4151_v55 }
 0x6da   : > { %v6413_v39 = vpop.eup %6412  ;;  %6432 = vrcp.f32 %v4646_v62  ;;  %v4652_v47 = vadd.f32 1.0, %v6411_v26  ;;  %v3930_v7 = vpop.f32.mrb[108].mxu1  ;;  %v5547_v27 = vmul.f32 -1.442695, %v3927_v41 }
 0x6db   : > { %v6415_v48 = vpop.eup %6414  ;;  %6434 = vrcp.f32 %v4650_v46  ;;  %v4656_v2 = vadd.f32 1.0, %v6413_v39  ;;  %v4156_v3 = vpop.f32.mrb[44].mxu0  ;;  %v3931_v32 = vadd.f32 %v3930_v7, %v8403_v61  ;;  %v5551_v46 = vmul.f32 -1.442695, %v4153_v9 }
 0x6dc   : > { %v6417_v10 = vpop.eup %6416  ;;  %6436 = vrcp.f32 %v4652_v47  ;;  %v4653_v16 = vadd.f32 1.0, %v6415_v48  ;;  %v8438_v21 = vpop.f32.mrb[109].mxu1  ;;  %v4157_v58 = vadd.f32 %v4156_v3, %v8405_v0 }
 0x6dd   : > { %v6419_v5 = vpop.eup %6418  ;;  %6438 = vrcp.f32 %v4656_v2  ;;  %v4657_v38 = vadd.f32 1.0, %v6417_v10  ;;  %v8441_v31 = vpop.f32.mrb[45].mxu0  ;;  %v5553_v39 = vmul.f32 -1.442695, %v3931_v32 }
 0x6de   : > { %v8443_v8 = vpop.f32.mrb[110].mxu1  ;;  %v6421_v30 = vpop.eup %6420  ;;  %6440 = vrcp.f32 %v4653_v16  ;;  %v4659_v34 = vadd.f32 1.0, %v6419_v5  ;;  %v5557_v48 = vmul.f32 -1.442695, %v4157_v58 }
 0x6df   : > { %v8446_v37 = vpop.f32.mrb[46].mxu0  ;;  %v8448_v23 = vpop.f32.mrb[111].mxu1  ;;  %4974 = vst [vmem:[%s8435_s19] sm:$0xff] %v6421_v30  ;;  %6442 = vrcp.f32 %v4657_v38 }
 0x6e0   : > { %v6423_v18 = vpop.eup %6422  ;;  %v8452_v42 = vpop.f32.mrb[47].mxu0  ;;  %6444 = vrcp.f32 %v4659_v34 }
 0x6e1   : > { %v6425_v44 = vpop.eup %6424  ;;  %4978 = vst [vmem:[%s8435_s19 + $0x20] sm:$0xff] %v6423_v18  ;;  %6446 = vpow2.f32 %v5536_v28 }
 0x6e2   : > { %v6427_v50 = vpop.eup %6426  ;;  %4975 = vst [vmem:[%s8435_s19 + $0x8] sm:$0xff] %v6425_v44  ;;  %6448 = vpow2.f32 %v5533_v36  ;;  %v8463_v22 = vpop.f32.mrb[112].mxu1  ;;  %v3933_v44 = vadd.f32 %v8438_v21, %v8408_v43 }
 0x6e3   : > { %v6429_v59 = vpop.eup %6428  ;;  %4979 = vst [vmem:[%s8435_s19 + $0x28] sm:$0xff] %v6427_v50  ;;  %6450 = vpow2.f32 %v5537_v25  ;;  %v8465_v11 = vpop.f32.mrb[48].mxu0 }
 0x6e4   : > { %v6431_v52 = vpop.eup %6430  ;;  %4981 = vst [vmem:[%s8435_s19 + $0x38] sm:$0xff] %v6429_v59  ;;  %6452 = vpow2.f32 %v5539_v51  ;;  %v8469_v53 = vpop.f32.mrb[113].mxu1  ;;  %v5554_v32 = vmul.f32 -1.442695, %v3933_v44 }
 0x6e5   : > { %v6433_v13 = vpop.eup %6432  ;;  %4985 = vst [vmem:[%s8435_s19 + $0x58] sm:$0xff] %v6431_v52  ;;  %v8471_v24 = vpop.f32.mrb[49].mxu0  ;;  %6454 = vpow2.f32 %v5543_v54  ;;  %v4159_v54 = vadd.f32 %v8441_v31, %v8410_v12 }
 0x6e6   : > { %v6435_v29 = vpop.eup %6434  ;;  %4982 = vst [vmem:[%s8435_s19 + $0x40] sm:$0xff] %v6433_v13  ;;  %v8475_v15 = vpop.f32.mrb[114].mxu1  ;;  %6456 = vpow2.f32 %v5540_v63 }
 0x6e7   : > { %v8477_v17 = vpop.f32.mrb[50].mxu0  ;;  %v6437_v19 = vpop.eup %6436  ;;  %4986 = vst [vmem:[%s8435_s19 + $0x60] sm:$0xff] %v6435_v29  ;;  %6458 = vpow2.f32 %v5544_v4  ;;  %v3935_v29 = vadd.f32 %v8443_v8, %v8403_v61 }
 0x6e8   : > { %v8480_v35 = vpop.f32.mrb[115].mxu1  ;;  %v4172_v62 = vpop.f32.mrb[51].mxu0  ;;  %4988 = vst [vmem:[%s8435_s19 + $0x70] sm:$0xff] %v6437_v19  ;;  %6460 = vpow2.f32 %v5546_v14  ;;  %v5558_v19 = vmul.f32 -1.442695, %v4159_v54 }
 0x6e9   : > { %v6439_v26 = vpop.eup %6438  ;;  %v8485_v47 = vadd.f32 %v4172_v62, %v8410_v12  ;;  %6462 = vpow2.f32 %v5550_v57 }
 0x6ea   : > { %v6441_v20 = vpop.eup %6440  ;;  %4992 = vst [vmem:[%s8435_s19 + $0x90] sm:$0xff] %v6439_v26  ;;  %6464 = vpow2.f32 %v5547_v27  ;;  %v3950_v7 = vpop.f32.mrb[116].mxu1  ;;  %v4161_v27 = vadd.f32 %v8446_v37, %v8405_v0 }
 0x6eb   : > { %v6443_v60 = vpop.eup %6442  ;;  %4989 = vst [vmem:[%s8435_s19 + $0x78] sm:$0xff] %v6441_v20  ;;  %6466 = vpow2.f32 %v5551_v46  ;;  %v4176_v10 = vpop.f32.mrb[52].mxu0  ;;  %v8491_v3 = vadd.f32 %v3950_v7, %v8403_v61  ;;  %v3937_v20 = vadd.f32 %v8448_v23, %v8408_v43  ;;  %v5560_v23 = vmul.f32 -1.442695, %v3935_v29 }
 0x6ec   : > { %v6445_v2 = vpop.eup %6444  ;;  %4993 = vst [vmem:[%s8435_s19 + $0x98] sm:$0xff] %v6443_v60  ;;  %6468 = vpow2.f32 %v5553_v39  ;;  %v8494_v5 = vadd.f32 %v4176_v10, %v8405_v0  ;;  %v3952_v38 = vpop.f32.mrb[117].mxu1 }
 0x6ed   : > { %v6447_v6 = vpop.eup %6446  ;;  %4995 = vst [vmem:[%s8435_s19 + $0xa8] sm:$0xff] %v6445_v2  ;;  %v4178_v28 = vpop.f32.mrb[53].mxu0  ;;  %6470 = vpow2.f32 %v5557_v48  ;;  %v8497_v34 = vadd.f32 %v3952_v38, %v8408_v43 }
 0x6ee   : > { %v6449_v16 = vpop.eup %6448  ;;  %v4663_v33 = vadd.f32 1.0, %v6447_v6  ;;  %v8500_v36 = vadd.f32 %v4178_v28, %v8410_v12  ;;  %v3954_v56 = vpop.f32.mrb[118].mxu1 }
 0x6ef   : > { %v6451_v1 = vpop.eup %6450  ;;  %v4660_v30 = vadd.f32 1.0, %v6449_v16  ;;  %v4180_v18 = vpop.f32.mrb[54].mxu0  ;;  %v8507_v41 = vadd.f32 %v3954_v56, %v8403_v61 }
 0x6f0   : > { %v6453_v25 = vpop.eup %6452  ;;  %6472 = vrcp.f32 %v4663_v33  ;;  %v4664_v40 = vadd.f32 1.0, %v6451_v1  ;;  %v3956_v51 = vpop.f32.mrb[119].mxu1  ;;  %v8510_v52 = vadd.f32 %v4180_v18, %v8405_v0  ;;  %v4163_v18 = vadd.f32 %v8452_v42, %v8410_v12 }
 0x6f1   : > { %v6455_v49 = vpop.eup %6454  ;;  %6474 = vrcp.f32 %v4660_v30  ;;  %v4666_v50 = vadd.f32 1.0, %v6453_v25  ;;  %v4182_v55 = vpop.f32.mrb[55].mxu0  ;;  %v8513_v9 = vadd.f32 %v3956_v51, %v8408_v43  ;;  %v3941_v25 = vadd.f32 %v8463_v22, %v8403_v61 }
 0x6f2   : > { %v6457_v59 = vpop.eup %6456  ;;  %6476 = vrcp.f32 %v4664_v40  ;;  %v4670_v63 = vadd.f32 1.0, %v6455_v49  ;;  %v8516_v13 = vadd.f32 %v4182_v55, %v8410_v12  ;;  %v3960_v62 = vpop.f32.mrb[120].mxu1  ;;  %v4167_v49 = vadd.f32 %v8465_v11, %v8405_v0 }
 0x6f3   : > { %v6459_v4 = vpop.eup %6458  ;;  %6478 = vrcp.f32 %v4666_v50  ;;  %v4667_v21 = vadd.f32 1.0, %v6457_v59  ;;  %v8525_v39 = vadd.f32 %v3960_v62, %v8403_v61  ;;  %v4186_v60 = vpop.f32.mrb[56].mxu0  ;;  %v5564_v11 = vmul.f32 -1.442695, %v4161_v27 }
 0x6f4   : > { %v6461_v31 = vpop.eup %6460  ;;  %6480 = vrcp.f32 %v4670_v63  ;;  %v4671_v14 = vadd.f32 1.0, %v6459_v4  ;;  %v3962_v48 = vpop.f32.mrb[121].mxu1  ;;  %v8528_v6 = vadd.f32 %v4186_v60, %v8405_v0  ;;  %v5561_v4 = vmul.f32 -1.442695, %v3937_v20 }
 0x6f5   : > { %v6463_v57 = vpop.eup %6462  ;;  %6482 = vrcp.f32 %v4667_v21  ;;  %v4673_v58 = vadd.f32 1.0, %v6461_v31  ;;  %v8531_v37 = vadd.f32 %v3962_v48, %v8408_v43  ;;  %v4188_v7 = vpop.f32.mrb[57].mxu0  ;;  %v5565_v21 = vmul.f32 -1.442695, %v4163_v18 }
 0x6f6   : > { %v6465_v26 = vpop.eup %6464  ;;  %6484 = vrcp.f32 %v4671_v14  ;;  %v4677_v46 = vadd.f32 1.0, %v6463_v57  ;;  %v3964_v10 = vpop.f32.mrb[122].mxu1  ;;  %v8534_v38 = vadd.f32 %v4188_v7, %v8410_v12  ;;  %v3943_v31 = vadd.f32 %v8469_v53, %v8408_v43 }
 0x6f7   : > { %v6467_v8 = vpop.eup %6466  ;;  %6486 = vrcp.f32 %v4673_v58  ;;  %v4674_v2 = vadd.f32 1.0, %v6465_v26  ;;  %v4190_v28 = vpop.f32.mrb[58].mxu0  ;;  %v8543_v50 = vadd.f32 %v3964_v10, %v8403_v61  ;;  %v5567_v29 = vmul.f32 -1.442695, %v3941_v25 }
 0x6f8   : > { %v6469_v16 = vpop.eup %6468  ;;  %6488 = vrcp.f32 %v4677_v46  ;;  %v4678_v33 = vadd.f32 1.0, %v6467_v8  ;;  %v3966_v1 = vpop.f32.mrb[123].mxu1  ;;  %v8547_v42 = vadd.f32 %v4190_v28, %v8405_v0  ;;  %v5571_v57 = vmul.f32 -1.442695, %v4167_v49 }
 0x6f9   : > { %v6471_v30 = vpop.eup %6470  ;;  %6490 = vrcp.f32 %v4674_v2  ;;  %v4680_v56 = vadd.f32 1.0, %v6469_v16  ;;  %v4192_v40 = vpop.f32.mrb[59].mxu0  ;;  %v8550_v22 = vadd.f32 %v3966_v1, %v8408_v43  ;;  %v4169_v58 = vadd.f32 %v8471_v24, %v8410_v12 }
 0x6fa   : > { %v6473_v44 = vpop.eup %6472  ;;  %6492 = vrcp.f32 %v4678_v33  ;;  %v4684_v51 = vadd.f32 1.0, %v6471_v30  ;;  %v8553_v55 = vadd.f32 %v4192_v40, %v8410_v12  ;;  %v3970_v62 = vpop.f32.mrb[124].mxu1  ;;  %v4171_v24 = vadd.f32 %v8477_v17, %v8405_v0 }
 0x6fb   : > { %v6475_v54 = vpop.eup %6474  ;;  %4999 = vst [vmem:[%s8435_s19 + $0xc8] sm:$0xff] %v6473_v44  ;;  %6494 = vrcp.f32 %v4680_v56  ;;  %v4196_v27 = vpop.f32.mrb[60].mxu0  ;;  %v8566_v53 = vadd.f32 %v3970_v62, %v8403_v61  ;;  %v5568_v10 = vmul.f32 -1.442695, %v3943_v31  ;;  %v3947_v16 = vadd.f32 %v8480_v35, %v8408_v43 }
 0x6fc   : > { %v6477_v59 = vpop.eup %6476  ;;  %4996 = vst [vmem:[%s8435_s19 + $0xb0] sm:$0xff] %v6475_v54  ;;  %6496 = vrcp.f32 %v4684_v51  ;;  %v8569_v46 = vadd.f32 %v4196_v27, %v8405_v0  ;;  %v4198_v20 = vpop.f32.mrb[61].mxu0  ;;  %v5572_v1 = vmul.f32 -1.442695, %v4169_v58  ;;  %v5578_v40 = vmul.f32 -1.442695, %v4171_v24 }
 0x6fd   : > { %v6479_v63 = vpop.eup %6478  ;;  %5000 = vst [vmem:[%s8435_s19 + $0xd0] sm:$0xff] %v6477_v59  ;;  %6498 = vpow2.f32 %v5554_v32  ;;  %v3945_v32 = vadd.f32 %v8475_v15, %v8403_v61  ;;  %v8578_v15 = vadd.f32 %v4198_v20, %v8410_v12  ;;  %v4200_v2 = vpop.f32.mrb[62].mxu0 }
 0x6fe   : > { %v6481_v14 = vpop.eup %6480  ;;  %5002 = vst [vmem:[%s8435_s19 + $0xe0] sm:$0xff] %v6479_v63  ;;  %6500 = vpow2.f32 %v5558_v19  ;;  %v3972_v19 = vpop.f32.mrb[125].mxu1  ;;  %v8588_v30 = vadd.f32 %v4200_v2, %v8405_v0  ;;  %v5575_v0 = vmul.f32 -1.442695, %v3947_v16 }
 0x6ff   : > { %v6483_v26 = vpop.eup %6482  ;;  %5006 = vst [vmem:[%s8435_s19 + $0x100] sm:$0xff] %v6481_v14  ;;  %6502 = vpow2.f32 %v5560_v23  ;;  %v8575_v48 = vadd.f32 %v3972_v19, %v8408_v43  ;;  %v3974_v8 = vpop.f32.mrb[126].mxu1  ;;  %v5574_v18 = vmul.f32 -1.442695, %v3945_v32 }
 0x700   : > { %v6485_v60 = vpop.eup %6484  ;;  %5003 = vst [vmem:[%s8435_s19 + $0xe8] sm:$0xff] %v6483_v26  ;;  %6504 = vpow2.f32 %v5564_v11  ;;  %v8584_v33 = vadd.f32 %v3974_v8, %v8403_v61  ;;  %v3976_v17 = vpop.f32.mrb[127].mxu1 }
 0x701   : > { %v6487_v7 = vpop.eup %6486  ;;  %5007 = vst [vmem:[%s8435_s19 + $0x108] sm:$0xff] %v6485_v60  ;;  %6506 = vpow2.f32 %v5561_v4  ;;  %v4202_v23 = vpop.f32.mrb[63].mxu0  ;;  %v8592_v35 = vadd.f32 %v3976_v17, %v8408_v43 }
 0x702   : > { %v6489_v28 = vpop.eup %6488  ;;  %5009 = vst [vmem:[%s8435_s19 + $0x118] sm:$0xff] %v6487_v7  ;;  %6508 = vpow2.f32 %v5565_v21  ;;  %v8595_v61 = vadd.f32 %v4202_v23, %v8410_v12  ;;  %v8599_v51 = vpop.f32.mrb[128].mxu1 }
 0x703   : > { %v6491_v56 = vpop.eup %6490  ;;  %5013 = vst [vmem:[%s8435_s19 + $0x138] sm:$0xff] %v6489_v28  ;;  %6510 = vpow2.f32 %v5567_v29  ;;  %v5730_v49 = vpop.f32.mrb[64].mxu0 }
 0x704   : > { %v6493_v25 = vpop.eup %6492  ;;  %5010 = vst [vmem:[%s8435_s19 + $0x120] sm:$0xff] %v6491_v56  ;;  %6512 = vpow2.f32 %v5571_v57  ;;  %v8602_v43 = vpop.f32.mrb[129].mxu1 }
 0x705   : > { %v6495_v44 = vpop.eup %6494  ;;  %5014 = vst [vmem:[%s8435_s19 + $0x140] sm:$0xff] %v6493_v25  ;;  %6514 = vpow2.f32 %v5568_v10  ;;  %v5731_v59 = vpop.f32.mrb[65].mxu0 }
 0x706   : > { %v6497_v54 = vpop.eup %6496  ;;  %5016 = vst [vmem:[%s8435_s19 + $0x150] sm:$0xff] %v6495_v44  ;;  %6516 = vpow2.f32 %v5572_v1  ;;  %v8605_v11 = vadd.f32 %v5731_v59, %v5730_v49  ;;  %v8607_v63 = vpop.f32.mrb[130].mxu1 }
 0x707   : > { %v6499_v12 = vpop.eup %6498  ;;  %5020 = vst [vmem:[%s8435_s19 + $0x170] sm:$0xff] %v6497_v54  ;;  %6518 = vpow2.f32 %v5574_v18  ;;  %v5733_v4 = vpop.f32.mrb[66].mxu0 }
 0x708   : > { %v6501_v21 = vpop.eup %6500  ;;  %v4681_v31 = vadd.f32 1.0, %v6499_v12  ;;  %6520 = vpow2.f32 %v5578_v40  ;;  %v8609_v14 = vpop.f32.mrb[131].mxu1 }
 0x709   : > { %v5734_v29 = vpop.f32.mrb[67].mxu0  ;;  %v6503_v57 = vpop.eup %6502  ;;  %v4685_v58 = vadd.f32 1.0, %v6501_v21  ;;  %6522 = vpow2.f32 %v5575_v0 }
 0x70a   : > { %v6505_v62 = vpop.eup %6504  ;;  %6524 = vrcp.f32 %v4681_v31  ;;  %v4687_v27 = vadd.f32 1.0, %v6503_v57  ;;  %v8611_v19 = vadd.f32 %v5734_v29, %v5733_v4  ;;  %v8613_v2 = vpop.f32.mrb[132].mxu1  ;;  %v5579_v29 = vmul.f32 -1.442695, %v8485_v47 }
 0x70b   : > { %v6507_v26 = vpop.eup %6506  ;;  %6526 = vrcp.f32 %v4685_v58  ;;  %v4691_v32 = vadd.f32 1.0, %v6505_v62  ;;  %v5736_v7 = vpop.f32.mrb[68].mxu0  ;;  %v5582_v47 = vmul.f32 -1.442695, %v8497_v34 }
 0x70c   : > { %v6509_v20 = vpop.eup %6508  ;;  %6528 = vrcp.f32 %v4687_v27  ;;  %v4688_v60 = vadd.f32 1.0, %v6507_v26  ;;  %v8615_v17 = vpop.f32.mrb[133].mxu1  ;;  %v5581_v27 = vmul.f32 -1.442695, %v8491_v3  ;;  %v5586_v3 = vmul.f32 -1.442695, %v8500_v36 }
 0x70d   : > { %v6511_v24 = vpop.eup %6510  ;;  %6530 = vrcp.f32 %v4691_v32  ;;  %v4692_v8 = vadd.f32 1.0, %v6509_v20  ;;  %v5737_v23 = vpop.f32.mrb[69].mxu0  ;;  %v5585_v32 = vmul.f32 -1.442695, %v8494_v5  ;;  %v5589_v36 = vmul.f32 -1.442695, %v8513_v9 }
 0x70e   : > { %v6513_v10 = vpop.eup %6512  ;;  %6532 = vrcp.f32 %v4688_v60  ;;  %v4694_v16 = vadd.f32 1.0, %v6511_v24  ;;  %v8617_v56 = vpop.f32.mrb[134].mxu1  ;;  %v8619_v44 = vadd.f32 %v5737_v23, %v5736_v7  ;;  %v5592_v23 = vmul.f32 -1.442695, %v8510_v52 }
 0x70f   : > { %v6515_v28 = vpop.eup %6514  ;;  %6534 = vrcp.f32 %v4692_v8  ;;  %v4698_v1 = vadd.f32 1.0, %v6513_v10  ;;  %v5739_v18 = vpop.f32.mrb[70].mxu0  ;;  %v5588_v10 = vmul.f32 -1.442695, %v8507_v41  ;;  %v5599_v52 = vmul.f32 -1.442695, %v8528_v6 }
 0x710   : > { %v6517_v25 = vpop.eup %6516  ;;  %6536 = vrcp.f32 %v4694_v16  ;;  %v4695_v40 = vadd.f32 1.0, %v6515_v28  ;;  %v8621_v0 = vpop.f32.mrb[135].mxu1 }
 0x711   : > { %v5740_v49 = vpop.f32.mrb[71].mxu0  ;;  %v6519_v54 = vpop.eup %6518  ;;  %6538 = vrcp.f32 %v4698_v1  ;;  %v4699_v59 = vadd.f32 1.0, %v6517_v25  ;;  %v5595_v25 = vmul.f32 -1.442695, %v8525_v39  ;;  %v5600_v39 = vmul.f32 -1.442695, %v8534_v38 }
 0x712   : > { %v6521_v12 = vpop.eup %6520  ;;  %6540 = vrcp.f32 %v4695_v40  ;;  %v4701_v4 = vadd.f32 1.0, %v6519_v54  ;;  %v8624_v57 = vadd.f32 %v5740_v49, %v5739_v18  ;;  %v8629_v20 = vpop.f32.mrb[136].mxu1  ;;  %v5593_v18 = vmul.f32 -1.442695, %v8516_v13 }
 0x713   : > { %v6523_v21 = vpop.eup %6522  ;;  %6542 = vrcp.f32 %v4699_v59  ;;  %v4705_v31 = vadd.f32 1.0, %v6521_v12  ;;  %v8633_v24 = vpop.f32.mrb[137].mxu1  ;;  %v5596_v13 = vmul.f32 -1.442695, %v8531_v37 }
 0x714   : > { %v6525_v58 = vpop.eup %6524  ;;  %6544 = vrcp.f32 %v4701_v4  ;;  %v4702_v62 = vadd.f32 1.0, %v6523_v21  ;;  %v8637_v7 = vpop.f32.mrb[138].mxu1 }
 0x715   : > { %v6527_v26 = vpop.eup %6526  ;;  %5017 = vst [vmem:[%s8435_s19 + $0x158] sm:$0xff] %v6525_v58  ;;  %6546 = vrcp.f32 %v4705_v31  ;;  %v8641_v16 = vpop.f32.mrb[139].mxu1 }
 0x716   : > { %v6529_v60 = vpop.eup %6528  ;;  %5021 = vst [vmem:[%s8435_s19 + $0x178] sm:$0xff] %v6527_v26  ;;  %6548 = vrcp.f32 %v4702_v62 }
 0x717   : > { %v6531_v8 = vpop.eup %6530  ;;  %5023 = vst [vmem:[%s8435_s19 + $0x188] sm:$0xff] %v6529_v60  ;;  %6550 = vpow2.f32 %v5579_v29 }
 0x718   : > { %v6533_v5 = vpop.eup %6532  ;;  %5027 = vst [vmem:[%s8435_s19 + $0x1a8] sm:$0xff] %v6531_v8  ;;  %6552 = vpow2.f32 %v5581_v27 }
 0x719   : > { %v6535_v34 = vpop.eup %6534  ;;  %5024 = vst [vmem:[%s8435_s19 + $0x190] sm:$0xff] %v6533_v5  ;;  %6554 = vpow2.f32 %v5585_v32 }
 0x71a   : > { %v6537_v28 = vpop.eup %6536  ;;  %5028 = vst [vmem:[%s8435_s19 + $0x1b0] sm:$0xff] %v6535_v34  ;;  %6556 = vpow2.f32 %v5582_v47  ;;  %v8653_v49 = vpop.f32.mrb[140].mxu1 }
 0x71b   : > { %v6539_v1 = vpop.eup %6538  ;;  %5030 = vst [vmem:[%s8435_s19 + $0x1c0] sm:$0xff] %v6537_v28  ;;  %6558 = vpow2.f32 %v5586_v3  ;;  %v8657_v54 = vpop.f32.mrb[141].mxu1 }
 0x71c   : > { %v6541_v41 = vpop.eup %6540  ;;  %5034 = vst [vmem:[%s8435_s19 + $0x1e0] sm:$0xff] %v6539_v1  ;;  %6560 = vpow2.f32 %v5588_v10  ;;  %v8661_v12 = vpop.f32.mrb[142].mxu1 }
 0x71d   : > { %v6543_v40 = vpop.eup %6542  ;;  %5031 = vst [vmem:[%s8435_s19 + $0x1c8] sm:$0xff] %v6541_v41  ;;  %6562 = vpow2.f32 %v5592_v23  ;;  %v8664_v6 = vpop.f32.mrb[143].mxu1 }
 0x71e   : > { %v6545_v9 = vpop.eup %6544  ;;  %5035 = vst [vmem:[%s8435_s19 + $0x1e8] sm:$0xff] %v6543_v40  ;;  %6564 = vpow2.f32 %v5589_v36 }
 0x71f   : > { %v6547_v59 = vpop.eup %6546  ;;  %5037 = vst [vmem:[%s8435_s19 + $0x1f8] sm:$0xff] %v6545_v9  ;;  %6566 = vpow2.f32 %v5593_v18 }
 0x720   : > { %v6549_v4 = vpop.eup %6548  ;;  %5041 = vst [vmem:[%s8435_s19 + $0x218] sm:$0xff] %v6547_v59  ;;  %6568 = vpow2.f32 %v5595_v25 }
 0x721   : > { %v6551_v21 = vpop.eup %6550  ;;  %5038 = vst [vmem:[%s8435_s19 + $0x200] sm:$0xff] %v6549_v4  ;;  %6570 = vpow2.f32 %v5599_v52  ;;  %v3265_v4 = vsub.s32 2, %v7470_v45 }
 0x722   : > { %v6553_v31 = vpop.eup %6552  ;;  %v4706_v29 = vadd.f32 1.0, %v6551_v21  ;;  %6572 = vpow2.f32 %v5596_v13  ;;  %v8667_v32 = vpop.f32.mrb[144].mxu1 }
 0x723   : > { %v6555_v37 = vpop.eup %6554  ;;  %v4708_v58 = vadd.f32 1.0, %v6553_v31  ;;  %6574 = vpow2.f32 %v5600_v39  ;;  %v8669_v8 = vpop.f32.mrb[145].mxu1  ;;  %v5602_v39 = vmul.f32 -1.442695, %v8543_v50 }
 0x724   : > { %v6557_v62 = vpop.eup %6556  ;;  %6576 = vrcp.f32 %v4706_v29  ;;  %v4712_v27 = vadd.f32 1.0, %v6555_v37  ;;  %v8671_v10 = vpop.f32.mrb[146].mxu1  ;;  %v5606_v37 = vmul.f32 -1.442695, %v8547_v42 }
 0x725   : > { %v6559_v38 = vpop.eup %6558  ;;  %6578 = vrcp.f32 %v4708_v58  ;;  %v4709_v26 = vadd.f32 1.0, %v6557_v62  ;;  %v8673_v28 = vpop.f32.mrb[147].mxu1 }
 0x726   : > { %v6561_v60 = vpop.eup %6560  ;;  %6580 = vrcp.f32 %v4712_v27  ;;  %v4713_v47 = vadd.f32 1.0, %v6559_v38  ;;  %v5603_v27 = vmul.f32 -1.442695, %v8550_v22  ;;  %v8695_v22 = vld [vmem:[%s8939_s15] sm:$0xff] }
 0x727   : > { %v6563_v3 = vpop.eup %6562  ;;  %6582 = vrcp.f32 %v4709_v26  ;;  %v4715_v5 = vadd.f32 1.0, %v6561_v60  ;;  %v5607_v26 = vmul.f32 -1.442695, %v8553_v55  ;;  %v5613_v55 = vmul.f32 -1.442695, %v8569_v46 }
 0x728   : > { %v6565_v34 = vpop.eup %6564  ;;  %6584 = vrcp.f32 %v4713_v47  ;;  %v4719_v23 = vadd.f32 1.0, %v6563_v3  ;;  %v5609_v47 = vmul.f32 -1.442695, %v8566_v53  ;;  %v8698_v3 = vrot.slane %v8695_v22, %v3265_v4 }
 0x729   : > { %v6567_v36 = vpop.eup %6566  ;;  %6586 = vrcp.f32 %v4715_v5  ;;  %v4716_v1 = vadd.f32 1.0, %v6565_v34  ;;  %v5610_v53 = vmul.f32 -1.442695, %v8575_v48  ;;  %v5620_v48 = vmul.f32 -1.442695, %v8588_v30 }
 0x72a   : > { %v6569_v18 = vpop.eup %6568  ;;  %6588 = vrcp.f32 %v4719_v23  ;;  %v4720_v41 = vadd.f32 1.0, %v6567_v36  ;;  %v8677_v21 = vpop.f32.mrb[148].mxu1  ;;  %v5614_v36 = vmul.f32 -1.442695, %v8578_v15  ;;  %v4014_v46 = vadd.f32 %v8599_v51, %v8698_v3 }
 0x72b   : > { %v6571_v25 = vpop.eup %6570  ;;  %6590 = vrcp.f32 %v4716_v1  ;;  %v4722_v40 = vadd.f32 1.0, %v6569_v18  ;;  %v8680_v58 = vpop.f32.mrb[149].mxu1  ;;  %v5616_v18 = vmul.f32 -1.442695, %v8584_v33  ;;  %v5617_v33 = vmul.f32 -1.442695, %v8592_v35 }
 0x72c   : > { %v6573_v52 = vpop.eup %6572  ;;  %6592 = vrcp.f32 %v4720_v41  ;;  %v4726_v9 = vadd.f32 1.0, %v6571_v25  ;;  %v8684_v38 = vpop.f32.mrb[150].mxu1  ;;  %v5513_v4 = vmul.f32 -1.442695, %v4014_v46  ;;  %v3269_v35 = vsub.s32 3, %v7470_v45 }
 0x72d   : > { %v6575_v13 = vpop.eup %6574  ;;  %6594 = vrcp.f32 %v4722_v40  ;;  %v4723_v59 = vadd.f32 1.0, %v6573_v52  ;;  %v8688_v60 = vpop.f32.mrb[151].mxu1 }
 0x72e   : > { %v6577_v31 = vpop.eup %6576  ;;  %6596 = vrcp.f32 %v4726_v9  ;;  %v4727_v29 = vadd.f32 1.0, %v6575_v13  ;;  %v5621_v13 = vmul.f32 -1.442695, %v8595_v61  ;;  %v3281_v61 = vsub.s32 6, %v7470_v45 }
 0x72f   : > { %v6579_v62 = vpop.eup %6578  ;;  %5042 = vst [vmem:[%s8435_s19 + $0x220] sm:$0xff] %v6577_v31  ;;  %6598 = vrcp.f32 %v4723_v59 }
 0x730   : > { %v6581_v50 = vpop.eup %6580  ;;  %5044 = vst [vmem:[%s8435_s19 + $0x230] sm:$0xff] %v6579_v62  ;;  %6600 = vrcp.f32 %v4727_v29 }
 0x731   : > { %v6583_v42 = vpop.eup %6582  ;;  %5048 = vst [vmem:[%s8435_s19 + $0x250] sm:$0xff] %v6581_v50  ;;  %6602 = vpow2.f32 %v5602_v39 }
 0x732   : > { %v6585_v5 = vpop.eup %6584  ;;  %5045 = vst [vmem:[%s8435_s19 + $0x238] sm:$0xff] %v6583_v42  ;;  %6604 = vpow2.f32 %v5606_v37  ;;  %v4073_v41 = vpop.f32.mrb[152].mxu1 }
 0x733   : > { %v6587_v34 = vpop.eup %6586  ;;  %5049 = vst [vmem:[%s8435_s19 + $0x258] sm:$0xff] %v6585_v5  ;;  %6606 = vpow2.f32 %v5603_v27  ;;  %v8713_v40 = vadd.f32 %v4073_v41, %v8698_v3  ;;  %v8715_v15 = vpop.f32.mrb[153].mxu1  ;;  %v8732_v5 = vrot.slane %v8695_v22, %v3269_v35 }
 0x734   : > { %v6589_v23 = vpop.eup %6588  ;;  %5051 = vst [vmem:[%s8435_s19 + $0x268] sm:$0xff] %v6587_v34  ;;  %6608 = vpow2.f32 %v5607_v26  ;;  %v4077_v9 = vpop.f32.mrb[154].mxu1 }
 0x735   : > { %v6591_v1 = vpop.eup %6590  ;;  %5055 = vst [vmem:[%s8435_s19 + $0x288] sm:$0xff] %v6589_v23  ;;  %6610 = vpow2.f32 %v5609_v47  ;;  %v8722_v30 = vadd.f32 %v4077_v9, %v8698_v3  ;;  %v8724_v59 = vpop.f32.mrb[155].mxu1  ;;  %v4016_v9 = vadd.f32 %v8602_v43, %v8732_v5 }
 0x736   : > { %v6593_v25 = vpop.eup %6592  ;;  %5052 = vst [vmem:[%s8435_s19 + $0x270] sm:$0xff] %v6591_v1  ;;  %6612 = vpow2.f32 %v5613_v55 }
 0x737   : > { %v6595_v52 = vpop.eup %6594  ;;  %5056 = vst [vmem:[%s8435_s19 + $0x290] sm:$0xff] %v6593_v25  ;;  %6614 = vpow2.f32 %v5610_v53  ;;  %v5514_v43 = vmul.f32 -1.442695, %v4016_v9 }
 0x738   : > { %v6597_v51 = vpop.eup %6596  ;;  %5058 = vst [vmem:[%s8435_s19 + $0x2a0] sm:$0xff] %v6595_v52  ;;  %6616 = vpow2.f32 %v5614_v36 }
 0x739   : > { %v6599_v39 = vpop.eup %6598  ;;  %5062 = vst [vmem:[%s8435_s19 + $0x2c0] sm:$0xff] %v6597_v51  ;;  %6618 = vpow2.f32 %v5616_v18  ;;  %v8740_v18 = vrot.slane %v8695_v22, %v3281_v61 }
 0x73a   : > { %v6601_v31 = vpop.eup %6600  ;;  %5059 = vst [vmem:[%s8435_s19 + $0x2a8] sm:$0xff] %v6599_v39  ;;  %6620 = vpow2.f32 %v5620_v48  ;;  %v4083_v26 = vpop.f32.mrb[156].mxu1 }
 0x73b   : > { %v6603_v29 = vpop.eup %6602  ;;  %5063 = vst [vmem:[%s8435_s19 + $0x2c8] sm:$0xff] %v6601_v31  ;;  %6622 = vpow2.f32 %v5617_v33  ;;  %v8735_v55 = vadd.f32 %v4083_v26, %v8698_v3  ;;  %v8737_v34 = vpop.f32.mrb[157].mxu1  ;;  %v4248_v9 = vadd.f32 %v8619_v44, %v8740_v18 }
 0x73c   : > { %v6605_v37 = vpop.eup %6604  ;;  %v4729_v62 = vadd.f32 1.0, %v6603_v29  ;;  %6624 = vpow2.f32 %v5621_v13  ;;  %v4087_v36 = vpop.f32.mrb[158].mxu1  ;;  %v4018_v29 = vadd.f32 %v8607_v63, %v8698_v3 }
 0x73d   : > { %v6607_v27 = vpop.eup %6606  ;;  %v4733_v50 = vadd.f32 1.0, %v6605_v37  ;;  %6626 = vpow2.f32 %v5513_v4  ;;  %v8743_v46 = vadd.f32 %v4087_v36, %v8698_v3  ;;  %v8745_v41 = vpop.f32.mrb[159].mxu1  ;;  %v4240_v4 = vadd.f32 %v8605_v11, %v8740_v18 }
 0x73e   : > { %v6609_v42 = vpop.eup %6608  ;;  %6628 = vrcp.f32 %v4729_v62  ;;  %v4730_v47 = vadd.f32 1.0, %v6607_v27  ;;  %v4020_v27 = vadd.f32 %v8609_v14, %v8732_v5  ;;  %v4243_v11 = vadd.f32 %v8611_v19, %v8740_v18 }
 0x73f   : > { %v6611_v53 = vpop.eup %6610  ;;  %6630 = vrcp.f32 %v4733_v50  ;;  %v4734_v23 = vadd.f32 1.0, %v6609_v42  ;;  %v5517_v36 = vmul.f32 -1.442695, %v4240_v4  ;;  %v4026_v19 = vadd.f32 %v8615_v17, %v8732_v5 }
 0x740   : > { %v6613_v45 = vpop.eup %6612  ;;  %6632 = vrcp.f32 %v4730_v47  ;;  %v4736_v1 = vadd.f32 1.0, %v6611_v53 }
 0x741   : > { %v6615_v25 = vpop.eup %6614  ;;  %6634 = vrcp.f32 %v4734_v23  ;;  %v4740_v48 = vadd.f32 1.0, %v6613_v45  ;;  %v4024_v45 = vadd.f32 %v8613_v2, %v8698_v3  ;;  %v5528_v44 = vmul.f32 -1.442695, %v4026_v19 }
 0x742   : > { %v6617_v52 = vpop.eup %6616  ;;  %6636 = vrcp.f32 %v4736_v1  ;;  %v4737_v33 = vadd.f32 1.0, %v6615_v25  ;;  %v5742_v37 = vpop.f32.mrb[160].mxu1  ;;  %v5520_v25 = vmul.f32 -1.442695, %v4018_v29 }
 0x743   : > { %v6619_v51 = vpop.eup %6618  ;;  %6638 = vrcp.f32 %v4740_v48  ;;  %v4741_v13 = vadd.f32 1.0, %v6617_v52  ;;  %v5743_v50 = vpop.f32.mrb[161].mxu1  ;;  %v5527_v17 = vmul.f32 -1.442695, %v4024_v45 }
 0x744   : > { %v6621_v39 = vpop.eup %6620  ;;  %6640 = vrcp.f32 %v4737_v33  ;;  %v4743_v22 = vadd.f32 1.0, %v6619_v51  ;;  %v8757_v47 = vadd.f32 %v5743_v50, %v5742_v37  ;;  %v5745_v63 = vpop.f32.mrb[162].mxu1  ;;  %v5521_v33 = vmul.f32 -1.442695, %v4020_v27 }
 0x745   : > { %v6623_v31 = vpop.eup %6622  ;;  %6642 = vrcp.f32 %v4741_v13  ;;  %v4747_v35 = vadd.f32 1.0, %v6621_v39  ;;  %v5746_v14 = vpop.f32.mrb[163].mxu1  ;;  %v5524_v51 = vmul.f32 -1.442695, %v4243_v11  ;;  %v4028_v13 = vadd.f32 %v8617_v56, %v8698_v3 }
 0x746   : > { %v6625_v62 = vpop.eup %6624  ;;  %6644 = vrcp.f32 %v4743_v22  ;;  %v4744_v61 = vadd.f32 1.0, %v6623_v31  ;;  %v8764_v48 = vadd.f32 %v5746_v14, %v5745_v63  ;;  %v4030_v22 = vadd.f32 %v8621_v0, %v8732_v5 }
 0x747   : > { %v6627_v26 = vpop.eup %6626  ;;  %6646 = vrcp.f32 %v4747_v35  ;;  %v4748_v42 = vadd.f32 1.0, %v6625_v62  ;;  %v4251_v31 = vadd.f32 %v8624_v57, %v8740_v18  ;;  %v5531_v56 = vmul.f32 -1.442695, %v4248_v9 }
 0x748   : > { %v6629_v53 = vpop.eup %6628  ;;  %6648 = vrcp.f32 %v4744_v61  ;;  %v4640_v23 = vadd.f32 1.0, %v6627_v26  ;;  %v4034_v37 = vadd.f32 %v8629_v20, %v8698_v3  ;;  %v5534_v0 = vmul.f32 -1.442695, %v4028_v13 }
 0x749   : > { %v6631_v1 = vpop.eup %6630  ;;  %5065 = vst [vmem:[%s8435_s19 + $0x2d8] sm:$0xff] %v6629_v53  ;;  %6650 = vrcp.f32 %v4748_v42  ;;  %v5535_v26 = vmul.f32 -1.442695, %v4030_v22  ;;  %v5538_v11 = vmul.f32 -1.442695, %v4251_v31 }
 0x74a   : > { %v6633_v52 = vpop.eup %6632  ;;  %5069 = vst [vmem:[%s8435_s19 + $0x2f8] sm:$0xff] %v6631_v1  ;;  %6652 = vrcp.f32 %v4640_v23  ;;  %v5748_v35 = vpop.f32.mrb[164].mxu1 }
 0x74b   : > { %v6635_v2 = vpop.eup %6634  ;;  %5066 = vst [vmem:[%s8435_s19 + $0x2e0] sm:$0xff] %v6633_v52  ;;  %6654 = vpow2.f32 %v5514_v43  ;;  %v5749_v62 = vpop.f32.mrb[165].mxu1  ;;  %v4036_v43 = vadd.f32 %v8633_v24, %v8732_v5  ;;  %v5541_v24 = vmul.f32 -1.442695, %v4034_v37 }
 0x74c   : > { %v6637_v39 = vpop.eup %6636  ;;  %5070 = vst [vmem:[%s8435_s19 + $0x300] sm:$0xff] %v6635_v2  ;;  %6656 = vpow2.f32 %v5517_v36  ;;  %v8784_v57 = vadd.f32 %v5749_v62, %v5748_v35  ;;  %v5751_v27 = vpop.f32.mrb[166].mxu1 }
 0x74d   : > { %v6639_v4 = vpop.eup %6638  ;;  %5072 = vst [vmem:[%s8435_s19 + $0x310] sm:$0xff] %v6637_v39  ;;  %6658 = vpow2.f32 %v5520_v25  ;;  %v5752_v42 = vpop.f32.mrb[167].mxu1  ;;  %v5542_v36 = vmul.f32 -1.442695, %v4036_v43 }
 0x74e   : > { %v6641_v29 = vpop.eup %6640  ;;  %5076 = vst [vmem:[%s8435_s19 + $0x330] sm:$0xff] %v6639_v4  ;;  %6660 = vpow2.f32 %v5521_v33  ;;  %v8788_v63 = vadd.f32 %v5752_v42, %v5751_v27  ;;  %v4040_v42 = vadd.f32 %v8641_v16, %v8732_v5 }
 0x74f   : > { %v6643_v61 = vpop.eup %6642  ;;  %5073 = vst [vmem:[%s8435_s19 + $0x318] sm:$0xff] %v6641_v29  ;;  %6662 = vpow2.f32 %v5524_v51 }
 0x750   : > { %v6645_v50 = vpop.eup %6644  ;;  %5077 = vst [vmem:[%s8435_s19 + $0x338] sm:$0xff] %v6643_v61  ;;  %6664 = vpow2.f32 %v5527_v17  ;;  %v4038_v61 = vadd.f32 %v8637_v7, %v8698_v3 }
 0x751   : > { %v6647_v20 = vpop.eup %6646  ;;  %5079 = vst [vmem:[%s8435_s19 + $0x348] sm:$0xff] %v6645_v50  ;;  %6666 = vpow2.f32 %v5528_v44 }
 0x752   : > { %v6649_v53 = vpop.eup %6648  ;;  %5083 = vst [vmem:[%s8435_s19 + $0x368] sm:$0xff] %v6647_v20  ;;  %6668 = vpow2.f32 %v5531_v56  ;;  %v5754_v1 = vpop.f32.mrb[168].mxu1 }
 0x753   : > { %v6651_v23 = vpop.eup %6650  ;;  %5080 = vst [vmem:[%s8435_s19 + $0x350] sm:$0xff] %v6649_v53  ;;  %6670 = vpow2.f32 %v5534_v0  ;;  %v5755_v52 = vpop.f32.mrb[169].mxu1 }
 0x754   : > { %v6653_v45 = vpop.eup %6652  ;;  %5084 = vst [vmem:[%s8435_s19 + $0x370] sm:$0xff] %v6651_v23  ;;  %6672 = vpow2.f32 %v5535_v26  ;;  %v8794_v2 = vadd.f32 %v5755_v52, %v5754_v1  ;;  %v5757_v51 = vpop.f32.mrb[170].mxu1  ;;  %v4046_v1 = vadd.f32 %v8657_v54, %v8732_v5  ;;  %v4048_v52 = vadd.f32 %v8661_v12, %v8698_v3 }
 0x755   : > { %v6655_v14 = vpop.eup %6654  ;;  %4976 = vst [vmem:[%s8435_s19 + $0x10] sm:$0xff] %v6653_v45  ;;  %6674 = vpow2.f32 %v5538_v11  ;;  %v5758_v17 = vpop.f32.mrb[171].mxu1 }
 0x756   : > { %v6657_v25 = vpop.eup %6656  ;;  %v4641_v19 = vadd.f32 1.0, %v6655_v14  ;;  %6676 = vpow2.f32 %v5541_v24  ;;  %v8796_v44 = vadd.f32 %v5758_v17, %v5757_v51  ;;  %v4044_v24 = vadd.f32 %v8653_v49, %v8698_v3 }
 0x757   : > { %v6659_v33 = vpop.eup %6658  ;;  %v4644_v9 = vadd.f32 1.0, %v6657_v25  ;;  %6678 = vpow2.f32 %v5542_v36  ;;  %v5548_v14 = vmul.f32 -1.442695, %v4038_v61  ;;  %v5549_v51 = vmul.f32 -1.442695, %v4040_v42 }
 0x758   : > { %v6661_v13 = vpop.eup %6660  ;;  %6680 = vrcp.f32 %v4641_v19  ;;  %v4647_v39 = vadd.f32 1.0, %v6659_v33  ;;  %v5555_v54 = vmul.f32 -1.442695, %v4044_v24  ;;  %v4054_v17 = vadd.f32 %v8667_v32, %v8698_v3 }
 0x759   : > { %v6663_v22 = vpop.eup %6662  ;;  %6682 = vrcp.f32 %v4644_v9  ;;  %v4648_v4 = vadd.f32 1.0, %v6661_v13  ;;  %v4050_v13 = vadd.f32 %v8664_v6, %v8732_v5  ;;  %v5556_v12 = vmul.f32 -1.442695, %v4046_v1 }
 0x75a   : > { %v6665_v31 = vpop.eup %6664  ;;  %6684 = vrcp.f32 %v4647_v39  ;;  %v4651_v35 = vadd.f32 1.0, %v6663_v22  ;;  %v5760_v27 = vpop.f32.mrb[172].mxu1  ;;  %v5562_v6 = vmul.f32 -1.442695, %v4048_v52 }
 0x75b   : > { %v6667_v29 = vpop.eup %6666  ;;  %6686 = vrcp.f32 %v4648_v4  ;;  %v4654_v56 = vadd.f32 1.0, %v6665_v31  ;;  %v5761_v20 = vpop.f32.mrb[173].mxu1  ;;  %v4056_v4 = vadd.f32 %v8669_v8, %v8732_v5  ;;  %v5563_v32 = vmul.f32 -1.442695, %v4050_v13 }
 0x75c   : > { %v6669_v37 = vpop.eup %6668  ;;  %6688 = vrcp.f32 %v4651_v35  ;;  %v4655_v62 = vadd.f32 1.0, %v6667_v29  ;;  %v8804_v23 = vadd.f32 %v5761_v20, %v5760_v27  ;;  %v5763_v7 = vpop.f32.mrb[174].mxu1  ;;  %v4058_v35 = vadd.f32 %v8671_v10, %v8698_v3 }
 0x75d   : > { %v6671_v0 = vpop.eup %6670  ;;  %6690 = vrcp.f32 %v4654_v56  ;;  %v4658_v43 = vadd.f32 1.0, %v6669_v37  ;;  %v5764_v25 = vpop.f32.mrb[175].mxu1  ;;  %v4060_v37 = vadd.f32 %v8673_v28, %v8732_v5  ;;  %v5569_v8 = vmul.f32 -1.442695, %v4054_v17 }
 0x75e   : > { %v6673_v50 = vpop.eup %6672  ;;  %6692 = vrcp.f32 %v4655_v62  ;;  %v4661_v26 = vadd.f32 1.0, %v6671_v0  ;;  %v8810_v49 = vadd.f32 %v5764_v25, %v5763_v7  ;;  %v4064_v0 = vadd.f32 %v8677_v21, %v8698_v3 }
 0x75f   : > { %v6675_v11 = vpop.eup %6674  ;;  %6694 = vrcp.f32 %v4658_v43  ;;  %v4662_v53 = vadd.f32 1.0, %v6673_v50  ;;  %v5570_v50 = vmul.f32 -1.442695, %v4056_v4  ;;  %v4066_v28 = vadd.f32 %v8680_v58, %v8732_v5 }
 0x760   : > { %v6677_v36 = vpop.eup %6676  ;;  %6696 = vrcp.f32 %v4661_v26  ;;  %v4665_v45 = vadd.f32 1.0, %v6675_v11  ;;  %v5576_v20 = vmul.f32 -1.442695, %v4058_v35  ;;  %v4068_v21 = vadd.f32 %v8684_v38, %v8698_v3 }
 0x761   : > { %v6679_v16 = vpop.eup %6678  ;;  %6698 = vrcp.f32 %v4662_v53  ;;  %v4668_v19 = vadd.f32 1.0, %v6677_v36  ;;  %v5577_v24 = vmul.f32 -1.442695, %v4060_v37  ;;  %v5583_v58 = vmul.f32 -1.442695, %v4064_v0 }
 0x762   : > { %v6681_v33 = vpop.eup %6680  ;;  %6700 = vrcp.f32 %v4665_v45  ;;  %v4669_v9 = vadd.f32 1.0, %v6679_v16  ;;  %v5766_v29 = vpop.f32.mrb[176].mxu1  ;;  %v5584_v45 = vmul.f32 -1.442695, %v4066_v28  ;;  %v5590_v38 = vmul.f32 -1.442695, %v4068_v21 }
 0x763   : > { %v6683_v39 = vpop.eup %6682  ;;  %4977 = vst [vmem:[%s8435_s19 + $0x18] sm:$0xff] %v6681_v33  ;;  %6702 = vrcp.f32 %v4668_v19  ;;  %v5767_v62 = vpop.f32.mrb[177].mxu1 }
 0x764   : > { %v6685_v22 = vpop.eup %6684  ;;  %4980 = vst [vmem:[%s8435_s19 + $0x30] sm:$0xff] %v6683_v39  ;;  %6704 = vrcp.f32 %v4669_v9  ;;  %v8829_v10 = vadd.f32 %v5767_v62, %v5766_v29  ;;  %v5769_v43 = vpop.f32.mrb[178].mxu1 }
 0x765   : > { %v6687_v31 = vpop.eup %6686  ;;  %4983 = vst [vmem:[%s8435_s19 + $0x48] sm:$0xff] %v6685_v22  ;;  %6706 = vpow2.f32 %v5548_v14  ;;  %v5770_v26 = vpop.f32.mrb[179].mxu1 }
 0x766   : > { %v6689_v56 = vpop.eup %6688  ;;  %4984 = vst [vmem:[%s8435_s19 + $0x50] sm:$0xff] %v6687_v31  ;;  %6708 = vpow2.f32 %v5549_v51  ;;  %v8837_v11 = vadd.f32 %v5770_v26, %v5769_v43 }
 0x767   : > { %v6691_v61 = vpop.eup %6690  ;;  %4987 = vst [vmem:[%s8435_s19 + $0x68] sm:$0xff] %v6689_v56  ;;  %6710 = vpow2.f32 %v5555_v54 }
 0x768   : > { %v6693_v27 = vpop.eup %6692  ;;  %4990 = vst [vmem:[%s8435_s19 + $0x80] sm:$0xff] %v6691_v61  ;;  %6712 = vpow2.f32 %v5556_v12  ;;  %v4070_v61 = vadd.f32 %v8688_v60, %v8732_v5  ;;  %v4080_v60 = vadd.f32 %v8724_v59, %v8732_v5 }
 0x769   : > { %v6695_v42 = vpop.eup %6694  ;;  %4991 = vst [vmem:[%s8435_s19 + $0x88] sm:$0xff] %v6693_v27  ;;  %6714 = vpow2.f32 %v5562_v6 }
 0x76a   : > { %v6697_v53 = vpop.eup %6696  ;;  %4994 = vst [vmem:[%s8435_s19 + $0xa0] sm:$0xff] %v6695_v42  ;;  %6716 = vpow2.f32 %v5563_v32  ;;  %v5772_v3 = vpop.f32.mrb[180].mxu1  ;;  %v5591_v21 = vmul.f32 -1.442695, %v4070_v61 }
 0x76b   : > { %v6699_v7 = vpop.eup %6698  ;;  %4997 = vst [vmem:[%s8435_s19 + $0xb8] sm:$0xff] %v6697_v53  ;;  %6718 = vpow2.f32 %v5569_v8  ;;  %v5773_v25 = vpop.f32.mrb[181].mxu1 }
 0x76c   : > { %v6701_v36 = vpop.eup %6700  ;;  %4998 = vst [vmem:[%s8435_s19 + $0xc0] sm:$0xff] %v6699_v7  ;;  %6720 = vpow2.f32 %v5570_v50  ;;  %v8845_v19 = vadd.f32 %v5773_v25, %v5772_v3  ;;  %v5775_v52 = vpop.f32.mrb[182].mxu1  ;;  %v4076_v50 = vadd.f32 %v8715_v15, %v8732_v5  ;;  %v5597_v7 = vmul.f32 -1.442695, %v8713_v40 }
 0x76d   : > { %v6703_v14 = vpop.eup %6702  ;;  %5001 = vst [vmem:[%s8435_s19 + $0xd8] sm:$0xff] %v6701_v36  ;;  %6722 = vpow2.f32 %v5576_v20  ;;  %v5776_v51 = vpop.f32.mrb[183].mxu1  ;;  %v4086_v36 = vadd.f32 %v8737_v34, %v8732_v5  ;;  %v4090_v40 = vadd.f32 %v8745_v41, %v8732_v5  ;;  %v5611_v34 = vmul.f32 -1.442695, %v8735_v55 }
 0x76e   : > { %v6705_v1 = vpop.eup %6704  ;;  %5004 = vst [vmem:[%s8435_s19 + $0xf0] sm:$0xff] %v6703_v14  ;;  %6724 = vpow2.f32 %v5577_v24  ;;  %v8847_v54 = vadd.f32 %v5776_v51, %v5775_v52  ;;  %v5598_v15 = vmul.f32 -1.442695, %v4076_v50  ;;  %v5604_v14 = vmul.f32 -1.442695, %v8722_v30 }
 0x76f   : > { %v6707_v16 = vpop.eup %6706  ;;  %5005 = vst [vmem:[%s8435_s19 + $0xf8] sm:$0xff] %v6705_v1  ;;  %6726 = vpow2.f32 %v5583_v58  ;;  %v4256_v1 = vadd.f32 %v8757_v47, %v8740_v18  ;;  %v5612_v30 = vmul.f32 -1.442695, %v4086_v36  ;;  %v5618_v5 = vmul.f32 -1.442695, %v8743_v46 }
 0x770   : > { %v6709_v33 = vpop.eup %6708  ;;  %v4675_v9 = vadd.f32 1.0, %v6707_v16  ;;  %6728 = vpow2.f32 %v5584_v45  ;;  %v4259_v16 = vadd.f32 %v8764_v48, %v8740_v18  ;;  %v4264_v55 = vadd.f32 %v8784_v57, %v8740_v18 }
 0x771   : > { %v6711_v13 = vpop.eup %6710  ;;  %v4676_v39 = vadd.f32 1.0, %v6709_v33  ;;  %6730 = vpow2.f32 %v5590_v38  ;;  %v5605_v38 = vmul.f32 -1.442695, %v4080_v60  ;;  %v5619_v47 = vmul.f32 -1.442695, %v4090_v40 }
 0x772   : > { %v6713_v17 = vpop.eup %6712  ;;  %6732 = vrcp.f32 %v4675_v9  ;;  %v4682_v22 = vadd.f32 1.0, %v6711_v13  ;;  %v4267_v33 = vadd.f32 %v8788_v63, %v8740_v18  ;;  %v5545_v48 = vmul.f32 -1.442695, %v4256_v1 }
 0x773   : > { %v6715_v12 = vpop.eup %6714  ;;  %6734 = vrcp.f32 %v4676_v39  ;;  %v4683_v4 = vadd.f32 1.0, %v6713_v17  ;;  %v5552_v46 = vmul.f32 -1.442695, %v4259_v16  ;;  %v5559_v57 = vmul.f32 -1.442695, %v4264_v55 }
 0x774   : > { %v6717_v31 = vpop.eup %6716  ;;  %6736 = vrcp.f32 %v4682_v22  ;;  %v4689_v6 = vadd.f32 1.0, %v6715_v12  ;;  %v5566_v17 = vmul.f32 -1.442695, %v4267_v33  ;;  %v4296_v40 = vadd.f32 %v8845_v19, %v8740_v18 }
 0x775   : > { %v6719_v35 = vpop.eup %6718  ;;  %6738 = vrcp.f32 %v4683_v4  ;;  %v4690_v29 = vadd.f32 1.0, %v6717_v31 }
 0x776   : > { %v6721_v56 = vpop.eup %6720  ;;  %6740 = vrcp.f32 %v4689_v6  ;;  %v4696_v32 = vadd.f32 1.0, %v6719_v35  ;;  %v5615_v16 = vmul.f32 -1.442695, %v4296_v40 }
 0x777   : > { %v6723_v37 = vpop.eup %6722  ;;  %6742 = vrcp.f32 %v4690_v29  ;;  %v4697_v62 = vadd.f32 1.0, %v6721_v56 }
 0x778   : > { %v6725_v8 = vpop.eup %6724  ;;  %6744 = vrcp.f32 %v4696_v32  ;;  %v4703_v0 = vadd.f32 1.0, %v6723_v37 }
 0x779   : > { %v6727_v43 = vpop.eup %6726  ;;  %6746 = vrcp.f32 %v4697_v62  ;;  %v4704_v27 = vadd.f32 1.0, %v6725_v8 }
 0x77a   : > { %v6729_v28 = vpop.eup %6728  ;;  %6748 = vrcp.f32 %v4703_v0  ;;  %v4710_v26 = vadd.f32 1.0, %v6727_v43 }
 0x77b   : > { %v6731_v42 = vpop.eup %6730  ;;  %6750 = vrcp.f32 %v4704_v27  ;;  %v4711_v20 = vadd.f32 1.0, %v6729_v28  ;;  %v4272_v28 = vadd.f32 %v8794_v2, %v8740_v18 }
 0x77c   : > { %v6733_v53 = vpop.eup %6732  ;;  %6752 = vrcp.f32 %v4710_v26  ;;  %v4717_v24 = vadd.f32 1.0, %v6731_v42 }
 0x77d   : > { %v6735_v58 = vpop.eup %6734  ;;  %5011 = vst [vmem:[%s8435_s19 + $0x128] sm:$0xff] %v6733_v53  ;;  %6754 = vrcp.f32 %v4711_v20  ;;  %v4275_v20 = vadd.f32 %v8796_v44, %v8740_v18  ;;  %v4280_v53 = vadd.f32 %v8804_v23, %v8740_v18  ;;  %v5573_v36 = vmul.f32 -1.442695, %v4272_v28 }
 0x77e   : > { %v6737_v45 = vpop.eup %6736  ;;  %5012 = vst [vmem:[%s8435_s19 + $0x130] sm:$0xff] %v6735_v58  ;;  %6756 = vrcp.f32 %v4717_v24  ;;  %v4283_v58 = vadd.f32 %v8810_v49, %v8740_v18  ;;  %v4288_v44 = vadd.f32 %v8829_v10, %v8740_v18 }
 0x77f   : > { %v6739_v59 = vpop.eup %6738  ;;  %5018 = vst [vmem:[%s8435_s19 + $0x160] sm:$0xff] %v6737_v45  ;;  %6758 = vpow2.f32 %v5591_v21  ;;  %v5580_v23 = vmul.f32 -1.442695, %v4275_v20  ;;  %v5587_v49 = vmul.f32 -1.442695, %v4280_v53 }
 0x780   : > { %v6741_v3 = vpop.eup %6740  ;;  %5019 = vst [vmem:[%s8435_s19 + $0x168] sm:$0xff] %v6739_v59  ;;  %6760 = vpow2.f32 %v5597_v7  ;;  %v4291_v59 = vadd.f32 %v8837_v11, %v8740_v18  ;;  %v5594_v10 = vmul.f32 -1.442695, %v4283_v58  ;;  %v5601_v11 = vmul.f32 -1.442695, %v4288_v44 }
 0x781   : > { %v6743_v25 = vpop.eup %6742  ;;  %5025 = vst [vmem:[%s8435_s19 + $0x198] sm:$0xff] %v6741_v3  ;;  %6762 = vpow2.f32 %v5598_v15 }
 0x782   : > { %v6745_v52 = vpop.eup %6744  ;;  %5026 = vst [vmem:[%s8435_s19 + $0x1a0] sm:$0xff] %v6743_v25  ;;  %6764 = vpow2.f32 %v5604_v14 }
 0x783   : > { %v6747_v41 = vpop.eup %6746  ;;  %5032 = vst [vmem:[%s8435_s19 + $0x1d0] sm:$0xff] %v6745_v52  ;;  %6766 = vpow2.f32 %v5605_v38 }
 0x784   : > { %v6749_v9 = vpop.eup %6748  ;;  %5033 = vst [vmem:[%s8435_s19 + $0x1d8] sm:$0xff] %v6747_v41  ;;  %6768 = vpow2.f32 %v5611_v34  ;;  %v4299_v34 = vadd.f32 %v8847_v54, %v8740_v18 }
 0x785   : > { %v6751_v51 = vpop.eup %6750  ;;  %5039 = vst [vmem:[%s8435_s19 + $0x208] sm:$0xff] %v6749_v9  ;;  %6770 = vpow2.f32 %v5612_v30  ;;  %v5608_v30 = vmul.f32 -1.442695, %v4291_v59 }
 0x786   : > { %v6753_v13 = vpop.eup %6752  ;;  %5040 = vst [vmem:[%s8435_s19 + $0x210] sm:$0xff] %v6751_v51  ;;  %6772 = vpow2.f32 %v5618_v5  ;;  %v5622_v18 = vmul.f32 -1.442695, %v4299_v34 }
 0x787   : > { %v6755_v39 = vpop.eup %6754  ;;  %5046 = vst [vmem:[%s8435_s19 + $0x240] sm:$0xff] %v6753_v13  ;;  %6774 = vpow2.f32 %v5619_v47 }
 0x788   : > { %v6757_v22 = vpop.eup %6756  ;;  %5047 = vst [vmem:[%s8435_s19 + $0x248] sm:$0xff] %v6755_v39  ;;  %6776 = vpow2.f32 %v5545_v48 }
 0x789   : > { %v6759_v63 = vpop.eup %6758  ;;  %5053 = vst [vmem:[%s8435_s19 + $0x278] sm:$0xff] %v6757_v22  ;;  %6778 = vpow2.f32 %v5552_v46 }
 0x78a   : > { %v6761_v12 = vpop.eup %6760  ;;  %v4718_v4 = vadd.f32 1.0, %v6759_v63  ;;  %6780 = vpow2.f32 %v5559_v57 }
 0x78b   : > { %v6763_v31 = vpop.eup %6762  ;;  %v4724_v6 = vadd.f32 1.0, %v6761_v12  ;;  %6782 = vpow2.f32 %v5566_v17 }
 0x78c   : > { %v6765_v35 = vpop.eup %6764  ;;  %6784 = vrcp.f32 %v4718_v4  ;;  %v4725_v29 = vadd.f32 1.0, %v6763_v31 }
 0x78d   : > { %v6767_v56 = vpop.eup %6766  ;;  %6786 = vrcp.f32 %v4724_v6  ;;  %v4731_v32 = vadd.f32 1.0, %v6765_v35 }
 0x78e   : > { %v6769_v37 = vpop.eup %6768  ;;  %6788 = vrcp.f32 %v4725_v29  ;;  %v4732_v62 = vadd.f32 1.0, %v6767_v56 }
 0x78f   : > { %v6771_v61 = vpop.eup %6770  ;;  %6790 = vrcp.f32 %v4731_v32  ;;  %v4738_v8 = vadd.f32 1.0, %v6769_v37 }
 0x790   : > { %v6773_v0 = vpop.eup %6772  ;;  %6792 = vrcp.f32 %v4732_v62  ;;  %v4739_v43 = vadd.f32 1.0, %v6771_v61 }
 0x791   : > { %v6775_v27 = vpop.eup %6774  ;;  %6794 = vrcp.f32 %v4738_v8  ;;  %v4745_v50 = vadd.f32 1.0, %v6773_v0 }
 0x792   : > { %v6777_v26 = vpop.eup %6776  ;;  %6796 = vrcp.f32 %v4739_v43  ;;  %v4746_v42 = vadd.f32 1.0, %v6775_v27 }
 0x793   : > { %v6779_v21 = vpop.eup %6778  ;;  %6798 = vrcp.f32 %v4745_v50  ;;  %v4672_v60 = vadd.f32 1.0, %v6777_v26 }
 0x794   : > { %v6781_v24 = vpop.eup %6780  ;;  %6800 = vrcp.f32 %v4746_v42  ;;  %v4679_v7 = vadd.f32 1.0, %v6779_v21 }
 0x795   : > { %v6783_v2 = vpop.eup %6782  ;;  %6802 = vrcp.f32 %v4672_v60  ;;  %v4686_v15 = vadd.f32 1.0, %v6781_v24 }
 0x796   : > { %v6785_v45 = vpop.eup %6784  ;;  %6804 = vrcp.f32 %v4679_v7  ;;  %v4693_v14 = vadd.f32 1.0, %v6783_v2 }
 0x797   : > { %v6787_v38 = vpop.eup %6786  ;;  %5054 = vst [vmem:[%s8435_s19 + $0x280] sm:$0xff] %v6785_v45  ;;  %6806 = vrcp.f32 %v4686_v15 }
 0x798   : > { %v6789_v3 = vpop.eup %6788  ;;  %5060 = vst [vmem:[%s8435_s19 + $0x2b0] sm:$0xff] %v6787_v38  ;;  %6808 = vrcp.f32 %v4693_v14 }
 0x799   : > { %v6791_v1 = vpop.eup %6790  ;;  %5061 = vst [vmem:[%s8435_s19 + $0x2b8] sm:$0xff] %v6789_v3  ;;  %6810 = vpow2.f32 %v5573_v36 }
 0x79a   : > { %v6793_v25 = vpop.eup %6792  ;;  %5067 = vst [vmem:[%s8435_s19 + $0x2e8] sm:$0xff] %v6791_v1  ;;  %6812 = vpow2.f32 %v5580_v23 }
 0x79b   : > { %v6795_v19 = vpop.eup %6794  ;;  %5068 = vst [vmem:[%s8435_s19 + $0x2f0] sm:$0xff] %v6793_v25  ;;  %6814 = vpow2.f32 %v5587_v49 }
 0x79c   : > { %v6797_v52 = vpop.eup %6796  ;;  %5074 = vst [vmem:[%s8435_s19 + $0x320] sm:$0xff] %v6795_v19  ;;  %6816 = vpow2.f32 %v5594_v10 }
 0x79d   : > { %v6799_v54 = vpop.eup %6798  ;;  %5075 = vst [vmem:[%s8435_s19 + $0x328] sm:$0xff] %v6797_v52  ;;  %6818 = vpow2.f32 %v5601_v11 }
 0x79e   : > { %v6801_v5 = vpop.eup %6800  ;;  %5081 = vst [vmem:[%s8435_s19 + $0x358] sm:$0xff] %v6799_v54  ;;  %6820 = vpow2.f32 %v5608_v30 }
 0x79f   : > { %v6803_v55 = vpop.eup %6802  ;;  %5082 = vst [vmem:[%s8435_s19 + $0x360] sm:$0xff] %v6801_v5  ;;  %6822 = vpow2.f32 %v5615_v16 }
 0x7a0   : > { %v6805_v41 = vpop.eup %6804  ;;  %5008 = vst [vmem:[%s8435_s19 + $0x110] sm:$0xff] %v6803_v55  ;;  %6824 = vpow2.f32 %v5622_v18 }
 0x7a1   : > { %v6807_v47 = vpop.eup %6806  ;;  %5015 = vst [vmem:[%s8435_s19 + $0x148] sm:$0xff] %v6805_v41 }
 0x7a2   : > { %v6809_v33 = vpop.eup %6808  ;;  %5022 = vst [vmem:[%s8435_s19 + $0x180] sm:$0xff] %v6807_v47 }
 0x7a3   : > { %v6811_v9 = vpop.eup %6810  ;;  %5029 = vst [vmem:[%s8435_s19 + $0x1b8] sm:$0xff] %v6809_v33 }
 0x7a4   : > { %v6813_v48 = vpop.eup %6812  ;;  %v4700_v51 = vadd.f32 1.0, %v6811_v9 }
 0x7a5   : > { %v6815_v46 = vpop.eup %6814  ;;  %v4707_v13 = vadd.f32 1.0, %v6813_v48 }
 0x7a6   : > { %v6817_v57 = vpop.eup %6816  ;;  %6826 = vrcp.f32 %v4700_v51  ;;  %v4714_v39 = vadd.f32 1.0, %v6815_v46 }
 0x7a7   : > { %v6819_v17 = vpop.eup %6818  ;;  %6828 = vrcp.f32 %v4707_v13  ;;  %v4721_v22 = vadd.f32 1.0, %v6817_v57 }
 0x7a8   : > { %v6821_v63 = vpop.eup %6820  ;;  %6830 = vrcp.f32 %v4714_v39  ;;  %v4728_v12 = vadd.f32 1.0, %v6819_v17 }
 0x7a9   : > { %v6823_v4 = vpop.eup %6822  ;;  %6832 = vrcp.f32 %v4721_v22  ;;  %v4735_v31 = vadd.f32 1.0, %v6821_v63 }
 0x7aa   : > { %v6825_v6 = vpop.eup %6824  ;;  %6834 = vrcp.f32 %v4728_v12  ;;  %v4742_v35 = vadd.f32 1.0, %v6823_v4 }
 0x7ab   : > { %6836 = vrcp.f32 %v4735_v31  ;;  %v4749_v29 = vadd.f32 1.0, %v6825_v6 }
 0x7ac   : > { %6838 = vrcp.f32 %v4742_v35 }
 0x7ad   : > { %6840 = vrcp.f32 %v4749_v29 }
 0x7b0   : > { %v6827_v56 = vpop.eup %6826 }
 0x7b1   : > { %v6829_v32 = vpop.eup %6828  ;;  %5036 = vst [vmem:[%s8435_s19 + $0x1f0] sm:$0xff] %v6827_v56 }
 0x7b2   : > { %v6831_v37 = vpop.eup %6830  ;;  %5043 = vst [vmem:[%s8435_s19 + $0x228] sm:$0xff] %v6829_v32 }
 0x7b3   : > { %v6833_v62 = vpop.eup %6832  ;;  %5050 = vst [vmem:[%s8435_s19 + $0x260] sm:$0xff] %v6831_v37 }
 0x7b4   : > { %v6835_v61 = vpop.eup %6834  ;;  %5057 = vst [vmem:[%s8435_s19 + $0x298] sm:$0xff] %v6833_v62 }
 0x7b5   : > { %v6837_v8 = vpop.eup %6836  ;;  %5064 = vst [vmem:[%s8435_s19 + $0x2d0] sm:$0xff] %v6835_v61 }
 0x7b6   : > { %v6839_v0 = vpop.eup %6838  ;;  %5071 = vst [vmem:[%s8435_s19 + $0x308] sm:$0xff] %v6837_v8 }
 0x7b7   : > { %v6841_v43 = vpop.eup %6840  ;;  %5078 = vst [vmem:[%s8435_s19 + $0x340] sm:$0xff] %v6839_v0 }
 0x7b8   : > { %5085 = vst [vmem:[%s8435_s19 + $0x378] sm:$0xff] %v6841_v43 }
 0x7b9 PF: > { %s28_s24 = sadd.s32 1, %s6849_s24  }
 0x7ba   : > { %p25_p4 = scmp.ge.s32.totalorder %s28_s24, 4  }
 0x7bc   :  { %27 = sbr.rel (!%p25_p4) target bundleno = 3 (0x3), region = 132 }

</bundles_post_ra>
